<compile_context>
chip_gen: v7x
topology: tpu7x:2x2x1
jax: 0.10.0
libtpu: 0.0.40
codegen_flags: <defaults>
</compile_context>

<pallas_src>
import functools

import jax
import jax.numpy as jnp
import numpy as np
from jax.experimental import pallas as pl
from jax.experimental.pallas import tpu as pltpu

# hp-equivalent config (small, synthetic; deterministic in-script init)
ENC_SIZE = 32      # hp.encoder_output_size
FILTER = 32        # hp.duration_predictor_filter_size
KERNEL = 3         # hp.duration_predictor_kernel_size
DROPOUT = 0.1      # eval mode -> dropout is identity

# Static cap for the device-side expansion when mel_max_length is None.
# TODO(synk): the reference output length is data dependent; we expand on
# device into a statically sized, zero-padded buffer and slice to the true
# length on the host (single int32 scalar sync).
MAX_MEL_LEN = 2048
EXPAND_BLOCK = 256          # output rows per expansion grid step


# ---------------------------------------------------------------------------
# Kernel 1: DurationPredictor + eval epilogue -> int32 repeat counts
# ---------------------------------------------------------------------------
def _duration_reps_kernel(x_ref, m_ref, w_ref, v_ref, o_ref, *, alpha):
    """One batch element.

    x_ref, m_ref : (1, T, C)       encoder output / mask
    w_ref        : (3C + 3F, F)    conv taps [c1_prev; c1_ctr; c1_next;
                                              c2_prev; c2_ctr; c2_next]
    v_ref        : (8, F)          rows [b1, g1, bt1, b2, g2, bt2, wl, bl]
    o_ref        : (1, T, 1) int32 repeat counts = round_half_up(alpha*(e^d-1))+1
    """
    T, C = x_ref.shape[1], x_ref.shape[2]
    F = v_ref.shape[1]
    eps = 1e-5                                   # PyTorch LayerNorm default

    m = m_ref[0]                                 # (T, C)
    x = x_ref[0] * m                             # masked encoder output

    v = v_ref[...]                               # one (8, F) load; slice values
    b1, g1, bt1 = v[0:1, :], v[1:2, :], v[2:3, :]
    b2, g2, bt2 = v[3:4, :], v[4:5, :], v[5:6, :]
    wl = v[6:7, :]                               # Linear(F, 1) weight as a row
    bl = v[7:8, 0:1]                             # Linear bias (scalar)

    # conv zero-padding masks, hoisted (JAX does not CSE broadcast_in_dim).
    rows = jax.lax.broadcasted_iota(jnp.int32, (T, 1), 0)
    not_first = rows != 0
    not_last = rows != T - 1

    def conv3(h, w_prev, w_ctr, w_next, b):
        # y[t] = w_prev @ h[t-1] + w_ctr @ h[t] + w_next @ h[t+1]  (zero padded)
        h_prev = jnp.where(not_first, pltpu.roll(h, 1, axis=0), 0.0)
        h_next = jnp.where(not_last, pltpu.roll(h, T - 1, axis=0), 0.0)
        y = (jnp.dot(h_prev, w_prev, preferred_element_type=jnp.float32)
             + jnp.dot(h, w_ctr, preferred_element_type=jnp.float32)
             + jnp.dot(h_next, w_next, preferred_element_type=jnp.float32))
        return y + b

    def layer_norm(y, g, bt):
        mu = jnp.mean(y, axis=-1, keepdims=True)
        var = jnp.mean((y - mu) ** 2, axis=-1, keepdims=True)
        return (y - mu) * jax.lax.rsqrt(var + eps) * g + bt

    h = conv3(x, w_ref[0:C, :], w_ref[C:2 * C, :], w_ref[2 * C:3 * C, :], b1)
    h = jnp.maximum(layer_norm(h, g1, bt1), 0.0)
    o = 3 * C
    h = conv3(h, w_ref[o:o + F, :], w_ref[o + F:o + 2 * F, :],
              w_ref[o + 2 * F:o + 3 * F, :], b2)
    h = jnp.maximum(layer_norm(h, g2, bt2), 0.0)

    # Linear(F, 1) as VPU multiply + lane reduce (no 1-column MXU matmul).
    d = jnp.sum(h * wl, axis=-1, keepdims=True) + bl          # (T, 1)
    d = jnp.maximum(d * m[:, 0:1], 0.0)                       # mask + ReLU

    # Eval epilogue: duration = exp(d) - 1; reps = round_half_up(dur*alpha) + 1.
    # dur*alpha >= 0, so half-up rounding == floor(x + 0.5).  exp -> EUP slot.
    dur = jnp.exp(d) - 1.0
    reps = jnp.floor(dur * alpha + 0.5).astype(jnp.int32) + 1
    o_ref[0] = reps


def _duration_reps(w_slab, v_slab, encoder_output, encoder_output_mask, alpha):
    B, T, C = encoder_output.shape
    F = v_slab.shape[1]
    kern = functools.partial(_duration_reps_kernel, alpha=float(alpha))
    return pl.pallas_call(
        kern,
        out_shape=jax.ShapeDtypeStruct((B, T, 1), jnp.int32),
        grid=(B,),
        in_specs=[
            pl.BlockSpec((1, T, C), lambda b: (b, 0, 0)),        # encoder_output
            pl.BlockSpec((1, T, C), lambda b: (b, 0, 0)),        # mask
            pl.BlockSpec((3 * C + 3 * F, F), lambda b: (0, 0)),  # conv weight slab
            pl.BlockSpec((8, F), lambda b: (0, 0)),              # vector slab
        ],
        out_specs=pl.BlockSpec((1, T, 1), lambda b: (b, 0, 0)),
        compiler_params=pltpu.CompilerParams(dimension_semantics=("parallel",)),
    )(encoder_output, encoder_output_mask, w_slab, v_slab)


# ---------------------------------------------------------------------------
# Kernel 2: vectorized ragged repeat-expansion (blocked interval-mask select)
# ---------------------------------------------------------------------------
def _expand_kernel(cum_ref, tot_ref, x_ref, o_ref, pos_ref):
    """One BLOCK-row slab of the expanded output.

    cum_ref : (T+1,) int32 SMEM   cum_ref[0]=0, cum_ref[t+1]=sum(reps[:t+1])
    tot_ref : (1,)   int32 SMEM   expanded length clamped to the cap
    x_ref   : (T, C) VMEM         encoder output (one batch element)
    o_ref   : (BLOCK, C) VMEM     expanded rows [j*BLOCK, (j+1)*BLOCK)
    pos_ref : (BLOCK, 1) int32    decoder positions (1-based; 0 in padding)
    """
    T = x_ref.shape[0]
    block = o_ref.shape[0]
    base = pl.program_id(0) * block
    pos = base + jax.lax.broadcasted_iota(jnp.int32, (block, 1), 0)   # (BLOCK,1)

    # out[p] = x[t]  for  cum[t] <= p < cum[t+1].  Rows past cum[T] fall
    # outside every interval and stay zero -> no separate zero init, every
    # output row is stored exactly once.
    acc = jnp.zeros(o_ref.shape, o_ref.dtype)
    for t in range(T):                           # static unroll: T VPU selects
        sel = (pos >= cum_ref[t]) & (pos < cum_ref[t + 1])            # (BLOCK,1)
        acc = jnp.where(sel, x_ref[t:t + 1, :], acc)                  # (BLOCK,C)
    o_ref[...] = acc
    pos_ref[...] = jnp.where(pos < tot_ref[0], pos + 1, 0)


def _expand(cum_ex, total, x2d, buf_len):
    T, C = x2d.shape
    return pl.pallas_call(
        _expand_kernel,
        out_shape=(jax.ShapeDtypeStruct((buf_len, C), x2d.dtype),
                   jax.ShapeDtypeStruct((buf_len, 1), jnp.int32)),
        grid_spec=pltpu.PrefetchScalarGridSpec(
            num_scalar_prefetch=2,
            grid=(buf_len // EXPAND_BLOCK,),
            in_specs=[pl.BlockSpec((T, C), lambda j, cum, tot: (0, 0))],
            out_specs=[
                pl.BlockSpec((EXPAND_BLOCK, C), lambda j, cum, tot: (j, 0)),
                pl.BlockSpec((EXPAND_BLOCK, 1), lambda j, cum, tot: (j, 0)),
            ]),
        compiler_params=pltpu.CompilerParams(dimension_semantics=("parallel",)),
    )(cum_ex, total, x2d)


# ---------------------------------------------------------------------------
# Full device-side eval forward (jit'ed once per (alpha, cap))
# ---------------------------------------------------------------------------
@functools.partial(jax.jit, static_argnames=("alpha", "cap"))
def _device_forward(w_slab, v_slab, encoder_output, encoder_output_mask, *,
                    alpha, cap):
    B, T, C = encoder_output.shape
    buf_len = pl.cdiv(cap, EXPAND_BLOCK) * EXPAND_BLOCK          # static
    reps = _duration_reps(w_slab, v_slab, encoder_output, encoder_output_mask,
                          alpha)                                 # (B, T, 1) int32
    # Reference eval path (squeeze / unsqueeze(0)) assumes B == 1.
    r = reps[0, :, 0]                                            # (T,)
    cum = jnp.cumsum(r)                                          # (T,) int32
    cum_ex = jnp.concatenate([jnp.zeros((1,), jnp.int32), cum])  # (T+1,)
    total = jnp.minimum(cum[-1], cap).astype(jnp.int32)          # clamp to cap
    out_pad, dec_pos_col = _expand(cum_ex, jnp.reshape(total, (1,)),
                                   encoder_output[0], buf_len)
    return out_pad[None], dec_pos_col[:, 0][None], total, reps[:, :, 0]


def length_regulator_forward(params, encoder_output, encoder_output_mask,
                             alpha=1.0, mel_max_length=None):
    """Eval-mode LengthRegulator.forward -> (output, decoder_pos)."""
    # TODO(synk): training-mode branch (LR driven by the provided `target`
    # durations) is not implemented; eval path only, as in the prior version.
    B = encoder_output.shape[0]
    assert B == 1, "eval-mode LengthRegulator assumes batch size 1 (as in reference)"
    cap = int(mel_max_length) if mel_max_length else MAX_MEL_LEN
    out_pad, dec_pos_pad, total, _ = _device_forward(
        params["w_slab"], params["v_slab"], encoder_output, encoder_output_mask,
        alpha=float(alpha), cap=cap)
    if mel_max_length:
        # Reference pads every batch element to mel_max_length (zeros, pos=0);
        # lengths exceeding mel_max_length are truncated instead of erroring.
        return out_pad[:, :cap], dec_pos_pad[:, :cap]
    # Without mel_max_length the reference output length equals the expanded
    # length.  Only this single int32 scalar is synced to the host; the
    # expansion itself already ran on device.
    length = int(total)
    return out_pad[:, :length], dec_pos_pad[:, :length]


# ---------------------------------------------------------------------------
# Deterministic parameter init (mirrors the PyTorch module's __init__),
# packed directly into the two slabs consumed by the kernel.
# ---------------------------------------------------------------------------
def init_params(key):
    ks = jax.random.split(key, 6)
    gain = float(np.sqrt(2.0))  # nn.init.calculate_gain('relu')

    def xavier(k, shape, fan_in, fan_out):
        bound = gain * np.sqrt(6.0 / (fan_in + fan_out))
        return jax.random.uniform(k, shape, jnp.float32, -bound, bound)

    def bias_u(k, shape, fan_in):
        b = 1.0 / np.sqrt(fan_in)
        return jax.random.uniform(k, shape, jnp.float32, -b, b)

    C, F, K = ENC_SIZE, FILTER, KERNEL
    # Conv1d weight torch shape (out=F, in=C, K); stored as K taps of (C, F).
    w1 = xavier(ks[0], (K, C, F), C * K, F * K)
    b1 = bias_u(ks[1], (1, F), C * K)
    w2 = xavier(ks[2], (K, F, F), F * K, F * K)
    b2 = bias_u(ks[3], (1, F), F * K)
    # Linear(F, 1): torch weight (1, F) stored as a row; bias scalar.
    wl = xavier(ks[4], (1, F), F, 1)
    bl = bias_u(ks[5], (1, 1), F)

    ones = jnp.ones((1, F), jnp.float32)
    zeros = jnp.zeros((1, F), jnp.float32)
    w_slab = jnp.concatenate([w1[0], w1[1], w1[2], w2[0], w2[1], w2[2]], axis=0)
    v_slab = jnp.concatenate(
        [b1, ones, zeros,                       # conv1 bias, ln1 gamma, ln1 beta
         b2, ones, zeros,                       # conv2 bias, ln2 gamma, ln2 beta
         wl, jnp.broadcast_to(bl, (1, F))],     # linear weight row, linear bias
        axis=0)
    return dict(w_slab=w_slab, v_slab=v_slab)


# ---------------------------------------------------------------------------
# numpy LR path, retained only as a correctness reference for the device path
# ---------------------------------------------------------------------------
def _lr_host_reference(x_np, reps_np):
    B, T, C = x_np.shape
    expanded = [np.repeat(x_np[i], reps_np[i], axis=0) for i in range(B)]
    max_len = max(e.shape[0] for e in expanded)
    out = np.zeros((B, max_len, C), dtype=x_np.dtype)
    pos = np.zeros((B, max_len), dtype=np.int32)   # torch .long(); int32 here
    for i, e in enumerate(expanded):
        L = e.shape[0]
        out[i, :L] = e
        pos[i, :L] = np.arange(1, L + 1)
    return out, pos


# ---------------------------------------------------------------------------
if __name__ == "__main__":
    key = jax.random.PRNGKey(0)
    kx, kp = jax.random.split(key)

    B, T = 1, 16
    x = jax.random.normal(kx, (B, T, ENC_SIZE), jnp.float32)
    valid = 12
    mask = (jnp.arange(T) < valid).astype(jnp.float32)[None, :, None]
    mask = jnp.broadcast_to(mask, (B, T, ENC_SIZE))

    params = init_params(kp)
    output, decoder_pos = length_regulator_forward(params, x, mask, alpha=1.0)
    jax.block_until_ready(output)
    jax.block_until_ready(decoder_pos)

    # Reference check: device-side vectorized expansion vs. retained numpy LR
    # path, using the same device-computed repeat counts (must match exactly).
    _, _, _, reps = _device_forward(params["w_slab"], params["v_slab"], x, mask,
                                    alpha=1.0, cap=MAX_MEL_LEN)
    ref_out, ref_pos = _lr_host_reference(np.asarray(x), np.asarray(reps))
    np.testing.assert_array_equal(np.asarray(output), ref_out)
    np.testing.assert_array_equal(np.asarray(decoder_pos), ref_pos)

    print("KERNEL_OK")
</pallas_src>

<mosaic_0001>
module attributes {stable_mosaic.version = 11 : i64} {
  func.func @_duration_reps_kernel(%arg0: i32, %arg1: memref<1x16x32xf32, #tpu.memory_space<vmem>>, %arg2: memref<1x16x32xf32, #tpu.memory_space<vmem>>, %arg3: memref<192x32xf32, #tpu.memory_space<vmem>>, %arg4: memref<8x32xf32, #tpu.memory_space<vmem>>, %arg5: memref<1x16x1xi32, #tpu.memory_space<vmem>>) attributes {dimension_semantics = [#tpu.dimension_semantics<parallel>], iteration_bounds = array<i64: 1>, scalar_prefetch = 0 : i64, scratch_operands = 0 : i64, tpu.core_type = #tpu.core_type<tc>, window_params = [{transform_indices = @transform_0, window_bounds = array<i64: 1, 16, 32>}, {transform_indices = @transform_1, window_bounds = array<i64: 1, 16, 32>}, {pipeline_mode = #tpu.pipeline_mode<synchronous>, transform_indices = @transform_2, window_bounds = array<i64: 192, 32>}, {pipeline_mode = #tpu.pipeline_mode<synchronous>, transform_indices = @transform_3, window_bounds = array<i64: 8, 32>}, {transform_indices = @transform_4, window_bounds = array<i64: 1, 16, 1>}]} {
    %c0 = arith.constant 0 : index
    %c0_0 = arith.constant 0 : index
    %c0_1 = arith.constant 0 : index
    %0 = vector.load %arg2[%c0, %c0_0, %c0_1] : memref<1x16x32xf32, #tpu.memory_space<vmem>>, vector<1x16x32xf32>
    %1 = vector.shape_cast %0 : vector<1x16x32xf32> to vector<16x32xf32>
    %c0_2 = arith.constant 0 : index
    %c0_3 = arith.constant 0 : index
    %c0_4 = arith.constant 0 : index
    %2 = vector.load %arg1[%c0_2, %c0_3, %c0_4] : memref<1x16x32xf32, #tpu.memory_space<vmem>>, vector<1x16x32xf32>
    %3 = vector.shape_cast %2 : vector<1x16x32xf32> to vector<16x32xf32>
    %4 = arith.mulf %3, %1 : vector<16x32xf32>
    %c0_5 = arith.constant 0 : index
    %c0_6 = arith.constant 0 : index
    %5 = vector.load %arg4[%c0_5, %c0_6] : memref<8x32xf32, #tpu.memory_space<vmem>>, vector<8x32xf32>
    %6 = vector.extract_strided_slice %5 {offsets = [0, 0], sizes = [1, 32], strides = [1, 1]} : vector<8x32xf32> to vector<1x32xf32>
    %7 = vector.extract_strided_slice %5 {offsets = [1, 0], sizes = [1, 32], strides = [1, 1]} : vector<8x32xf32> to vector<1x32xf32>
    %8 = vector.extract_strided_slice %5 {offsets = [2, 0], sizes = [1, 32], strides = [1, 1]} : vector<8x32xf32> to vector<1x32xf32>
    %9 = vector.extract_strided_slice %5 {offsets = [3, 0], sizes = [1, 32], strides = [1, 1]} : vector<8x32xf32> to vector<1x32xf32>
    %10 = vector.extract_strided_slice %5 {offsets = [4, 0], sizes = [1, 32], strides = [1, 1]} : vector<8x32xf32> to vector<1x32xf32>
    %11 = vector.extract_strided_slice %5 {offsets = [5, 0], sizes = [1, 32], strides = [1, 1]} : vector<8x32xf32> to vector<1x32xf32>
    %12 = vector.extract_strided_slice %5 {offsets = [6, 0], sizes = [1, 32], strides = [1, 1]} : vector<8x32xf32> to vector<1x32xf32>
    %13 = vector.extract_strided_slice %5 {offsets = [7, 0], sizes = [1, 1], strides = [1, 1]} : vector<8x32xf32> to vector<1x1xf32>
    %14 = tpu.iota {dimensions = array<i32: 0>} : vector<16x1xi32>
    %c0_i32 = arith.constant 0 : i32
    %15 = vector.broadcast %c0_i32 : i32 to vector<16x1xi32>
    %16 = arith.cmpi ne, %14, %15 : vector<16x1xi32>
    %c15_i32 = arith.constant 15 : i32
    %17 = vector.broadcast %c15_i32 : i32 to vector<16x1xi32>
    %18 = arith.cmpi ne, %14, %17 : vector<16x1xi32>
    %c0_7 = arith.constant 0 : index
    %c0_8 = arith.constant 0 : index
    %19 = vector.load %arg3[%c0_7, %c0_8] : memref<192x32xf32, #tpu.memory_space<vmem>>, vector<32x32xf32>
    %c32 = arith.constant 32 : index
    %c0_9 = arith.constant 0 : index
    %20 = vector.load %arg3[%c32, %c0_9] : memref<192x32xf32, #tpu.memory_space<vmem>>, vector<32x32xf32>
    %c64 = arith.constant 64 : index
    %c0_10 = arith.constant 0 : index
    %21 = vector.load %arg3[%c64, %c0_10] : memref<192x32xf32, #tpu.memory_space<vmem>>, vector<32x32xf32>
    %c1_i32 = arith.constant 1 : i32
    %22 = tpu.dynamic_rotate %4 by %c1_i32 dim 0 : vector<16x32xf32>, i32 -> vector<16x32xf32>
    %cst = arith.constant 0.000000e+00 : f32
    %23 = vector.shape_cast %16 : vector<16x1xi1> to vector<16x1xi1>
    %24 = vector.broadcast %23 : vector<16x1xi1> to vector<16x32xi1>
    %25 = vector.broadcast %cst : f32 to vector<16x32xf32>
    %26 = arith.select %24, %22, %25 : vector<16x32xi1>, vector<16x32xf32>
    %c15_i32_11 = arith.constant 15 : i32
    %27 = tpu.dynamic_rotate %4 by %c15_i32_11 dim 0 : vector<16x32xf32>, i32 -> vector<16x32xf32>
    %cst_12 = arith.constant 0.000000e+00 : f32
    %28 = vector.shape_cast %18 : vector<16x1xi1> to vector<16x1xi1>
    %29 = vector.broadcast %28 : vector<16x1xi1> to vector<16x32xi1>
    %30 = vector.broadcast %cst_12 : f32 to vector<16x32xf32>
    %31 = arith.select %29, %27, %30 : vector<16x32xi1>, vector<16x32xf32>
    %cst_13 = arith.constant dense<0.000000e+00> : vector<16x32xf32>
    %32 = tpu.matmul %26, %19, %cst_13 {dimension_numbers = #tpu.dot_dimension_numbers<[1], [0], [0], [1], [0, 0, 1, 1], [], []>} : vector<16x32xf32>, vector<32x32xf32>, vector<16x32xf32> -> vector<16x32xf32>
    %cst_14 = arith.constant dense<0.000000e+00> : vector<16x32xf32>
    %33 = tpu.matmul %4, %20, %cst_14 {dimension_numbers = #tpu.dot_dimension_numbers<[1], [0], [0], [1], [0, 0, 1, 1], [], []>} : vector<16x32xf32>, vector<32x32xf32>, vector<16x32xf32> -> vector<16x32xf32>
    %34 = arith.addf %32, %33 : vector<16x32xf32>
    %cst_15 = arith.constant dense<0.000000e+00> : vector<16x32xf32>
    %35 = tpu.matmul %31, %21, %cst_15 {dimension_numbers = #tpu.dot_dimension_numbers<[1], [0], [0], [1], [0, 0, 1, 1], [], []>} : vector<16x32xf32>, vector<32x32xf32>, vector<16x32xf32> -> vector<16x32xf32>
    %36 = arith.addf %34, %35 : vector<16x32xf32>
    %37 = vector.broadcast %6 : vector<1x32xf32> to vector<16x32xf32>
    %38 = arith.addf %36, %37 : vector<16x32xf32>
    %cst_16 = arith.constant dense<0.000000e+00> : vector<16xf32>
    %39 = vector.multi_reduction <add>, %38, %cst_16 [1] : vector<16x32xf32> to vector<16xf32>
    %40 = vector.shape_cast %39 : vector<16xf32> to vector<16x1xf32>
    %cst_17 = arith.constant 3.200000e+01 : f32
    %41 = vector.broadcast %cst_17 : f32 to vector<16x1xf32>
    %42 = arith.divf %40, %41 : vector<16x1xf32>
    %43 = vector.broadcast %42 : vector<16x1xf32> to vector<16x32xf32>
    %44 = arith.subf %38, %43 : vector<16x32xf32>
    %45 = arith.mulf %44, %44 : vector<16x32xf32>
    %cst_18 = arith.constant dense<0.000000e+00> : vector<16xf32>
    %46 = vector.multi_reduction <add>, %45, %cst_18 [1] : vector<16x32xf32> to vector<16xf32>
    %47 = vector.shape_cast %46 : vector<16xf32> to vector<16x1xf32>
    %cst_19 = arith.constant 3.200000e+01 : f32
    %48 = vector.broadcast %cst_19 : f32 to vector<16x1xf32>
    %49 = arith.divf %47, %48 : vector<16x1xf32>
    %50 = vector.broadcast %42 : vector<16x1xf32> to vector<16x32xf32>
    %51 = arith.subf %38, %50 : vector<16x32xf32>
    %cst_20 = arith.constant 9.99999974E-6 : f32
    %52 = vector.broadcast %cst_20 : f32 to vector<16x1xf32>
    %53 = arith.addf %49, %52 : vector<16x1xf32>
    %54 = math.rsqrt %53 : vector<16x1xf32>
    %55 = vector.broadcast %54 : vector<16x1xf32> to vector<16x32xf32>
    %56 = arith.mulf %51, %55 : vector<16x32xf32>
    %57 = vector.broadcast %7 : vector<1x32xf32> to vector<16x32xf32>
    %58 = arith.mulf %56, %57 : vector<16x32xf32>
    %59 = vector.broadcast %8 : vector<1x32xf32> to vector<16x32xf32>
    %60 = arith.addf %58, %59 : vector<16x32xf32>
    %cst_21 = arith.constant 0.000000e+00 : f32
    %61 = vector.broadcast %cst_21 : f32 to vector<16x32xf32>
    %62 = arith.maximumf %60, %61 : vector<16x32xf32>
    %c96 = arith.constant 96 : index
    %c0_22 = arith.constant 0 : index
    %63 = vector.load %arg3[%c96, %c0_22] : memref<192x32xf32, #tpu.memory_space<vmem>>, vector<32x32xf32>
    %c128 = arith.constant 128 : index
    %c0_23 = arith.constant 0 : index
    %64 = vector.load %arg3[%c128, %c0_23] : memref<192x32xf32, #tpu.memory_space<vmem>>, vector<32x32xf32>
    %c160 = arith.constant 160 : index
    %c0_24 = arith.constant 0 : index
    %65 = vector.load %arg3[%c160, %c0_24] : memref<192x32xf32, #tpu.memory_space<vmem>>, vector<32x32xf32>
    %c1_i32_25 = arith.constant 1 : i32
    %66 = tpu.dynamic_rotate %62 by %c1_i32_25 dim 0 : vector<16x32xf32>, i32 -> vector<16x32xf32>
    %cst_26 = arith.constant 0.000000e+00 : f32
    %67 = vector.shape_cast %16 : vector<16x1xi1> to vector<16x1xi1>
    %68 = vector.broadcast %67 : vector<16x1xi1> to vector<16x32xi1>
    %69 = vector.broadcast %cst_26 : f32 to vector<16x32xf32>
    %70 = arith.select %68, %66, %69 : vector<16x32xi1>, vector<16x32xf32>
    %c15_i32_27 = arith.constant 15 : i32
    %71 = tpu.dynamic_rotate %62 by %c15_i32_27 dim 0 : vector<16x32xf32>, i32 -> vector<16x32xf32>
    %cst_28 = arith.constant 0.000000e+00 : f32
    %72 = vector.shape_cast %18 : vector<16x1xi1> to vector<16x1xi1>
    %73 = vector.broadcast %72 : vector<16x1xi1> to vector<16x32xi1>
    %74 = vector.broadcast %cst_28 : f32 to vector<16x32xf32>
    %75 = arith.select %73, %71, %74 : vector<16x32xi1>, vector<16x32xf32>
    %cst_29 = arith.constant dense<0.000000e+00> : vector<16x32xf32>
    %76 = tpu.matmul %70, %63, %cst_29 {dimension_numbers = #tpu.dot_dimension_numbers<[1], [0], [0], [1], [0, 0, 1, 1], [], []>} : vector<16x32xf32>, vector<32x32xf32>, vector<16x32xf32> -> vector<16x32xf32>
    %cst_30 = arith.constant dense<0.000000e+00> : vector<16x32xf32>
    %77 = tpu.matmul %62, %64, %cst_30 {dimension_numbers = #tpu.dot_dimension_numbers<[1], [0], [0], [1], [0, 0, 1, 1], [], []>} : vector<16x32xf32>, vector<32x32xf32>, vector<16x32xf32> -> vector<16x32xf32>
    %78 = arith.addf %76, %77 : vector<16x32xf32>
    %cst_31 = arith.constant dense<0.000000e+00> : vector<16x32xf32>
    %79 = tpu.matmul %75, %65, %cst_31 {dimension_numbers = #tpu.dot_dimension_numbers<[1], [0], [0], [1], [0, 0, 1, 1], [], []>} : vector<16x32xf32>, vector<32x32xf32>, vector<16x32xf32> -> vector<16x32xf32>
    %80 = arith.addf %78, %79 : vector<16x32xf32>
    %81 = vector.broadcast %9 : vector<1x32xf32> to vector<16x32xf32>
    %82 = arith.addf %80, %81 : vector<16x32xf32>
    %cst_32 = arith.constant dense<0.000000e+00> : vector<16xf32>
    %83 = vector.multi_reduction <add>, %82, %cst_32 [1] : vector<16x32xf32> to vector<16xf32>
    %84 = vector.shape_cast %83 : vector<16xf32> to vector<16x1xf32>
    %cst_33 = arith.constant 3.200000e+01 : f32
    %85 = vector.broadcast %cst_33 : f32 to vector<16x1xf32>
    %86 = arith.divf %84, %85 : vector<16x1xf32>
    %87 = vector.broadcast %86 : vector<16x1xf32> to vector<16x32xf32>
    %88 = arith.subf %82, %87 : vector<16x32xf32>
    %89 = arith.mulf %88, %88 : vector<16x32xf32>
    %cst_34 = arith.constant dense<0.000000e+00> : vector<16xf32>
    %90 = vector.multi_reduction <add>, %89, %cst_34 [1] : vector<16x32xf32> to vector<16xf32>
    %91 = vector.shape_cast %90 : vector<16xf32> to vector<16x1xf32>
    %cst_35 = arith.constant 3.200000e+01 : f32
    %92 = vector.broadcast %cst_35 : f32 to vector<16x1xf32>
    %93 = arith.divf %91, %92 : vector<16x1xf32>
    %94 = vector.broadcast %86 : vector<16x1xf32> to vector<16x32xf32>
    %95 = arith.subf %82, %94 : vector<16x32xf32>
    %cst_36 = arith.constant 9.99999974E-6 : f32
    %96 = vector.broadcast %cst_36 : f32 to vector<16x1xf32>
    %97 = arith.addf %93, %96 : vector<16x1xf32>
    %98 = math.rsqrt %97 : vector<16x1xf32>
    %99 = vector.broadcast %98 : vector<16x1xf32> to vector<16x32xf32>
    %100 = arith.mulf %95, %99 : vector<16x32xf32>
    %101 = vector.broadcast %10 : vector<1x32xf32> to vector<16x32xf32>
    %102 = arith.mulf %100, %101 : vector<16x32xf32>
    %103 = vector.broadcast %11 : vector<1x32xf32> to vector<16x32xf32>
    %104 = arith.addf %102, %103 : vector<16x32xf32>
    %cst_37 = arith.constant 0.000000e+00 : f32
    %105 = vector.broadcast %cst_37 : f32 to vector<16x32xf32>
    %106 = arith.maximumf %104, %105 : vector<16x32xf32>
    %107 = vector.broadcast %12 : vector<1x32xf32> to vector<16x32xf32>
    %108 = arith.mulf %106, %107 : vector<16x32xf32>
    %cst_38 = arith.constant dense<0.000000e+00> : vector<16xf32>
    %109 = vector.multi_reduction <add>, %108, %cst_38 [1] : vector<16x32xf32> to vector<16xf32>
    %110 = vector.shape_cast %109 : vector<16xf32> to vector<16x1xf32>
    %111 = vector.broadcast %13 : vector<1x1xf32> to vector<16x1xf32>
    %112 = arith.addf %110, %111 : vector<16x1xf32>
    %113 = vector.extract_strided_slice %1 {offsets = [0, 0], sizes = [16, 1], strides = [1, 1]} : vector<16x32xf32> to vector<16x1xf32>
    %114 = arith.mulf %112, %113 : vector<16x1xf32>
    %cst_39 = arith.constant 0.000000e+00 : f32
    %115 = vector.broadcast %cst_39 : f32 to vector<16x1xf32>
    %116 = arith.maximumf %114, %115 : vector<16x1xf32>
    %117 = math.exp %116 : vector<16x1xf32>
    %cst_40 = arith.constant 1.000000e+00 : f32
    %118 = vector.broadcast %cst_40 : f32 to vector<16x1xf32>
    %119 = arith.subf %117, %118 : vector<16x1xf32>
    %cst_41 = arith.constant 1.000000e+00 : f32
    %120 = vector.broadcast %cst_41 : f32 to vector<16x1xf32>
    %121 = arith.mulf %119, %120 : vector<16x1xf32>
    %cst_42 = arith.constant 5.000000e-01 : f32
    %122 = vector.broadcast %cst_42 : f32 to vector<16x1xf32>
    %123 = arith.addf %121, %122 : vector<16x1xf32>
    %124 = math.floor %123 : vector<16x1xf32>
    %125 = arith.fptosi %124 : vector<16x1xf32> to vector<16x1xi32>
    %c1_i32_43 = arith.constant 1 : i32
    %126 = vector.broadcast %c1_i32_43 : i32 to vector<16x1xi32>
    %127 = arith.addi %125, %126 : vector<16x1xi32>
    %c0_44 = arith.constant 0 : index
    %c0_45 = arith.constant 0 : index
    %c0_46 = arith.constant 0 : index
    %128 = vector.load %arg5[%c0_44, %c0_45, %c0_46] : memref<1x16x1xi32, #tpu.memory_space<vmem>>, vector<1x16x1xi32>
    %129 = vector.shape_cast %128 : vector<1x16x1xi32> to vector<16x1xi32>
    %130 = vector.shape_cast %127 : vector<16x1xi32> to vector<1x16x1xi32>
    tpu.vector_store %arg5[%c0_44, %c0_45, %c0_46], %130 {strides = array<i32>} : memref<1x16x1xi32, #tpu.memory_space<vmem>>, vector<1x16x1xi32>,
    return
  }
  func.func @transform_0(%arg0: i32) -> (i32, i32, i32) {
    %c0_i32 = arith.constant 0 : i32
    %c0_i32_0 = arith.constant 0 : i32
    %c0_i32_1 = arith.constant 0 : i32
    return %arg0, %c0_i32, %c0_i32_0 : i32, i32, i32
  }
  func.func @transform_1(%arg0: i32) -> (i32, i32, i32) {
    %c0_i32 = arith.constant 0 : i32
    %c0_i32_0 = arith.constant 0 : i32
    %c0_i32_1 = arith.constant 0 : i32
    return %arg0, %c0_i32, %c0_i32_0 : i32, i32, i32
  }
  func.func @transform_2(%arg0: i32) -> (i32, i32) {
    %c0_i32 = arith.constant 0 : i32
    %c0_i32_0 = arith.constant 0 : i32
    %c0_i32_1 = arith.constant 0 : i32
    return %c0_i32, %c0_i32_0 : i32, i32
  }
  func.func @transform_3(%arg0: i32) -> (i32, i32) {
    %c0_i32 = arith.constant 0 : i32
    %c0_i32_0 = arith.constant 0 : i32
    %c0_i32_1 = arith.constant 0 : i32
    return %c0_i32, %c0_i32_0 : i32, i32
  }
  func.func @transform_4(%arg0: i32) -> (i32, i32, i32) {
    %c0_i32 = arith.constant 0 : i32
    %c0_i32_0 = arith.constant 0 : i32
    %c0_i32_1 = arith.constant 0 : i32
    return %arg0, %c0_i32, %c0_i32_0 : i32, i32, i32
  }
}

module attributes {stable_mosaic.version = 11 : i64} {
  func.func @_expand_kernel(%arg0: i32, %arg1: memref<17xi32, #tpu.memory_space<smem>>, %arg2: memref<1xi32, #tpu.memory_space<smem>>, %arg3: memref<16x32xf32, #tpu.memory_space<vmem>>, %arg4: memref<256x32xf32, #tpu.memory_space<vmem>>, %arg5: memref<256x1xi32, #tpu.memory_space<vmem>>) attributes {dimension_semantics = [#tpu.dimension_semantics<parallel>], iteration_bounds = array<i64: 8>, scalar_prefetch = 2 : i64, scratch_operands = 0 : i64, tpu.core_type = #tpu.core_type<tc>, window_params = [{pipeline_mode = #tpu.pipeline_mode<synchronous>, transform_indices = @transform_0, window_bounds = array<i64: 16, 32>}, {transform_indices = @transform_1, window_bounds = array<i64: 256, 32>}, {transform_indices = @transform_2, window_bounds = array<i64: 256, 1>}]} {
    %c256_i32 = arith.constant 256 : i32
    %0 = arith.muli %arg0, %c256_i32 : i32
    %1 = tpu.iota {dimensions = array<i32: 0>} : vector<256x1xi32>
    %2 = vector.broadcast %0 : i32 to vector<256x1xi32>
    %3 = arith.addi %2, %1 : vector<256x1xi32>
    %cst = arith.constant 0.000000e+00 : f32
    %4 = vector.broadcast %cst : f32 to vector<256x32xf32>
    %c0 = arith.constant 0 : index
    %5 = memref.load %arg1[%c0] : memref<17xi32, #tpu.memory_space<smem>>
    %6 = vector.broadcast %5 : i32 to vector<256x1xi32>
    %7 = arith.cmpi sge, %3, %6 : vector<256x1xi32>
    %c1 = arith.constant 1 : index
    %8 = memref.load %arg1[%c1] : memref<17xi32, #tpu.memory_space<smem>>
    %9 = vector.broadcast %8 : i32 to vector<256x1xi32>
    %10 = arith.cmpi slt, %3, %9 : vector<256x1xi32>
    %11 = arith.andi %7, %10 : vector<256x1xi1>
    %c0_0 = arith.constant 0 : index
    %c0_1 = arith.constant 0 : index
    %12 = vector.load %arg3[%c0_0, %c0_1] : memref<16x32xf32, #tpu.memory_space<vmem>>, vector<1x32xf32>
    %13 = vector.shape_cast %11 : vector<256x1xi1> to vector<256x1xi1>
    %14 = vector.broadcast %13 : vector<256x1xi1> to vector<256x32xi1>
    %15 = vector.shape_cast %12 : vector<1x32xf32> to vector<1x32xf32>
    %16 = vector.broadcast %15 : vector<1x32xf32> to vector<256x32xf32>
    %17 = arith.select %14, %16, %4 : vector<256x32xi1>, vector<256x32xf32>
    %c1_2 = arith.constant 1 : index
    %18 = memref.load %arg1[%c1_2] : memref<17xi32, #tpu.memory_space<smem>>
    %19 = vector.broadcast %18 : i32 to vector<256x1xi32>
    %20 = arith.cmpi sge, %3, %19 : vector<256x1xi32>
    %c2 = arith.constant 2 : index
    %21 = memref.load %arg1[%c2] : memref<17xi32, #tpu.memory_space<smem>>
    %22 = vector.broadcast %21 : i32 to vector<256x1xi32>
    %23 = arith.cmpi slt, %3, %22 : vector<256x1xi32>
    %24 = arith.andi %20, %23 : vector<256x1xi1>
    %c1_3 = arith.constant 1 : index
    %c0_4 = arith.constant 0 : index
    %25 = vector.load %arg3[%c1_3, %c0_4] : memref<16x32xf32, #tpu.memory_space<vmem>>, vector<1x32xf32>
    %26 = vector.shape_cast %24 : vector<256x1xi1> to vector<256x1xi1>
    %27 = vector.broadcast %26 : vector<256x1xi1> to vector<256x32xi1>
    %28 = vector.shape_cast %25 : vector<1x32xf32> to vector<1x32xf32>
    %29 = vector.broadcast %28 : vector<1x32xf32> to vector<256x32xf32>
    %30 = arith.select %27, %29, %17 : vector<256x32xi1>, vector<256x32xf32>
    %c2_5 = arith.constant 2 : index
    %31 = memref.load %arg1[%c2_5] : memref<17xi32, #tpu.memory_space<smem>>
    %32 = vector.broadcast %31 : i32 to vector<256x1xi32>
    %33 = arith.cmpi sge, %3, %32 : vector<256x1xi32>
    %c3 = arith.constant 3 : index
    %34 = memref.load %arg1[%c3] : memref<17xi32, #tpu.memory_space<smem>>
    %35 = vector.broadcast %34 : i32 to vector<256x1xi32>
    %36 = arith.cmpi slt, %3, %35 : vector<256x1xi32>
    %37 = arith.andi %33, %36 : vector<256x1xi1>
    %c2_6 = arith.constant 2 : index
    %c0_7 = arith.constant 0 : index
    %38 = vector.load %arg3[%c2_6, %c0_7] : memref<16x32xf32, #tpu.memory_space<vmem>>, vector<1x32xf32>
    %39 = vector.shape_cast %37 : vector<256x1xi1> to vector<256x1xi1>
    %40 = vector.broadcast %39 : vector<256x1xi1> to vector<256x32xi1>
    %41 = vector.shape_cast %38 : vector<1x32xf32> to vector<1x32xf32>
    %42 = vector.broadcast %41 : vector<1x32xf32> to vector<256x32xf32>
    %43 = arith.select %40, %42, %30 : vector<256x32xi1>, vector<256x32xf32>
    %c3_8 = arith.constant 3 : index
    %44 = memref.load %arg1[%c3_8] : memref<17xi32, #tpu.memory_space<smem>>
    %45 = vector.broadcast %44 : i32 to vector<256x1xi32>
    %46 = arith.cmpi sge, %3, %45 : vector<256x1xi32>
    %c4 = arith.constant 4 : index
    %47 = memref.load %arg1[%c4] : memref<17xi32, #tpu.memory_space<smem>>
    %48 = vector.broadcast %47 : i32 to vector<256x1xi32>
    %49 = arith.cmpi slt, %3, %48 : vector<256x1xi32>
    %50 = arith.andi %46, %49 : vector<256x1xi1>
    %c3_9 = arith.constant 3 : index
    %c0_10 = arith.constant 0 : index
    %51 = vector.load %arg3[%c3_9, %c0_10] : memref<16x32xf32, #tpu.memory_space<vmem>>, vector<1x32xf32>
    %52 = vector.shape_cast %50 : vector<256x1xi1> to vector<256x1xi1>
    %53 = vector.broadcast %52 : vector<256x1xi1> to vector<256x32xi1>
    %54 = vector.shape_cast %51 : vector<1x32xf32> to vector<1x32xf32>
    %55 = vector.broadcast %54 : vector<1x32xf32> to vector<256x32xf32>
    %56 = arith.select %53, %55, %43 : vector<256x32xi1>, vector<256x32xf32>
    %c4_11 = arith.constant 4 : index
    %57 = memref.load %arg1[%c4_11] : memref<17xi32, #tpu.memory_space<smem>>
    %58 = vector.broadcast %57 : i32 to vector<256x1xi32>
    %59 = arith.cmpi sge, %3, %58 : vector<256x1xi32>
    %c5 = arith.constant 5 : index
    %60 = memref.load %arg1[%c5] : memref<17xi32, #tpu.memory_space<smem>>
    %61 = vector.broadcast %60 : i32 to vector<256x1xi32>
    %62 = arith.cmpi slt, %3, %61 : vector<256x1xi32>
    %63 = arith.andi %59, %62 : vector<256x1xi1>
    %c4_12 = arith.constant 4 : index
    %c0_13 = arith.constant 0 : index
    %64 = vector.load %arg3[%c4_12, %c0_13] : memref<16x32xf32, #tpu.memory_space<vmem>>, vector<1x32xf32>
    %65 = vector.shape_cast %63 : vector<256x1xi1> to vector<256x1xi1>
    %66 = vector.broadcast %65 : vector<256x1xi1> to vector<256x32xi1>
    %67 = vector.shape_cast %64 : vector<1x32xf32> to vector<1x32xf32>
    %68 = vector.broadcast %67 : vector<1x32xf32> to vector<256x32xf32>
    %69 = arith.select %66, %68, %56 : vector<256x32xi1>, vector<256x32xf32>
    %c5_14 = arith.constant 5 : index
    %70 = memref.load %arg1[%c5_14] : memref<17xi32, #tpu.memory_space<smem>>
    %71 = vector.broadcast %70 : i32 to vector<256x1xi32>
    %72 = arith.cmpi sge, %3, %71 : vector<256x1xi32>
    %c6 = arith.constant 6 : index
    %73 = memref.load %arg1[%c6] : memref<17xi32, #tpu.memory_space<smem>>
    %74 = vector.broadcast %73 : i32 to vector<256x1xi32>
    %75 = arith.cmpi slt, %3, %74 : vector<256x1xi32>
    %76 = arith.andi %72, %75 : vector<256x1xi1>
    %c5_15 = arith.constant 5 : index
    %c0_16 = arith.constant 0 : index
    %77 = vector.load %arg3[%c5_15, %c0_16] : memref<16x32xf32, #tpu.memory_space<vmem>>, vector<1x32xf32>
    %78 = vector.shape_cast %76 : vector<256x1xi1> to vector<256x1xi1>
    %79 = vector.broadcast %78 : vector<256x1xi1> to vector<256x32xi1>
    %80 = vector.shape_cast %77 : vector<1x32xf32> to vector<1x32xf32>
    %81 = vector.broadcast %80 : vector<1x32xf32> to vector<256x32xf32>
    %82 = arith.select %79, %81, %69 : vector<256x32xi1>, vector<256x32xf32>
    %c6_17 = arith.constant 6 : index
    %83 = memref.load %arg1[%c6_17] : memref<17xi32, #tpu.memory_space<smem>>
    %84 = vector.broadcast %83 : i32 to vector<256x1xi32>
    %85 = arith.cmpi sge, %3, %84 : vector<256x1xi32>
    %c7 = arith.constant 7 : index
    %86 = memref.load %arg1[%c7] : memref<17xi32, #tpu.memory_space<smem>>
    %87 = vector.broadcast %86 : i32 to vector<256x1xi32>
    %88 = arith.cmpi slt, %3, %87 : vector<256x1xi32>
    %89 = arith.andi %85, %88 : vector<256x1xi1>
    %c6_18 = arith.constant 6 : index
    %c0_19 = arith.constant 0 : index
    %90 = vector.load %arg3[%c6_18, %c0_19] : memref<16x32xf32, #tpu.memory_space<vmem>>, vector<1x32xf32>
    %91 = vector.shape_cast %89 : vector<256x1xi1> to vector<256x1xi1>
    %92 = vector.broadcast %91 : vector<256x1xi1> to vector<256x32xi1>
    %93 = vector.shape_cast %90 : vector<1x32xf32> to vector<1x32xf32>
    %94 = vector.broadcast %93 : vector<1x32xf32> to vector<256x32xf32>
    %95 = arith.select %92, %94, %82 : vector<256x32xi1>, vector<256x32xf32>
    %c7_20 = arith.constant 7 : index
    %96 = memref.load %arg1[%c7_20] : memref<17xi32, #tpu.memory_space<smem>>
    %97 = vector.broadcast %96 : i32 to vector<256x1xi32>
    %98 = arith.cmpi sge, %3, %97 : vector<256x1xi32>
    %c8 = arith.constant 8 : index
    %99 = memref.load %arg1[%c8] : memref<17xi32, #tpu.memory_space<smem>>
    %100 = vector.broadcast %99 : i32 to vector<256x1xi32>
    %101 = arith.cmpi slt, %3, %100 : vector<256x1xi32>
    %102 = arith.andi %98, %101 : vector<256x1xi1>
    %c7_21 = arith.constant 7 : index
    %c0_22 = arith.constant 0 : index
    %103 = vector.load %arg3[%c7_21, %c0_22] : memref<16x32xf32, #tpu.memory_space<vmem>>, vector<1x32xf32>
    %104 = vector.shape_cast %102 : vector<256x1xi1> to vector<256x1xi1>
    %105 = vector.broadcast %104 : vector<256x1xi1> to vector<256x32xi1>
    %106 = vector.shape_cast %103 : vector<1x32xf32> to vector<1x32xf32>
    %107 = vector.broadcast %106 : vector<1x32xf32> to vector<256x32xf32>
    %108 = arith.select %105, %107, %95 : vector<256x32xi1>, vector<256x32xf32>
    %c8_23 = arith.constant 8 : index
    %109 = memref.load %arg1[%c8_23] : memref<17xi32, #tpu.memory_space<smem>>
    %110 = vector.broadcast %109 : i32 to vector<256x1xi32>
    %111 = arith.cmpi sge, %3, %110 : vector<256x1xi32>
    %c9 = arith.constant 9 : index
    %112 = memref.load %arg1[%c9] : memref<17xi32, #tpu.memory_space<smem>>
    %113 = vector.broadcast %112 : i32 to vector<256x1xi32>
    %114 = arith.cmpi slt, %3, %113 : vector<256x1xi32>
    %115 = arith.andi %111, %114 : vector<256x1xi1>
    %c8_24 = arith.constant 8 : index
    %c0_25 = arith.constant 0 : index
    %116 = vector.load %arg3[%c8_24, %c0_25] : memref<16x32xf32, #tpu.memory_space<vmem>>, vector<1x32xf32>
    %117 = vector.shape_cast %115 : vector<256x1xi1> to vector<256x1xi1>
    %118 = vector.broadcast %117 : vector<256x1xi1> to vector<256x32xi1>
    %119 = vector.shape_cast %116 : vector<1x32xf32> to vector<1x32xf32>
    %120 = vector.broadcast %119 : vector<1x32xf32> to vector<256x32xf32>
    %121 = arith.select %118, %120, %108 : vector<256x32xi1>, vector<256x32xf32>
    %c9_26 = arith.constant 9 : index
    %122 = memref.load %arg1[%c9_26] : memref<17xi32, #tpu.memory_space<smem>>
    %123 = vector.broadcast %122 : i32 to vector<256x1xi32>
    %124 = arith.cmpi sge, %3, %123 : vector<256x1xi32>
    %c10 = arith.constant 10 : index
    %125 = memref.load %arg1[%c10] : memref<17xi32, #tpu.memory_space<smem>>
    %126 = vector.broadcast %125 : i32 to vector<256x1xi32>
    %127 = arith.cmpi slt, %3, %126 : vector<256x1xi32>
    %128 = arith.andi %124, %127 : vector<256x1xi1>
    %c9_27 = arith.constant 9 : index
    %c0_28 = arith.constant 0 : index
    %129 = vector.load %arg3[%c9_27, %c0_28] : memref<16x32xf32, #tpu.memory_space<vmem>>, vector<1x32xf32>
    %130 = vector.shape_cast %128 : vector<256x1xi1> to vector<256x1xi1>
    %131 = vector.broadcast %130 : vector<256x1xi1> to vector<256x32xi1>
    %132 = vector.shape_cast %129 : vector<1x32xf32> to vector<1x32xf32>
    %133 = vector.broadcast %132 : vector<1x32xf32> to vector<256x32xf32>
    %134 = arith.select %131, %133, %121 : vector<256x32xi1>, vector<256x32xf32>
    %c10_29 = arith.constant 10 : index
    %135 = memref.load %arg1[%c10_29] : memref<17xi32, #tpu.memory_space<smem>>
    %136 = vector.broadcast %135 : i32 to vector<256x1xi32>
    %137 = arith.cmpi sge, %3, %136 : vector<256x1xi32>
    %c11 = arith.constant 11 : index
    %138 = memref.load %arg1[%c11] : memref<17xi32, #tpu.memory_space<smem>>
    %139 = vector.broadcast %138 : i32 to vector<256x1xi32>
    %140 = arith.cmpi slt, %3, %139 : vector<256x1xi32>
    %141 = arith.andi %137, %140 : vector<256x1xi1>
    %c10_30 = arith.constant 10 : index
    %c0_31 = arith.constant 0 : index
    %142 = vector.load %arg3[%c10_30, %c0_31] : memref<16x32xf32, #tpu.memory_space<vmem>>, vector<1x32xf32>
    %143 = vector.shape_cast %141 : vector<256x1xi1> to vector<256x1xi1>
    %144 = vector.broadcast %143 : vector<256x1xi1> to vector<256x32xi1>
    %145 = vector.shape_cast %142 : vector<1x32xf32> to vector<1x32xf32>
    %146 = vector.broadcast %145 : vector<1x32xf32> to vector<256x32xf32>
    %147 = arith.select %144, %146, %134 : vector<256x32xi1>, vector<256x32xf32>
    %c11_32 = arith.constant 11 : index
    %148 = memref.load %arg1[%c11_32] : memref<17xi32, #tpu.memory_space<smem>>
    %149 = vector.broadcast %148 : i32 to vector<256x1xi32>
    %150 = arith.cmpi sge, %3, %149 : vector<256x1xi32>
    %c12 = arith.constant 12 : index
    %151 = memref.load %arg1[%c12] : memref<17xi32, #tpu.memory_space<smem>>
    %152 = vector.broadcast %151 : i32 to vector<256x1xi32>
    %153 = arith.cmpi slt, %3, %152 : vector<256x1xi32>
    %154 = arith.andi %150, %153 : vector<256x1xi1>
    %c11_33 = arith.constant 11 : index
    %c0_34 = arith.constant 0 : index
    %155 = vector.load %arg3[%c11_33, %c0_34] : memref<16x32xf32, #tpu.memory_space<vmem>>, vector<1x32xf32>
    %156 = vector.shape_cast %154 : vector<256x1xi1> to vector<256x1xi1>
    %157 = vector.broadcast %156 : vector<256x1xi1> to vector<256x32xi1>
    %158 = vector.shape_cast %155 : vector<1x32xf32> to vector<1x32xf32>
    %159 = vector.broadcast %158 : vector<1x32xf32> to vector<256x32xf32>
    %160 = arith.select %157, %159, %147 : vector<256x32xi1>, vector<256x32xf32>
    %c12_35 = arith.constant 12 : index
    %161 = memref.load %arg1[%c12_35] : memref<17xi32, #tpu.memory_space<smem>>
    %162 = vector.broadcast %161 : i32 to vector<256x1xi32>
    %163 = arith.cmpi sge, %3, %162 : vector<256x1xi32>
    %c13 = arith.constant 13 : index
    %164 = memref.load %arg1[%c13] : memref<17xi32, #tpu.memory_space<smem>>
    %165 = vector.broadcast %164 : i32 to vector<256x1xi32>
    %166 = arith.cmpi slt, %3, %165 : vector<256x1xi32>
    %167 = arith.andi %163, %166 : vector<256x1xi1>
    %c12_36 = arith.constant 12 : index
    %c0_37 = arith.constant 0 : index
    %168 = vector.load %arg3[%c12_36, %c0_37] : memref<16x32xf32, #tpu.memory_space<vmem>>, vector<1x32xf32>
    %169 = vector.shape_cast %167 : vector<256x1xi1> to vector<256x1xi1>
    %170 = vector.broadcast %169 : vector<256x1xi1> to vector<256x32xi1>
    %171 = vector.shape_cast %168 : vector<1x32xf32> to vector<1x32xf32>
    %172 = vector.broadcast %171 : vector<1x32xf32> to vector<256x32xf32>
    %173 = arith.select %170, %172, %160 : vector<256x32xi1>, vector<256x32xf32>
    %c13_38 = arith.constant 13 : index
    %174 = memref.load %arg1[%c13_38] : memref<17xi32, #tpu.memory_space<smem>>
    %175 = vector.broadcast %174 : i32 to vector<256x1xi32>
    %176 = arith.cmpi sge, %3, %175 : vector<256x1xi32>
    %c14 = arith.constant 14 : index
    %177 = memref.load %arg1[%c14] : memref<17xi32, #tpu.memory_space<smem>>
    %178 = vector.broadcast %177 : i32 to vector<256x1xi32>
    %179 = arith.cmpi slt, %3, %178 : vector<256x1xi32>
    %180 = arith.andi %176, %179 : vector<256x1xi1>
    %c13_39 = arith.constant 13 : index
    %c0_40 = arith.constant 0 : index
    %181 = vector.load %arg3[%c13_39, %c0_40] : memref<16x32xf32, #tpu.memory_space<vmem>>, vector<1x32xf32>
    %182 = vector.shape_cast %180 : vector<256x1xi1> to vector<256x1xi1>
    %183 = vector.broadcast %182 : vector<256x1xi1> to vector<256x32xi1>
    %184 = vector.shape_cast %181 : vector<1x32xf32> to vector<1x32xf32>
    %185 = vector.broadcast %184 : vector<1x32xf32> to vector<256x32xf32>
    %186 = arith.select %183, %185, %173 : vector<256x32xi1>, vector<256x32xf32>
    %c14_41 = arith.constant 14 : index
    %187 = memref.load %arg1[%c14_41] : memref<17xi32, #tpu.memory_space<smem>>
    %188 = vector.broadcast %187 : i32 to vector<256x1xi32>
    %189 = arith.cmpi sge, %3, %188 : vector<256x1xi32>
    %c15 = arith.constant 15 : index
    %190 = memref.load %arg1[%c15] : memref<17xi32, #tpu.memory_space<smem>>
    %191 = vector.broadcast %190 : i32 to vector<256x1xi32>
    %192 = arith.cmpi slt, %3, %191 : vector<256x1xi32>
    %193 = arith.andi %189, %192 : vector<256x1xi1>
    %c14_42 = arith.constant 14 : index
    %c0_43 = arith.constant 0 : index
    %194 = vector.load %arg3[%c14_42, %c0_43] : memref<16x32xf32, #tpu.memory_space<vmem>>, vector<1x32xf32>
    %195 = vector.shape_cast %193 : vector<256x1xi1> to vector<256x1xi1>
    %196 = vector.broadcast %195 : vector<256x1xi1> to vector<256x32xi1>
    %197 = vector.shape_cast %194 : vector<1x32xf32> to vector<1x32xf32>
    %198 = vector.broadcast %197 : vector<1x32xf32> to vector<256x32xf32>
    %199 = arith.select %196, %198, %186 : vector<256x32xi1>, vector<256x32xf32>
    %c15_44 = arith.constant 15 : index
    %200 = memref.load %arg1[%c15_44] : memref<17xi32, #tpu.memory_space<smem>>
    %201 = vector.broadcast %200 : i32 to vector<256x1xi32>
    %202 = arith.cmpi sge, %3, %201 : vector<256x1xi32>
    %c16 = arith.constant 16 : index
    %203 = memref.load %arg1[%c16] : memref<17xi32, #tpu.memory_space<smem>>
    %204 = vector.broadcast %203 : i32 to vector<256x1xi32>
    %205 = arith.cmpi slt, %3, %204 : vector<256x1xi32>
    %206 = arith.andi %202, %205 : vector<256x1xi1>
    %c15_45 = arith.constant 15 : index
    %c0_46 = arith.constant 0 : index
    %207 = vector.load %arg3[%c15_45, %c0_46] : memref<16x32xf32, #tpu.memory_space<vmem>>, vector<1x32xf32>
    %208 = vector.shape_cast %206 : vector<256x1xi1> to vector<256x1xi1>
    %209 = vector.broadcast %208 : vector<256x1xi1> to vector<256x32xi1>
    %210 = vector.shape_cast %207 : vector<1x32xf32> to vector<1x32xf32>
    %211 = vector.broadcast %210 : vector<1x32xf32> to vector<256x32xf32>
    %212 = arith.select %209, %211, %199 : vector<256x32xi1>, vector<256x32xf32>
    %c0_47 = arith.constant 0 : index
    %c0_48 = arith.constant 0 : index
    %213 = vector.load %arg4[%c0_47, %c0_48] : memref<256x32xf32, #tpu.memory_space<vmem>>, vector<256x32xf32>
    tpu.vector_store %arg4[%c0_47, %c0_48], %212 {strides = array<i32>} : memref<256x32xf32, #tpu.memory_space<vmem>>, vector<256x32xf32>,
    %c0_49 = arith.constant 0 : index
    %214 = memref.load %arg2[%c0_49] : memref<1xi32, #tpu.memory_space<smem>>
    %215 = vector.broadcast %214 : i32 to vector<256x1xi32>
    %216 = arith.cmpi slt, %3, %215 : vector<256x1xi32>
    %c1_i32 = arith.constant 1 : i32
    %217 = vector.broadcast %c1_i32 : i32 to vector<256x1xi32>
    %218 = arith.addi %3, %217 : vector<256x1xi32>
    %c0_i32 = arith.constant 0 : i32
    %219 = vector.broadcast %c0_i32 : i32 to vector<256x1xi32>
    %220 = arith.select %216, %218, %219 : vector<256x1xi1>, vector<256x1xi32>
    %c0_50 = arith.constant 0 : index
    %c0_51 = arith.constant 0 : index
    %221 = vector.load %arg5[%c0_50, %c0_51] : memref<256x1xi32, #tpu.memory_space<vmem>>, vector<256x1xi32>
    tpu.vector_store %arg5[%c0_50, %c0_51], %220 {strides = array<i32>} : memref<256x1xi32, #tpu.memory_space<vmem>>, vector<256x1xi32>,
    return
  }
  func.func @transform_0(%arg0: i32, %arg1: memref<17xi32, #tpu.memory_space<smem>>, %arg2: memref<1xi32, #tpu.memory_space<smem>>) -> (i32, i32) {
    %c0_i32 = arith.constant 0 : i32
    %c0_i32_0 = arith.constant 0 : i32
    %c0_i32_1 = arith.constant 0 : i32
    return %c0_i32, %c0_i32_0 : i32, i32
  }
  func.func @transform_1(%arg0: i32, %arg1: memref<17xi32, #tpu.memory_space<smem>>, %arg2: memref<1xi32, #tpu.memory_space<smem>>) -> (i32, i32) {
    %c0_i32 = arith.constant 0 : i32
    %c0_i32_0 = arith.constant 0 : i32
    return %arg0, %c0_i32 : i32, i32
  }
  func.func @transform_2(%arg0: i32, %arg1: memref<17xi32, #tpu.memory_space<smem>>, %arg2: memref<1xi32, #tpu.memory_space<smem>>) -> (i32, i32) {
    %c0_i32 = arith.constant 0 : i32
    %c0_i32_0 = arith.constant 0 : i32
    return %arg0, %c0_i32 : i32, i32
  }
}

</mosaic_0001>

<bundles_post_ra>
// kernel: _device_forward.2
= control target key start
LH: loop header
LB: loop body
LE: loop exit
PB: predicated region body
PF: predicated region fallthrough
CT: control target
= control target key end

     0   :  { %v24_v0 = vlaneseq  ;;  %vm65_vm0 = vcmask 261120   ;;  %vm709_vm5 = vcmask 7168   ;;  %s1103_s2 = inlined_call_operand.vmem [shape: f32[192,32], index: 2, kind: input, shape index: {}]   ;;  %s1104_s0 = inlined_call_operand.vmem [shape: f32[1,16,32], index: 0, kind: input, shape index: {}]   ;;  %s1105_s1 = inlined_call_operand.vmem [shape: f32[1,16,32], index: 1, kind: input, shape index: {}]   ;;  %s1106_s3 = inlined_call_operand.vmem [shape: f32[8,32], index: 3, kind: input, shape index: {}]   ;;  %s1107_s4 = inlined_call_operand.vmem [shape: s32[1,16,1], index: 4, kind: output, shape index: {}]  }
   0x1   :  { %v35_v1 = vld [vmem:[%s1103_s2 + $0x20] sm:$0xff]  ;;  %v36_v2 = vld [vmem:[%s1103_s2 + $0x28] sm:$0xff]  ;;  %v37_v3 = vld [vmem:[%s1103_s2 + $0x30] sm:$0xff] }
   0x2   :  { %v832_v4 = vpack.c.bf16 %v36_v2, %v35_v1  ;;  %v38_v5 = vld [vmem:[%s1103_s2 + $0x38] sm:$0xff]  ;;  %v944_v6 = vld [vmem:[%s1105_s1] sm:$0xff]  ;;  %v949_v7 = vld [vmem:[%s1105_s1 + $0x8] sm:$0xff]  ;;  %v951_v8 = vshrl.u32 %v24_v0, 7 }
   0x3   :  { %v836_v9 = vpack.c.bf16 %v38_v5, %v37_v3  ;;  %v19_v10 = vld [vmem:[%s1104_s0] sm:$0xff]  ;;  %v20_v11 = vld [vmem:[%s1104_s0 + $0x8] sm:$0xff]  ;;  %v33_v19 = vld [vmem:[%s1103_s2 + $0x10] sm:$0xff] }
   0x4   :  { %v31_v12 = vld [vmem:[%s1103_s2] sm:$0xff]  ;;  %833 = vmatprep.subr.bf16.mxu0 %v832_v4  ;;  %v21_v13 = vmul.f32 %v19_v10, %v944_v6  ;;  %v22_v14 = vmul.f32 %v20_v11, %v949_v7  ;;  %v32_v15 = vld [vmem:[%s1103_s2 + $0x8] sm:$0xff]  ;;  %vm45_vm1 = vcmp.lt.s32.totalorder %v951_v8, 1  ;;  %v34_v20 = vld [vmem:[%s1103_s2 + $0x18] sm:$0xff]  ;;  %vm27_vm2 = vcmp.ne.s32.totalorder %v951_v8, 0 }
   0x5   :  { %835 = vmatpush3.bf16.msra.mxu0 %v832_v4  ;;  %v840_v17 = vpack.c.bf16 %v32_v15, %v31_v12  ;;  %v844_v22 = vpack.c.bf16 %v34_v20, %v33_v19  ;;  %v39_v24 = vld [vmem:[%s1103_s2 + $0x40] sm:$0xff]  ;;  %v40_v25 = vld [vmem:[%s1103_s2 + $0x48] sm:$0xff]  ;;  %v41_v29 = vld [vmem:[%s1103_s2 + $0x50] sm:$0xff]  ;;  %vm56_vm3 = vcmp.lt.s32.totalorder %v951_v8, 7  ;;  %v1000_v34 = vadd.s32 8, %v951_v8 }
   0x6   :  { %837 = vmatprep.subr.bf16.mxu0 %v836_v9  ;;  %v43_v16 = vrot.slane %v21_v13, 7  ;;  %774 = vmatprep.mubr.msk.f32.mxu0 %vm65_vm0, %v21_v13  ;;  %v44_v18 = vrot.slane %v22_v14, 7  ;;  %v848_v26 = vpack.c.bf16 %v40_v25, %v39_v24  ;;  %v54_v27 = vrot.slane %v21_v13, 1  ;;  %v42_v30 = vld [vmem:[%s1103_s2 + $0x58] sm:$0xff]  ;;  %v1014_v38 = vld [vmem:[%s1106_s3] sm:$0xff]  ;;  %v363_v57 = vld [vmem:[%s1103_s2 + $0x88] sm:$0xff] }
   0x7   :  { %v55_v28 = vrot.slane %v22_v14, 1  ;;  %v852_v32 = vpack.c.bf16 %v42_v30, %v41_v29  ;;  %vm30_vm4 = vcmp.ne.s32.totalorder %v1000_v34, 15  ;;  %v313_v37 = vsub.s32 0, %v951_v8  ;;  %v362_v56 = vld [vmem:[%s1103_s2 + $0x80] sm:$0xff]  ;;  %v364_v58 = vld [vmem:[%s1103_s2 + $0x90] sm:$0xff]  ;;  %v365_v60 = vld [vmem:[%s1103_s2 + $0x98] sm:$0xff] }
   0x8   :  { %v47_v21 = vsel %vm45_vm1, %v44_v18, %v43_v16  ;;  %v46_v31 = vsel %vm45_vm1, %v43_v16, %v44_v18  ;;  %v856_v59 = vpack.c.bf16 %v363_v57, %v362_v56  ;;  %v860_v61 = vpack.c.bf16 %v365_v60, %v364_v58  ;;  %v358_v62 = vld [vmem:[%s1103_s2 + $0x60] sm:$0xff]  ;;  %v359_v63 = vld [vmem:[%s1103_s2 + $0x68] sm:$0xff] }
   0x9   :  { %839 = vmatpush3.bf16.msra.mxu0 %v836_v9  ;;  %v52_v23 = vsel %vm27_vm2, %v47_v21, 0.0  ;;  %v57_v33 = vsel %vm56_vm3, %v54_v27, %v55_v28  ;;  %v58_v35 = vsel %vm56_vm3, %v55_v28, %v54_v27  ;;  %v314_v39 = vrot.slane %v1014_v38, %v313_v37  ;;  %v366_v27 = vld [vmem:[%s1103_s2 + $0xa0] sm:$0xff]  ;;  %v367_v28 = vld [vmem:[%s1103_s2 + $0xa8] sm:$0xff] }
   0xa   :  { %841 = vmatprep.subr.bf16.mxu0 %v840_v17  ;;  %v64_v36 = vsel %vm30_vm4, %v58_v35, 0.0  ;;  %857 = vmatprep.subr.bf16.mxu1 %v856_v59  ;;  %v864_v0 = vpack.c.bf16 %v359_v63, %v358_v62  ;;  %v346_v10 = vsub.s32 1, %v951_v8  ;;  %v352_v11 = vsub.s32 2, %v951_v8  ;;  %v368_v35 = vld [vmem:[%s1103_s2 + $0xb0] sm:$0xff] }
   0xb   :  { %859 = vmatpush3.bf16.msra.mxu1 %v856_v59 }
   0xc   :  { %775 = vmatmul.mubr.msk.f32.vlgmr.msra.gmra.mrb[0].mxu0 %vm65_vm0, %v22_v14  ;;  %861 = vmatprep.subr.bf16.mxu1 %v860_v61  ;;  %v347_v12 = vrot.slane %v1014_v38, %v346_v10  ;;  %v353_v15 = vrot.slane %v1014_v38, %v352_v11 }
   0xd   :  { %843 = vmatpush3.bf16.msra.mxu0 %v840_v17  ;;  %785 = vmatprep.mubr.msk.f32.mxu0 %vm65_vm0, %v52_v23  ;;  %v361_v23 = vld [vmem:[%s1103_s2 + $0x78] sm:$0xff] }
   0xe   :  { %845 = vmatprep.subr.bf16.mxu0 %v844_v22 }
   0xf   :  { %863 = vmatpush3.bf16.msra.mxu1 %v860_v61 }
  0x10   :  { %865 = vmatprep.subr.bf16.mxu1 %v864_v0 }
  0x11   :  { %847 = vmatpush3.bf16.msra.mxu0 %v844_v22  ;;  %v360_v22 = vld [vmem:[%s1103_s2 + $0x70] sm:$0xff] }
  0x12   :  { %849 = vmatprep.subr.bf16.mxu0 %v848_v26 }
  0x14   :  { %786 = vmatmul.mubr.msk.f32.vlgmr.msra.gmra.mrb[0].mxu0 %vm65_vm0, %v46_v31 }
  0x15   :  { %851 = vmatpush3.bf16.msra.mxu0 %v848_v26  ;;  %796 = vmatprep.mubr.msk.f32.mxu0 %vm65_vm0, %v57_v33  ;;  %v868_v26 = vpack.c.bf16 %v361_v23, %v360_v22 }
  0x16   :  { %853 = vmatprep.subr.bf16.mxu0 %v852_v32 }
  0x19   :  { %855 = vmatpush3.bf16.msra.mxu0 %v852_v32  ;;  %v872_v32 = vpack.c.bf16 %v367_v28, %v366_v27  ;;  %v687_v27 = vsub.s32 7, %v951_v8 }
  0x1b   :  { %v688_v28 = vrot.slane %v1014_v38, %v687_v27 }
  0x1c   :  { %797 = vmatmul.mubr.msk.f32.vlgmr.msra.gmra.mrb[0].mxu0 %vm65_vm0, %v64_v36  ;;  %v369_v36 = vld [vmem:[%s1103_s2 + $0xb8] sm:$0xff] }
  0xef   :  { %v798_v40 = vpop.f32.mrb[0].mxu0 }
  0xf0   :  { %v300_v41 = vpop.f32.mrb[1].mxu0  ;;  %v316_v43 = vadd.f32 %v798_v40, %v314_v39  ;;  %v876_v40 = vpack.c.bf16 %v369_v36, %v368_v35 }
  0xf1   :  { %v315_v42 = vadd.f32 %v314_v39, %v300_v41 }
  0xf2   :  { %v320_v45 = vsel %vm65_vm0, %v316_v43, 0.0 }
  0xf3   :  { %v317_v44 = vsel %vm65_vm0, %v315_v42, 0.0 }
  0xf4   :  { %318 = vadd.xlane.f32.xlu0 %v317_v44 }
  0xf8   :  { %321 = vadd.xlane.f32.xlu0 %v320_v45  ;;  %v629_v45 = vsub.s32 3, %v951_v8 }
 0x181   :  { %v319_v46 = vpop.xlane.xlu0 %318 }
 0x182   :  { %v324_v47 = vmul.f32 0.03125, %v319_v46  ;;  %v630_v46 = vrot.slane %v1014_v38, %v629_v45 }
 0x184   :  { %v326_v48 = vsub.f32 %v315_v42, %v324_v47 }
 0x185   :  { %v322_v49 = vpop.xlane.xlu0 %321 }
 0x186   :  { %v325_v50 = vmul.f32 0.03125, %v322_v49  ;;  %v328_v51 = vmul.f32 %v326_v48, %v326_v48 }
 0x188   :  { %v327_v52 = vsub.f32 %v316_v43, %v325_v50  ;;  %v330_v53 = vsel %vm65_vm0, %v328_v51, 0.0 }
 0x189   :  { %331 = vadd.xlane.f32.xlu1 %v330_v53 }
 0x18a   :  { %v329_v54 = vmul.f32 %v327_v52, %v327_v52 }
 0x18c   :  { %v333_v55 = vsel %vm65_vm0, %v329_v54, 0.0 }
 0x18d   :  { %334 = vadd.xlane.f32.xlu1 %v333_v55 }
 0x216   :  { %v332_v1 = vpop.xlane.xlu1 %331 }
 0x217   :  { %v336_v2 = vmul.f32 0.03125, %v332_v1 }
 0x219   :  { %v338_v3 = vadd.f32 1e-05, %v336_v2 }
 0x21a   :  { %v335_v4 = vpop.xlane.xlu1 %334 }
 0x21b   :  { %892 = vrsqrt.f32 %v338_v3  ;;  %v337_v5 = vmul.f32 0.03125, %v335_v4  ;;  %v661_v4 = vsub.s32 4, %v951_v8 }
 0x21d   :  { %v339_v9 = vadd.f32 1e-05, %v337_v5  ;;  %v667_v5 = vsub.s32 5, %v951_v8 }
 0x21f   :  { %894 = vrsqrt.f32 %v339_v9  ;;  %v662_v9 = vrot.slane %v1014_v38, %v661_v4 }
 0x225   :  { %v893_v13 = vpop.eup %892 }
 0x226   :  { %v342_v14 = vmul.f32 %v893_v13, %v326_v48  ;;  %v668_v13 = vrot.slane %v1014_v38, %v667_v5 }
 0x228   :  { %v348_v16 = vmul.f32 %v347_v12, %v342_v14  ;;  %v675_v14 = vsub.s32 6, %v951_v8 }
 0x229   :  { %v895_v17 = vpop.eup %894 }
 0x22a   :  { %v354_v18 = vadd.f32 %v353_v15, %v348_v16  ;;  %v343_v19 = vmul.f32 %v895_v17, %v327_v52 }
 0x22c   :  { %v356_v20 = vmax.f32 %v354_v18, 0.0  ;;  %v349_v21 = vmul.f32 %v347_v12, %v343_v19  ;;  %v676_v19 = vrot.slane %v1014_v38, %v675_v14 }
 0x22e   :  { %807 = vmatprep.mubr.msk.f32.mxu1 %vm65_vm0, %v356_v20  ;;  %v355_v24 = vadd.f32 %v353_v15, %v349_v21  ;;  %v370_v29 = vrot.slane %v356_v20, 7  ;;  %v376_v39 = vrot.slane %v356_v20, 1 }
 0x230   :  { %v357_v25 = vmax.f32 %v355_v24, 0.0 }
 0x232   :  { %808 = vmatmul.mubr.msk.f32.vlgmr.msra.gmra.mrb[0].mxu1 %vm65_vm0, %v357_v25  ;;  %v371_v30 = vrot.slane %v357_v25, 7  ;;  %v377_v37 = vrot.slane %v357_v25, 1 }
 0x233   :  { %867 = vmatpush3.bf16.msra.mxu1 %v864_v0 }
 0x234   :  { %869 = vmatprep.subr.bf16.mxu1 %v868_v26  ;;  %v373_v31 = vsel %vm45_vm1, %v371_v30, %v370_v29  ;;  %v372_v41 = vsel %vm45_vm1, %v370_v29, %v371_v30  ;;  %v378_v42 = vsel %vm56_vm3, %v376_v39, %v377_v37  ;;  %v379_v43 = vsel %vm56_vm3, %v377_v37, %v376_v39 }
 0x235   :  { %v374_v33 = vsel %vm27_vm2, %v373_v31, 0.0  ;;  %v381_v44 = vsel %vm30_vm4, %v379_v43, 0.0 }
 0x236   :  { %818 = vmatprep.mubr.msk.f32.mxu1 %vm65_vm0, %v374_v33 }
 0x237   :  { %871 = vmatpush3.bf16.msra.mxu1 %v868_v26 }
 0x238   :  { %873 = vmatprep.subr.bf16.mxu1 %v872_v32 }
 0x23a   :  { %819 = vmatmul.mubr.msk.f32.vlgmr.msra.gmra.mrb[0].mxu1 %vm65_vm0, %v372_v41 }
 0x23b   :  { %875 = vmatpush3.bf16.msra.mxu1 %v872_v32  ;;  %829 = vmatprep.mubr.msk.f32.mxu1 %vm65_vm0, %v378_v42 }
 0x23c   :  { %877 = vmatprep.subr.bf16.mxu1 %v876_v40 }
 0x23f   :  { %879 = vmatpush3.bf16.msra.mxu1 %v876_v40 }
 0x242   :  { %830 = vmatmul.mubr.msk.f32.vlgmr.msra.gmra.mrb[0].mxu1 %vm65_vm0, %v381_v44 }
 0x315   :  { %v831_v47 = vpop.f32.mrb[0].mxu1 }
 0x316   :  { %v632_v48 = vadd.f32 %v831_v47, %v630_v46  ;;  %v616_v49 = vpop.f32.mrb[1].mxu1 }
 0x317   :  { %v631_v50 = vadd.f32 %v630_v46, %v616_v49 }
 0x318   :  { %v636_v51 = vsel %vm65_vm0, %v632_v48, 0.0 }
 0x319   :  { %637 = vadd.xlane.f32.xlu1 %v636_v51  ;;  %v633_v52 = vsel %vm65_vm0, %v631_v50, 0.0 }
 0x31a   :  { %634 = vadd.xlane.f32.xlu0 %v633_v52 }
 0x3a6   :  { %v638_v53 = vpop.xlane.xlu1 %637 }
 0x3a7   :  { %v640_v54 = vmul.f32 0.03125, %v638_v53  ;;  %v635_v34 = vpop.xlane.xlu0 %634 }
 0x3a8   :  { %v639_v55 = vmul.f32 0.03125, %v635_v34 }
 0x3a9   :  { %v642_v56 = vsub.f32 %v632_v48, %v640_v54 }
 0x3aa   :  { %v641_v57 = vsub.f32 %v631_v50, %v639_v55 }
 0x3ab   :  { %v644_v58 = vmul.f32 %v642_v56, %v642_v56 }
 0x3ac   :  { %v643_v59 = vmul.f32 %v641_v57, %v641_v57 }
 0x3ad   :  { %v648_v60 = vsel %vm65_vm0, %v644_v58, 0.0 }
 0x3ae   :  { %649 = vadd.xlane.f32.xlu1 %v648_v60  ;;  %v645_v61 = vsel %vm65_vm0, %v643_v59, 0.0 }
 0x3af   :  { %646 = vadd.xlane.f32.xlu0 %v645_v61 }
 0x43b   :  { %v650_v62 = vpop.xlane.xlu1 %649 }
 0x43c   :  { %v652_v63 = vmul.f32 0.03125, %v650_v62  ;;  %v647_v0 = vpop.xlane.xlu0 %646 }
 0x43d   :  { %v651_v1 = vmul.f32 0.03125, %v647_v0 }
 0x43e   :  { %v654_v2 = vadd.f32 1e-05, %v652_v63 }
 0x43f   :  { %v653_v3 = vadd.f32 1e-05, %v651_v1 }
 0x440   :  { %896 = vrsqrt.f32 %v654_v2 }
 0x441   :  { %898 = vrsqrt.f32 %v653_v3 }
 0x44a   :  { %v897_v10 = vpop.eup %896 }
 0x44b   :  { %v899_v11 = vpop.eup %898  ;;  %v658_v12 = vmul.f32 %v897_v10, %v642_v56 }
 0x44c   :  { %v657_v15 = vmul.f32 %v899_v11, %v641_v57 }
 0x44d   :  { %v664_v16 = vmul.f32 %v662_v9, %v658_v12 }
 0x44e   :  { %v663_v17 = vmul.f32 %v662_v9, %v657_v15 }
 0x44f   :  { %v670_v18 = vadd.f32 %v668_v13, %v664_v16 }
 0x450   :  { %v669_v20 = vadd.f32 %v668_v13, %v663_v17 }
 0x451   :  { %v672_v21 = vmax.f32 %v670_v18, 0.0 }
 0x452   :  { %v671_v22 = vmax.f32 %v669_v20, 0.0 }
 0x453   :  { %v678_v23 = vmul.f32 %v676_v19, %v672_v21 }
 0x454   :  { %v677_v24 = vmul.f32 %v676_v19, %v671_v22 }
 0x455   :  { %v682_v25 = vsel %vm65_vm0, %v678_v23, 0.0 }
 0x456   :  { %683 = vadd.xlane.f32.xlu1 %v682_v25  ;;  %v679_v26 = vsel %vm65_vm0, %v677_v24, 0.0 }
 0x457   :  { %680 = vadd.xlane.f32.xlu0 %v679_v26 }
 0x4e3   :  { %v684_v29 = vpop.xlane.xlu1 %683 }
 0x4e4   :  { %v690_v30 = vadd.f32 %v688_v28, %v684_v29  ;;  %v681_v31 = vpop.xlane.xlu0 %680 }
 0x4e5   :  { %v689_v32 = vadd.f32 %v688_v28, %v681_v31 }
 0x4e6   :  { %v692_v33 = vmul.f32 %v690_v30, %v949_v7 }
 0x4e7   :  { %v691_v35 = vmul.f32 %v689_v32, %v944_v6 }
 0x4e8   :  { %v694_v36 = vmax.f32 %v692_v33, 0.0 }
 0x4e9   :  { %v693_v37 = vmax.f32 %v691_v35, 0.0 }
 0x4ea   :  { %v697_v39 = vmul.f32 1.442695, %v694_v36 }
 0x4eb   :  { %v695_v40 = vmul.f32 1.442695, %v693_v37 }
 0x4ec   :  { %900 = vpow2.f32 %v697_v39 }
 0x4ed   :  { %902 = vpow2.f32 %v695_v40 }
 0x4f6   :  { %v901_v41 = vpop.eup %900 }
 0x4f7   :  { %v903_v42 = vpop.eup %902  ;;  %v729_v43 = vadd.f32 -1.0, %v901_v41 }
 0x4f8   :  { %v728_v8 = vadd.f32 -1.0, %v903_v42 }
 0x4f9   :  { %v702_v44 = vadd.f32 0.5, %v729_v43 }
 0x4fa   :  { %v701_v38 = vadd.f32 0.5, %v728_v8 }
 0x4fb   :  { %v704_v45 = vfloor.f32 %v702_v44 }
 0x4fc   :  { %v703_v46 = vfloor.f32 %v701_v38 }
 0x4fd   :  { %v890_v47 = vtrunc.f32 %v704_v45 }
 0x4fe   :  { %v888_v48 = vtrunc.f32 %v703_v46 }
 0x4ff   :  { %v891_v49 = vcvt.f32.s32 %v890_v47 }
 0x500   :  { %v889_v7 = vcvt.f32.s32 %v888_v48 }
 0x501   :  { %v708_v6 = vadd.s32 1, %v891_v49 }
 0x502   :  { %v707_v50 = vadd.s32 1, %v889_v7 }
 0x503   :  { %711 = vst.msk [vmem:[%s1107_s4 + $0x8] sm:$0xff] %vm709_vm5, %v708_v6 }
 0x504   :  { %710 = vst.msk [vmem:[%s1107_s4] sm:$0xff] %vm709_vm5, %v707_v50 }

// kernel: _device_forward.3
= control target key start
LH: loop header
LB: loop body
LE: loop exit
PB: predicated region body
PF: predicated region fallthrough
CT: control target
= control target key end

     0   :  { %s7775_s0 = inlined_call_operand.vmem [shape: s32[17], index: 0, kind: input, shape index: {}]   ;;  %s7776_s1 = inlined_call_operand.<no memory space> [shape: s32[1], index: 1, kind: input, shape index: {}]   ;;  %s7777_s2 = inlined_call_operand.vmem [shape: f32[16,32], index: 2, kind: input, shape index: {}]   ;;  %s7778_s3 = inlined_call_operand.vmem [shape: f32[2048,32], index: 3, kind: output, shape index: {0}]   ;;  %s7779_s4 = inlined_call_operand.vmem [shape: s32[2048,1], index: 4, kind: output, shape index: {1}]  }
   0x1   :  { %s10_s17 = sshll.u32 %s7775_s0, 4  ;;  %14 = sst [smem:[#allocation4]] %s7776_s1  ;;  %s11_s17 = int_to_ptr.vmem [resolvable:$true] %s10_s17 }
   0x2   :  { %s3756_s20 = scalar_lea.vmem %s11_s17, 16  ;;  %p3761_p1 = scmp.lt.s32.totalorder %s11_s17, %s11_s17 }
   0x3   :  { %p3757_p0 = scmp.ne.s32.totalorder %s11_s17, %s3756_s20  ;;  %p3762_p2 = scmp.lt.s32.totalorder %s3756_s20, %s3756_s20 }
   0x5   :  { %p3763_p3 = por %p3762_p2, %p3761_p1 }
   0x7   :  { %p3764_p4 = pnand %p3763_p3, %p3757_p0 }
   0x9   :  { %3767 = shalt.err (!%p3764_p4)  }
   0xa   :  { %s3778_s21 = smov [#allocation3]  }
   0xb   :  { %13 = dma.vmem_to_smem %s11_s17, 16, %s3778_s21, [#allocation2] }
   0xc   :  { %3772 = dma.done.wait [#allocation2], 16 }
   0xd   :  { %3773 = vsyncadd [#allocation2], 4294967280 }
   0xe   :  { %16 = sfence }
   0xf   :  { %s3810_s22 = smov 0  }
  0x10 LB: > { %s3643_s0 = sadd.s32 4294967295, %s3776_s22   ;;  %p3646_p5 = scmp.ge.s32.totalorder %s3776_s22, 1  ;;  %s3776_s22 = sphi %s3810_s22, %s22_s22  }
  0x11   : > { %p114_p6 = scmp.lt.s32.totalorder %s3776_s22, 9 }
  0x13   : > { %p115_p7 = pnand %p3646_p5, %p114_p6 }
  0x15   : > { %118 = sbr.rel (%p115_p7) target bundleno = 566 (0x236), region = 24 }
  0x1c   : > { %s3651_s1 = sshll.u32 %s3643_s0, 8  ;;  %v149_v0 = vlaneseq  ;;  %s215_s23 = sld [smem:[#allocation3]]  ;;  %v3844_v7 = vld [vmem:[%s7777_s2] ss:$0 sm:$0xff]  ;;  %v3863_v9 = vld [vmem:[%s7777_s2 + $0x1] ss:$0 sm:$0xff] }
  0x1d   : > { %v3818_v1 = vstv %s3651_s1  ;;  %s3652_s24 = sld [smem:[#allocation3 + $0x1]]  ;;  %s3654_s25 = sld [smem:[#allocation3 + $0x2]]  ;;  %v3872_v11 = vld [vmem:[%s7777_s2 + $0x2] ss:$0 sm:$0xff]  ;;  %v3893_v15 = vld [vmem:[%s7777_s2 + $0x3] ss:$0 sm:$0xff] }
  0x1e   : > { %v3820_v2 = vshrl.u32 %v149_v0, 7  ;;  %s3656_s26 = sld [smem:[#allocation3 + $0x3]]  ;;  %s3658_s27 = sld [smem:[#allocation3 + $0x4]]  ;;  %v3907_v18 = vld [vmem:[%s7777_s2 + $0x4] ss:$0 sm:$0xff] }
  0x1f   : > { %s3826_s28 = sld [smem:[#allocation3 + $0x5]]  ;;  %s3828_s29 = sld [smem:[#allocation3 + $0x6]]  ;;  %v3927_v21 = vld [vmem:[%s7777_s2 + $0x5] ss:$0 sm:$0xff]  ;;  %v3942_v25 = vld [vmem:[%s7777_s2 + $0x6] ss:$0 sm:$0xff] }
  0x20   : > { %v3824_v3 = vadd.s32 %v3818_v1, %v3820_v2  ;;  %v151_v4 = vadd.s32 8, %v3820_v2  ;;  %s3833_s30 = sld [smem:[#allocation3 + $0x7]]  ;;  %s3835_s5 = sld [smem:[#allocation3 + $0x8]]  ;;  %v3963_v28 = vld [vmem:[%s7777_s2 + $0x7] ss:$0 sm:$0xff]  ;;  %v152_v0 = vadd.s32 16, %v3820_v2 }
  0x21   : > { %s3848_s8 = sld [smem:[#allocation3 + $0x9]]  ;;  %s3850_s9 = sld [smem:[#allocation3 + $0xa]]  ;;  %v3981_v31 = vld [vmem:[%s7777_s2 + $0x8] ss:$0 sm:$0xff]  ;;  %v4001_v34 = vld [vmem:[%s7777_s2 + $0x9] ss:$0 sm:$0xff] }
  0x22   : > { %v3831_v5 = vstv %s215_s23  ;;  %s3852_s10 = sshll.u32 %s3643_s0, 5  ;;  %s3876_s15 = sld [smem:[#allocation3 + $0xb]]  ;;  %v3881_v13 = vadd.s32 %v3818_v1, %v151_v4  ;;  %v4012_v37 = vld [vmem:[%s7777_s2 + $0xa] ss:$0 sm:$0xff]  ;;  %v4027_v40 = vld [vmem:[%s7777_s2 + $0xb] ss:$0 sm:$0xff] }
  0x23   : > { %vm217_vm0 = vcmp.ge.s32.totalorder %v3824_v3, %v3831_v5  ;;  %v3839_v6 = vstv %s3652_s24  ;;  %v3846_v8 = vstv %s3654_s25  ;;  %s3878_s16 = sld [smem:[#allocation3 + $0xc]]  ;;  %s3912_s21 = sld [smem:[#allocation3 + $0xd]]  ;;  %v4038_v43 = vld [vmem:[%s7777_s2 + $0xc] ss:$0 sm:$0xff]  ;;  %v4054_v46 = vld [vmem:[%s7777_s2 + $0xd] ss:$0 sm:$0xff] }
  0x24   : > { %vm251_vm1 = vcmp.lt.s32.totalorder %v3824_v3, %v3839_v6  ;;  %vm416_vm2 = vcmp.ge.s32.totalorder %v3824_v3, %v3839_v6  ;;  %vm450_vm3 = vcmp.lt.s32.totalorder %v3824_v3, %v3846_v8  ;;  %vm615_vm4 = vcmp.ge.s32.totalorder %v3824_v3, %v3846_v8  ;;  %s3914_s0 = sld [smem:[#allocation3 + $0xe]]  ;;  %p137_p8 = scmp.lt.s32.totalorder %s3852_s10, 255  ;;  %v4065_v49 = vld [vmem:[%s7777_s2 + $0xe] ss:$0 sm:$0xff]  ;;  %v4080_v52 = vld [vmem:[%s7777_s2 + $0xf] ss:$0 sm:$0xff] }
  0x25   : > { %vm283_vm5 = vmand %vm217_vm0, %vm251_vm1  ;;  %v3867_v10 = vstv %s3656_s26  ;;  %v3874_v12 = vstv %s3658_s27  ;;  %v3902_v17 = vstv %s3826_s28  ;;  %v3910_v19 = vstv %s3828_s29  ;;  %s3947_s26 = sld [smem:[#allocation3 + $0xf]]  ;;  %s3949_s27 = sld [smem:[#allocation3 + $0x10]] }
  0x26   : > { %v384_v14 = vsel %vm283_vm5, %v3844_v7, 0.0  ;;  %vm482_vm6 = vmand %vm416_vm2, %vm450_vm3  ;;  %vm649_vm7 = vcmp.lt.s32.totalorder %v3824_v3, %v3867_v10  ;;  %vm814_vm8 = vcmp.ge.s32.totalorder %v3824_v3, %v3867_v10  ;;  %vm848_vm9 = vcmp.lt.s32.totalorder %v3824_v3, %v3874_v12  ;;  %s7883_s10 = smov (!%p137_p8, %s3852_s10), 255 }
  0x27   : > { %v583_v16 = vsel %vm482_vm6, %v3863_v9, %v384_v14  ;;  %vm681_vm10 = vmand %vm615_vm4, %vm649_vm7  ;;  %vm1013_vm11 = vcmp.ge.s32.totalorder %v3824_v3, %v3874_v12  ;;  %vm1047_vm13 = vcmp.lt.s32.totalorder %v3824_v3, %v3902_v17  ;;  %vm1212_vm14 = vcmp.ge.s32.totalorder %v3824_v3, %v3902_v17 }
  0x28   : > { %v782_v20 = vsel %vm681_vm10, %v3872_v11, %v583_v16  ;;  %vm880_vm12 = vmand %vm814_vm8, %vm848_vm9  ;;  %vm1246_vm15 = vcmp.lt.s32.totalorder %v3824_v3, %v3910_v19  ;;  %vm1411_vm1 = vcmp.ge.s32.totalorder %v3824_v3, %v3910_v19  ;;  %v3937_v24 = vstv %s3833_s30 }
  0x29   : > { %v981_v22 = vsel %vm880_vm12, %v3893_v15, %v782_v20  ;;  %vm3930_vm0 = vmand %vm1013_vm11, %vm1047_vm13  ;;  %v3945_v26 = vstv %s3835_s5  ;;  %vm1445_vm3 = vcmp.lt.s32.totalorder %v3824_v3, %v3937_v24  ;;  %vm1610_vm4 = vcmp.ge.s32.totalorder %v3824_v3, %v3937_v24 }
  0x2a   : > { %v1180_v27 = vsel %vm3930_vm0, %v3907_v18, %v981_v22  ;;  %vm1278_vm2 = vmand %vm1212_vm14, %vm1246_vm15  ;;  %vm1644_vm5 = vcmp.lt.s32.totalorder %v3824_v3, %v3945_v26  ;;  %vm218_vm6 = vcmp.ge.s32.totalorder %v3881_v13, %v3831_v5  ;;  %vm252_vm7 = vcmp.lt.s32.totalorder %v3881_v13, %v3839_v6 }
  0x2b   : > { %v1379_v29 = vsel %vm1278_vm2, %v3927_v21, %v1180_v27  ;;  %vm1477_vm8 = vmand %vm1411_vm1, %vm1445_vm3  ;;  %vm1809_vm9 = vcmp.ge.s32.totalorder %v3824_v3, %v3945_v26  ;;  %v3976_v30 = vstv %s3848_s8  ;;  %v3984_v32 = vstv %s3850_s9 }
  0x2c   : > { %v1578_v33 = vsel %vm1477_vm8, %v3942_v25, %v1379_v29  ;;  %vm1676_vm10 = vmand %vm1610_vm4, %vm1644_vm5  ;;  %vm1843_vm11 = vcmp.lt.s32.totalorder %v3824_v3, %v3976_v30  ;;  %vm2008_vm12 = vcmp.ge.s32.totalorder %v3824_v3, %v3976_v30  ;;  %vm2042_vm13 = vcmp.lt.s32.totalorder %v3824_v3, %v3984_v32 }
  0x2d   : > { %v1777_v35 = vsel %vm1676_vm10, %v3963_v28, %v1578_v33  ;;  %vm1875_vm14 = vmand %vm1809_vm9, %vm1843_vm11  ;;  %vm2207_vm15 = vcmp.ge.s32.totalorder %v3824_v3, %v3984_v32  ;;  %v4007_v36 = vstv %s3876_s15  ;;  %v4015_v38 = vstv %s3878_s16  ;;  %s3648_s15 = sshll.u32 %s7883_s10, 3 }
  0x2e   : > { %v1976_v39 = vsel %vm1875_vm14, %v3981_v31, %v1777_v35  ;;  %vm2074_vm0 = vmand %vm2008_vm12, %vm2042_vm13  ;;  %vm2241_vm1 = vcmp.lt.s32.totalorder %v3824_v3, %v4007_v36  ;;  %vm2406_vm2 = vcmp.ge.s32.totalorder %v3824_v3, %v4007_v36  ;;  %vm2440_vm3 = vcmp.lt.s32.totalorder %v3824_v3, %v4015_v38  ;;  %s4087_s23 = scalar_lea.vmem %s7778_s3, %s3648_s15  ;;  %s6537_s25 = scalar_lea.vmem %s7779_s4, %s3648_s15 }
  0x2f   : > { %v2175_v41 = vsel %vm2074_vm0, %v4001_v34, %v1976_v39  ;;  %vm2273_vm4 = vmand %vm2207_vm15, %vm2241_vm1  ;;  %vm2605_vm5 = vcmp.ge.s32.totalorder %v3824_v3, %v4015_v38  ;;  %v4033_v42 = vstv %s3912_s21  ;;  %v4041_v44 = vstv %s3914_s0  ;;  %s6410_s0 = sld [smem:[#allocation4]] }
  0x30   : > { %v2374_v45 = vsel %vm2273_vm4, %v4012_v37, %v2175_v41  ;;  %vm2472_vm8 = vmand %vm2406_vm2, %vm2440_vm3  ;;  %vm2639_vm9 = vcmp.lt.s32.totalorder %v3824_v3, %v4033_v42  ;;  %vm2804_vm10 = vcmp.ge.s32.totalorder %v3824_v3, %v4033_v42  ;;  %vm2838_vm11 = vcmp.lt.s32.totalorder %v3824_v3, %v4041_v44 }
  0x31   : > { %v2573_v47 = vsel %vm2472_vm8, %v4027_v40, %v2374_v45  ;;  %vm2671_vm12 = vmand %vm2605_vm5, %vm2639_vm9  ;;  %vm3003_vm13 = vcmp.ge.s32.totalorder %v3824_v3, %v4041_v44  ;;  %v4060_v48 = vstv %s3947_s26  ;;  %v4068_v50 = vstv %s3949_s27 }
  0x32   : > { %v2772_v51 = vsel %vm2671_vm12, %v4038_v43, %v2573_v47  ;;  %vm2870_vm14 = vmand %vm2804_vm10, %vm2838_vm11  ;;  %vm3037_vm15 = vcmp.lt.s32.totalorder %v3824_v3, %v4060_v48  ;;  %vm3202_vm0 = vcmp.ge.s32.totalorder %v3824_v3, %v4060_v48  ;;  %vm3236_vm1 = vcmp.lt.s32.totalorder %v3824_v3, %v4068_v50 }
  0x33   : > { %v2971_v53 = vsel %vm2870_vm14, %v4054_v46, %v2772_v51  ;;  %vm3069_vm2 = vmand %vm3003_vm13, %vm3037_vm15  ;;  %vm7780_vm3 = vcmask 261120   ;;  %vm417_vm4 = vcmp.ge.s32.totalorder %v3881_v13, %v3839_v6  ;;  %vm451_vm5 = vcmp.lt.s32.totalorder %v3881_v13, %v3846_v8 }
  0x34   : > { %v3170_v54 = vsel %vm3069_vm2, %v4065_v49, %v2971_v53  ;;  %vm3268_vm8 = vmand %vm3202_vm0, %vm3236_vm1  ;;  %vm616_vm9 = vcmp.ge.s32.totalorder %v3881_v13, %v3846_v8  ;;  %vm650_vm10 = vcmp.lt.s32.totalorder %v3881_v13, %v3867_v10  ;;  %vm815_vm12 = vcmp.ge.s32.totalorder %v3881_v13, %v3867_v10 }
  0x35   : > { %v3369_v55 = vsel %vm3268_vm8, %v4080_v52, %v3170_v54  ;;  %vm284_vm11 = vmand %vm218_vm6, %vm252_vm7  ;;  %vm849_vm13 = vcmp.lt.s32.totalorder %v3881_v13, %v3874_v12  ;;  %vm1014_vm15 = vcmp.ge.s32.totalorder %v3881_v13, %v3874_v12  ;;  %vm1048_vm0 = vcmp.lt.s32.totalorder %v3881_v13, %v3902_v17 }
  0x36   : > { %3402 = vst.msk [vmem:[%s4087_s23] sm:$0xff] %vm7780_vm3, %v3369_v55  ;;  %v385_v56 = vsel %vm284_vm11, %v3844_v7, 0.0  ;;  %vm483_vm14 = vmand %vm417_vm4, %vm451_vm5  ;;  %vm1213_vm7 = vcmp.ge.s32.totalorder %v3881_v13, %v3902_v17  ;;  %vm1247_vm1 = vcmp.lt.s32.totalorder %v3881_v13, %v3910_v19  ;;  %vm1412_vm4 = vcmp.ge.s32.totalorder %v3881_v13, %v3910_v19 }
  0x37   : > { %v584_v57 = vsel %vm483_vm14, %v3863_v9, %v385_v56  ;;  %vm682_vm6 = vmand %vm616_vm9, %vm650_vm10  ;;  %vm1446_vm5 = vcmp.lt.s32.totalorder %v3881_v13, %v3937_v24  ;;  %vm1611_vm9 = vcmp.ge.s32.totalorder %v3881_v13, %v3937_v24  ;;  %vm1645_vm10 = vcmp.lt.s32.totalorder %v3881_v13, %v3945_v26 }
  0x38   : > { %v783_v58 = vsel %vm682_vm6, %v3872_v11, %v584_v57  ;;  %vm881_vm2 = vmand %vm815_vm12, %vm849_vm13  ;;  %vm1810_vm12 = vcmp.ge.s32.totalorder %v3881_v13, %v3945_v26  ;;  %vm1844_vm13 = vcmp.lt.s32.totalorder %v3881_v13, %v3976_v30  ;;  %v4164_v16 = vadd.s32 %v3818_v1, %v152_v0 }
  0x39   : > { %v982_v59 = vsel %vm881_vm2, %v3893_v15, %v783_v58  ;;  %vm1080_vm8 = vmand %vm1014_vm15, %vm1048_vm0  ;;  %vm2009_vm15 = vcmp.ge.s32.totalorder %v3881_v13, %v3976_v30  ;;  %vm2043_vm0 = vcmp.lt.s32.totalorder %v3881_v13, %v3984_v32  ;;  %v153_v51 = vadd.s32 24, %v3820_v2 }
  0x3a   : > { %v1181_v60 = vsel %vm1080_vm8, %v3907_v18, %v982_v59  ;;  %vm1279_vm11 = vmand %vm1213_vm7, %vm1247_vm1  ;;  %vm2208_vm7 = vcmp.ge.s32.totalorder %v3881_v13, %v3984_v32  ;;  %vm2242_vm1 = vcmp.lt.s32.totalorder %v3881_v13, %v4007_v36 }
  0x3b   : > { %v1380_v61 = vsel %vm1279_vm11, %v3927_v21, %v1181_v60  ;;  %vm1478_vm14 = vmand %vm1412_vm4, %vm1446_vm5  ;;  %vm2407_vm4 = vcmp.ge.s32.totalorder %v3881_v13, %v4007_v36  ;;  %vm2441_vm5 = vcmp.lt.s32.totalorder %v3881_v13, %v4015_v38  ;;  %v4245_v57 = vadd.s32 %v3818_v1, %v153_v51 }
  0x3c   : > { %v1579_v62 = vsel %vm1478_vm14, %v3942_v25, %v1380_v61  ;;  %vm1677_vm6 = vmand %vm1611_vm9, %vm1645_vm10  ;;  %vm2606_vm9 = vcmp.ge.s32.totalorder %v3881_v13, %v4015_v38  ;;  %vm2640_vm10 = vcmp.lt.s32.totalorder %v3881_v13, %v4033_v42 }
  0x3d   : > { %v1778_v63 = vsel %vm1677_vm6, %v3963_v28, %v1579_v62  ;;  %vm1876_vm2 = vmand %vm1810_vm12, %vm1844_vm13  ;;  %vm2805_vm12 = vcmp.ge.s32.totalorder %v3881_v13, %v4033_v42  ;;  %vm2839_vm13 = vcmp.lt.s32.totalorder %v3881_v13, %v4041_v44 }
  0x3e   : > { %v1977_v4 = vsel %vm1876_vm2, %v3981_v31, %v1778_v63  ;;  %vm2075_vm8 = vmand %vm2009_vm15, %vm2043_vm0  ;;  %vm3004_vm15 = vcmp.ge.s32.totalorder %v3881_v13, %v4041_v44  ;;  %vm3038_vm0 = vcmp.lt.s32.totalorder %v3881_v13, %v4060_v48 }
  0x3f   : > { %v2176_v14 = vsel %vm2075_vm8, %v4001_v34, %v1977_v4  ;;  %vm2274_vm11 = vmand %vm2208_vm7, %vm2242_vm1  ;;  %vm3203_vm7 = vcmp.ge.s32.totalorder %v3881_v13, %v4060_v48  ;;  %vm3237_vm1 = vcmp.lt.s32.totalorder %v3881_v13, %v4068_v50 }
  0x40   : > { %v2375_v20 = vsel %vm2274_vm11, %v4012_v37, %v2176_v14  ;;  %vm2473_vm14 = vmand %vm2407_vm4, %vm2441_vm5  ;;  %vm219_vm4 = vcmp.ge.s32.totalorder %v4164_v16, %v3831_v5  ;;  %vm253_vm5 = vcmp.lt.s32.totalorder %v4164_v16, %v3839_v6 }
  0x41   : > { %v2574_v22 = vsel %vm2473_vm14, %v4027_v40, %v2375_v20  ;;  %vm2672_vm6 = vmand %vm2606_vm9, %vm2640_vm10  ;;  %vm418_vm9 = vcmp.ge.s32.totalorder %v4164_v16, %v3839_v6  ;;  %vm452_vm10 = vcmp.lt.s32.totalorder %v4164_v16, %v3846_v8 }
  0x42   : > { %v2773_v23 = vsel %vm2672_vm6, %v4038_v43, %v2574_v22  ;;  %vm2871_vm2 = vmand %vm2805_vm12, %vm2839_vm13  ;;  %vm617_vm12 = vcmp.ge.s32.totalorder %v4164_v16, %v3846_v8  ;;  %vm651_vm13 = vcmp.lt.s32.totalorder %v4164_v16, %v3867_v10 }
  0x43   : > { %v2972_v27 = vsel %vm2871_vm2, %v4054_v46, %v2773_v23  ;;  %vm3070_vm8 = vmand %vm3004_vm15, %vm3038_vm0  ;;  %vm816_vm15 = vcmp.ge.s32.totalorder %v4164_v16, %v3867_v10  ;;  %vm850_vm0 = vcmp.lt.s32.totalorder %v4164_v16, %v3874_v12 }
  0x44   : > { %v3171_v29 = vsel %vm3070_vm8, %v4065_v49, %v2972_v27  ;;  %vm3269_vm11 = vmand %vm3203_vm7, %vm3237_vm1  ;;  %vm1015_vm7 = vcmp.ge.s32.totalorder %v4164_v16, %v3874_v12  ;;  %vm1049_vm1 = vcmp.lt.s32.totalorder %v4164_v16, %v3902_v17  ;;  %v154_v27 = vadd.s32 32, %v3820_v2 }
  0x45   : > { %v3370_v33 = vsel %vm3269_vm11, %v4080_v52, %v3171_v29  ;;  %vm285_vm14 = vmand %vm219_vm4, %vm253_vm5  ;;  %vm1214_vm4 = vcmp.ge.s32.totalorder %v4164_v16, %v3902_v17  ;;  %vm1248_vm5 = vcmp.lt.s32.totalorder %v4164_v16, %v3910_v19 }
  0x46   : > { %3403 = vst.msk [vmem:[%s4087_s23 + $0x8] sm:$0xff] %vm7780_vm3, %v3370_v33  ;;  %v386_v35 = vsel %vm285_vm14, %v3844_v7, 0.0  ;;  %vm484_vm6 = vmand %vm418_vm9, %vm452_vm10  ;;  %vm1413_vm9 = vcmp.ge.s32.totalorder %v4164_v16, %v3910_v19  ;;  %vm1447_vm10 = vcmp.lt.s32.totalorder %v4164_v16, %v3937_v24 }
  0x47   : > { %v585_v39 = vsel %vm484_vm6, %v3863_v9, %v386_v35  ;;  %vm683_vm2 = vmand %vm617_vm12, %vm651_vm13  ;;  %vm1612_vm12 = vcmp.ge.s32.totalorder %v4164_v16, %v3937_v24  ;;  %vm1646_vm13 = vcmp.lt.s32.totalorder %v4164_v16, %v3945_v26 }
  0x48   : > { %v784_v41 = vsel %vm683_vm2, %v3872_v11, %v585_v39  ;;  %vm882_vm8 = vmand %vm816_vm15, %vm850_vm0  ;;  %vm1811_vm15 = vcmp.ge.s32.totalorder %v4164_v16, %v3945_v26  ;;  %vm1845_vm0 = vcmp.lt.s32.totalorder %v4164_v16, %v3976_v30 }
  0x49   : > { %v983_v45 = vsel %vm882_vm8, %v3893_v15, %v784_v41  ;;  %vm1081_vm11 = vmand %vm1015_vm7, %vm1049_vm1  ;;  %vm2010_vm7 = vcmp.ge.s32.totalorder %v4164_v16, %v3976_v30  ;;  %vm2044_vm1 = vcmp.lt.s32.totalorder %v4164_v16, %v3984_v32  ;;  %v4331_v41 = vadd.s32 %v3818_v1, %v154_v27 }
  0x4a   : > { %v1182_v47 = vsel %vm1081_vm11, %v3907_v18, %v983_v45  ;;  %vm1280_vm14 = vmand %vm1214_vm4, %vm1248_vm5  ;;  %vm2209_vm4 = vcmp.ge.s32.totalorder %v4164_v16, %v3984_v32  ;;  %vm2243_vm5 = vcmp.lt.s32.totalorder %v4164_v16, %v4007_v36 }
  0x4b   : > { %v1381_v53 = vsel %vm1280_vm14, %v3927_v21, %v1182_v47  ;;  %vm1479_vm6 = vmand %vm1413_vm9, %vm1447_vm10  ;;  %vm2408_vm9 = vcmp.ge.s32.totalorder %v4164_v16, %v4007_v36  ;;  %vm2442_vm10 = vcmp.lt.s32.totalorder %v4164_v16, %v4015_v38 }
  0x4c   : > { %v1580_v54 = vsel %vm1479_vm6, %v3942_v25, %v1381_v53  ;;  %vm1678_vm2 = vmand %vm1612_vm12, %vm1646_vm13  ;;  %vm2607_vm12 = vcmp.ge.s32.totalorder %v4164_v16, %v4015_v38  ;;  %vm2641_vm13 = vcmp.lt.s32.totalorder %v4164_v16, %v4033_v42 }
  0x4d   : > { %v1779_v55 = vsel %vm1678_vm2, %v3963_v28, %v1580_v54  ;;  %vm1877_vm8 = vmand %vm1811_vm15, %vm1845_vm0  ;;  %vm2806_vm15 = vcmp.ge.s32.totalorder %v4164_v16, %v4033_v42  ;;  %vm2840_vm0 = vcmp.lt.s32.totalorder %v4164_v16, %v4041_v44 }
  0x4e   : > { %v1978_v56 = vsel %vm1877_vm8, %v3981_v31, %v1779_v55  ;;  %vm2076_vm11 = vmand %vm2010_vm7, %vm2044_vm1  ;;  %vm3005_vm7 = vcmp.ge.s32.totalorder %v4164_v16, %v4041_v44  ;;  %vm3039_vm1 = vcmp.lt.s32.totalorder %v4164_v16, %v4060_v48 }
  0x4f   : > { %v2177_v58 = vsel %vm2076_vm11, %v4001_v34, %v1978_v56  ;;  %vm2275_vm14 = vmand %vm2209_vm4, %vm2243_vm5  ;;  %vm3204_vm4 = vcmp.ge.s32.totalorder %v4164_v16, %v4060_v48  ;;  %vm3238_vm5 = vcmp.lt.s32.totalorder %v4164_v16, %v4068_v50 }
  0x50   : > { %v2376_v59 = vsel %vm2275_vm14, %v4012_v37, %v2177_v58  ;;  %vm2474_vm6 = vmand %vm2408_vm9, %vm2442_vm10  ;;  %vm220_vm9 = vcmp.ge.s32.totalorder %v4245_v57, %v3831_v5  ;;  %vm254_vm10 = vcmp.lt.s32.totalorder %v4245_v57, %v3839_v6 }
  0x51   : > { %v2575_v60 = vsel %vm2474_vm6, %v4027_v40, %v2376_v59  ;;  %vm2673_vm2 = vmand %vm2607_vm12, %vm2641_vm13  ;;  %vm419_vm12 = vcmp.ge.s32.totalorder %v4245_v57, %v3839_v6  ;;  %vm453_vm13 = vcmp.lt.s32.totalorder %v4245_v57, %v3846_v8 }
  0x52   : > { %v2774_v61 = vsel %vm2673_vm2, %v4038_v43, %v2575_v60  ;;  %vm2872_vm8 = vmand %vm2806_vm15, %vm2840_vm0  ;;  %vm618_vm15 = vcmp.ge.s32.totalorder %v4245_v57, %v3846_v8  ;;  %vm652_vm0 = vcmp.lt.s32.totalorder %v4245_v57, %v3867_v10 }
  0x53   : > { %v2973_v62 = vsel %vm2872_vm8, %v4054_v46, %v2774_v61  ;;  %vm3071_vm11 = vmand %vm3005_vm7, %vm3039_vm1  ;;  %vm817_vm7 = vcmp.ge.s32.totalorder %v4245_v57, %v3867_v10  ;;  %vm851_vm1 = vcmp.lt.s32.totalorder %v4245_v57, %v3874_v12 }
  0x54   : > { %v3172_v63 = vsel %vm3071_vm11, %v4065_v49, %v2973_v62  ;;  %vm3270_vm14 = vmand %vm3204_vm4, %vm3238_vm5  ;;  %vm1016_vm4 = vcmp.ge.s32.totalorder %v4245_v57, %v3874_v12  ;;  %vm1050_vm5 = vcmp.lt.s32.totalorder %v4245_v57, %v3902_v17 }
  0x55   : > { %v3371_v0 = vsel %vm3270_vm14, %v4080_v52, %v3172_v63  ;;  %vm286_vm6 = vmand %vm220_vm9, %vm254_vm10  ;;  %vm1215_vm9 = vcmp.ge.s32.totalorder %v4245_v57, %v3902_v17  ;;  %vm1249_vm10 = vcmp.lt.s32.totalorder %v4245_v57, %v3910_v19  ;;  %v155_v63 = vadd.s32 40, %v3820_v2 }
  0x56   : > { %3404 = vst.msk [vmem:[%s4087_s23 + $0x10] sm:$0xff] %vm7780_vm3, %v3371_v0  ;;  %v387_v4 = vsel %vm286_vm6, %v3844_v7, 0.0  ;;  %vm485_vm2 = vmand %vm419_vm12, %vm453_vm13  ;;  %vm1414_vm12 = vcmp.ge.s32.totalorder %v4245_v57, %v3910_v19  ;;  %vm1448_vm13 = vcmp.lt.s32.totalorder %v4245_v57, %v3937_v24 }
  0x57   : > { %v586_v14 = vsel %vm485_vm2, %v3863_v9, %v387_v4  ;;  %vm684_vm8 = vmand %vm618_vm15, %vm652_vm0  ;;  %vm1613_vm15 = vcmp.ge.s32.totalorder %v4245_v57, %v3937_v24  ;;  %vm1647_vm0 = vcmp.lt.s32.totalorder %v4245_v57, %v3945_v26 }
  0x58   : > { %v785_v20 = vsel %vm684_vm8, %v3872_v11, %v586_v14  ;;  %vm883_vm11 = vmand %vm817_vm7, %vm851_vm1  ;;  %vm1812_vm7 = vcmp.ge.s32.totalorder %v4245_v57, %v3945_v26  ;;  %vm1846_vm1 = vcmp.lt.s32.totalorder %v4245_v57, %v3976_v30 }
  0x59   : > { %v984_v22 = vsel %vm883_vm11, %v3893_v15, %v785_v20  ;;  %vm1082_vm14 = vmand %vm1016_vm4, %vm1050_vm5  ;;  %vm2011_vm4 = vcmp.ge.s32.totalorder %v4245_v57, %v3976_v30  ;;  %vm2045_vm5 = vcmp.lt.s32.totalorder %v4245_v57, %v3984_v32 }
  0x5a   : > { %v1183_v23 = vsel %vm1082_vm14, %v3907_v18, %v984_v22  ;;  %vm1281_vm6 = vmand %vm1215_vm9, %vm1249_vm10  ;;  %vm2210_vm9 = vcmp.ge.s32.totalorder %v4245_v57, %v3984_v32  ;;  %vm2244_vm10 = vcmp.lt.s32.totalorder %v4245_v57, %v4007_v36  ;;  %v4417_v22 = vadd.s32 %v3818_v1, %v155_v63 }
  0x5b   : > { %v1382_v29 = vsel %vm1281_vm6, %v3927_v21, %v1183_v23  ;;  %vm1480_vm2 = vmand %vm1414_vm12, %vm1448_vm13  ;;  %vm2409_vm12 = vcmp.ge.s32.totalorder %v4245_v57, %v4007_v36  ;;  %vm2443_vm13 = vcmp.lt.s32.totalorder %v4245_v57, %v4015_v38 }
  0x5c   : > { %v1581_v33 = vsel %vm1480_vm2, %v3942_v25, %v1382_v29  ;;  %vm1679_vm8 = vmand %vm1613_vm15, %vm1647_vm0  ;;  %vm2608_vm15 = vcmp.ge.s32.totalorder %v4245_v57, %v4015_v38  ;;  %vm2642_vm0 = vcmp.lt.s32.totalorder %v4245_v57, %v4033_v42 }
  0x5d   : > { %v1780_v35 = vsel %vm1679_vm8, %v3963_v28, %v1581_v33  ;;  %vm1878_vm11 = vmand %vm1812_vm7, %vm1846_vm1  ;;  %vm2807_vm7 = vcmp.ge.s32.totalorder %v4245_v57, %v4033_v42  ;;  %vm2841_vm1 = vcmp.lt.s32.totalorder %v4245_v57, %v4041_v44 }
  0x5e   : > { %v1979_v39 = vsel %vm1878_vm11, %v3981_v31, %v1780_v35  ;;  %vm2077_vm14 = vmand %vm2011_vm4, %vm2045_vm5  ;;  %vm3006_vm4 = vcmp.ge.s32.totalorder %v4245_v57, %v4041_v44  ;;  %vm3040_vm5 = vcmp.lt.s32.totalorder %v4245_v57, %v4060_v48 }
  0x5f   : > { %v2178_v45 = vsel %vm2077_vm14, %v4001_v34, %v1979_v39  ;;  %vm2276_vm6 = vmand %vm2210_vm9, %vm2244_vm10  ;;  %vm3205_vm9 = vcmp.ge.s32.totalorder %v4245_v57, %v4060_v48  ;;  %vm3239_vm10 = vcmp.lt.s32.totalorder %v4245_v57, %v4068_v50 }
  0x60   : > { %v2377_v47 = vsel %vm2276_vm6, %v4012_v37, %v2178_v45  ;;  %vm2475_vm2 = vmand %vm2409_vm12, %vm2443_vm13  ;;  %vm221_vm12 = vcmp.ge.s32.totalorder %v4331_v41, %v3831_v5  ;;  %vm255_vm13 = vcmp.lt.s32.totalorder %v4331_v41, %v3839_v6 }
  0x61   : > { %v2576_v51 = vsel %vm2475_vm2, %v4027_v40, %v2377_v47  ;;  %vm2674_vm8 = vmand %vm2608_vm15, %vm2642_vm0  ;;  %vm420_vm15 = vcmp.ge.s32.totalorder %v4331_v41, %v3839_v6  ;;  %vm454_vm0 = vcmp.lt.s32.totalorder %v4331_v41, %v3846_v8 }
  0x62   : > { %v2775_v53 = vsel %vm2674_vm8, %v4038_v43, %v2576_v51  ;;  %vm2873_vm11 = vmand %vm2807_vm7, %vm2841_vm1  ;;  %vm619_vm7 = vcmp.ge.s32.totalorder %v4331_v41, %v3846_v8  ;;  %vm653_vm1 = vcmp.lt.s32.totalorder %v4331_v41, %v3867_v10 }
  0x63   : > { %v2974_v54 = vsel %vm2873_vm11, %v4054_v46, %v2775_v53  ;;  %vm3072_vm14 = vmand %vm3006_vm4, %vm3040_vm5  ;;  %vm818_vm4 = vcmp.ge.s32.totalorder %v4331_v41, %v3867_v10  ;;  %vm852_vm5 = vcmp.lt.s32.totalorder %v4331_v41, %v3874_v12 }
  0x64   : > { %v3173_v55 = vsel %vm3072_vm14, %v4065_v49, %v2974_v54  ;;  %vm3271_vm6 = vmand %vm3205_vm9, %vm3239_vm10  ;;  %vm1017_vm9 = vcmp.ge.s32.totalorder %v4331_v41, %v3874_v12  ;;  %vm1051_vm10 = vcmp.lt.s32.totalorder %v4331_v41, %v3902_v17 }
  0x65   : > { %v3372_v56 = vsel %vm3271_vm6, %v4080_v52, %v3173_v55  ;;  %vm287_vm2 = vmand %vm221_vm12, %vm255_vm13  ;;  %vm1216_vm12 = vcmp.ge.s32.totalorder %v4331_v41, %v3902_v17  ;;  %vm1250_vm13 = vcmp.lt.s32.totalorder %v4331_v41, %v3910_v19 }
  0x66   : > { %3405 = vst.msk [vmem:[%s4087_s23 + $0x18] sm:$0xff] %vm7780_vm3, %v3372_v56  ;;  %v388_v58 = vsel %vm287_vm2, %v3844_v7, 0.0  ;;  %vm486_vm8 = vmand %vm420_vm15, %vm454_vm0  ;;  %vm1415_vm15 = vcmp.ge.s32.totalorder %v4331_v41, %v3910_v19  ;;  %vm1449_vm0 = vcmp.lt.s32.totalorder %v4331_v41, %v3937_v24  ;;  %v156_v56 = vadd.s32 48, %v3820_v2 }
  0x67   : > { %v587_v59 = vsel %vm486_vm8, %v3863_v9, %v388_v58  ;;  %vm685_vm11 = vmand %vm619_vm7, %vm653_vm1  ;;  %vm1614_vm7 = vcmp.ge.s32.totalorder %v4331_v41, %v3937_v24  ;;  %vm1648_vm1 = vcmp.lt.s32.totalorder %v4331_v41, %v3945_v26 }
  0x68   : > { %v786_v60 = vsel %vm685_vm11, %v3872_v11, %v587_v59  ;;  %vm884_vm14 = vmand %vm818_vm4, %vm852_vm5  ;;  %vm1813_vm4 = vcmp.ge.s32.totalorder %v4331_v41, %v3945_v26  ;;  %vm1847_vm5 = vcmp.lt.s32.totalorder %v4331_v41, %v3976_v30 }
  0x69   : > { %v985_v61 = vsel %vm884_vm14, %v3893_v15, %v786_v60  ;;  %vm1083_vm6 = vmand %vm1017_vm9, %vm1051_vm10  ;;  %vm2012_vm9 = vcmp.ge.s32.totalorder %v4331_v41, %v3976_v30  ;;  %vm2046_vm10 = vcmp.lt.s32.totalorder %v4331_v41, %v3984_v32 }
  0x6a   : > { %v1184_v62 = vsel %vm1083_vm6, %v3907_v18, %v985_v61  ;;  %vm1282_vm2 = vmand %vm1216_vm12, %vm1250_vm13  ;;  %vm2211_vm12 = vcmp.ge.s32.totalorder %v4331_v41, %v3984_v32  ;;  %vm2245_vm13 = vcmp.lt.s32.totalorder %v4331_v41, %v4007_v36 }
  0x6b   : > { %v1383_v0 = vsel %vm1282_vm2, %v3927_v21, %v1184_v62  ;;  %vm1481_vm8 = vmand %vm1415_vm15, %vm1449_vm0  ;;  %vm2410_vm15 = vcmp.ge.s32.totalorder %v4331_v41, %v4007_v36  ;;  %vm2444_vm0 = vcmp.lt.s32.totalorder %v4331_v41, %v4015_v38  ;;  %v4503_v62 = vadd.s32 %v3818_v1, %v156_v56 }
  0x6c   : > { %v1582_v4 = vsel %vm1481_vm8, %v3942_v25, %v1383_v0  ;;  %vm1680_vm11 = vmand %vm1614_vm7, %vm1648_vm1  ;;  %vm2609_vm7 = vcmp.ge.s32.totalorder %v4331_v41, %v4015_v38  ;;  %vm2643_vm1 = vcmp.lt.s32.totalorder %v4331_v41, %v4033_v42 }
  0x6d   : > { %v1781_v14 = vsel %vm1680_vm11, %v3963_v28, %v1582_v4  ;;  %vm1879_vm14 = vmand %vm1813_vm4, %vm1847_vm5  ;;  %vm2808_vm4 = vcmp.ge.s32.totalorder %v4331_v41, %v4033_v42  ;;  %vm2842_vm5 = vcmp.lt.s32.totalorder %v4331_v41, %v4041_v44 }
  0x6e   : > { %v1980_v20 = vsel %vm1879_vm14, %v3981_v31, %v1781_v14  ;;  %vm2078_vm6 = vmand %vm2012_vm9, %vm2046_vm10  ;;  %vm3007_vm9 = vcmp.ge.s32.totalorder %v4331_v41, %v4041_v44  ;;  %vm3041_vm10 = vcmp.lt.s32.totalorder %v4331_v41, %v4060_v48 }
  0x6f   : > { %v2179_v23 = vsel %vm2078_vm6, %v4001_v34, %v1980_v20  ;;  %vm2277_vm2 = vmand %vm2211_vm12, %vm2245_vm13  ;;  %vm3206_vm12 = vcmp.ge.s32.totalorder %v4331_v41, %v4060_v48  ;;  %vm3240_vm13 = vcmp.lt.s32.totalorder %v4331_v41, %v4068_v50 }
  0x70   : > { %v2378_v27 = vsel %vm2277_vm2, %v4012_v37, %v2179_v23  ;;  %vm2476_vm8 = vmand %vm2410_vm15, %vm2444_vm0  ;;  %vm222_vm15 = vcmp.ge.s32.totalorder %v4417_v22, %v3831_v5  ;;  %vm256_vm0 = vcmp.lt.s32.totalorder %v4417_v22, %v3839_v6 }
  0x71   : > { %v2577_v29 = vsel %vm2476_vm8, %v4027_v40, %v2378_v27  ;;  %vm2675_vm11 = vmand %vm2609_vm7, %vm2643_vm1  ;;  %vm421_vm7 = vcmp.ge.s32.totalorder %v4417_v22, %v3839_v6  ;;  %vm455_vm1 = vcmp.lt.s32.totalorder %v4417_v22, %v3846_v8 }
  0x72   : > { %v2776_v33 = vsel %vm2675_vm11, %v4038_v43, %v2577_v29  ;;  %vm2874_vm14 = vmand %vm2808_vm4, %vm2842_vm5  ;;  %vm620_vm4 = vcmp.ge.s32.totalorder %v4417_v22, %v3846_v8  ;;  %vm654_vm5 = vcmp.lt.s32.totalorder %v4417_v22, %v3867_v10 }
  0x73   : > { %v2975_v35 = vsel %vm2874_vm14, %v4054_v46, %v2776_v33  ;;  %vm3073_vm6 = vmand %vm3007_vm9, %vm3041_vm10  ;;  %vm819_vm9 = vcmp.ge.s32.totalorder %v4417_v22, %v3867_v10  ;;  %vm853_vm10 = vcmp.lt.s32.totalorder %v4417_v22, %v3874_v12 }
  0x74   : > { %v3174_v39 = vsel %vm3073_vm6, %v4065_v49, %v2975_v35  ;;  %vm3272_vm2 = vmand %vm3206_vm12, %vm3240_vm13  ;;  %vm1018_vm12 = vcmp.ge.s32.totalorder %v4417_v22, %v3874_v12  ;;  %vm1052_vm13 = vcmp.lt.s32.totalorder %v4417_v22, %v3902_v17 }
  0x75   : > { %v3373_v45 = vsel %vm3272_vm2, %v4080_v52, %v3174_v39  ;;  %vm288_vm8 = vmand %vm222_vm15, %vm256_vm0  ;;  %vm1217_vm15 = vcmp.ge.s32.totalorder %v4417_v22, %v3902_v17  ;;  %vm1251_vm0 = vcmp.lt.s32.totalorder %v4417_v22, %v3910_v19 }
  0x76   : > { %3406 = vst.msk [vmem:[%s4087_s23 + $0x20] sm:$0xff] %vm7780_vm3, %v3373_v45  ;;  %v389_v47 = vsel %vm288_vm8, %v3844_v7, 0.0  ;;  %vm487_vm11 = vmand %vm421_vm7, %vm455_vm1  ;;  %vm1416_vm7 = vcmp.ge.s32.totalorder %v4417_v22, %v3910_v19  ;;  %vm1450_vm1 = vcmp.lt.s32.totalorder %v4417_v22, %v3937_v24 }
  0x77   : > { %v588_v51 = vsel %vm487_vm11, %v3863_v9, %v389_v47  ;;  %vm686_vm14 = vmand %vm620_vm4, %vm654_vm5  ;;  %vm1615_vm4 = vcmp.ge.s32.totalorder %v4417_v22, %v3937_v24  ;;  %vm1649_vm5 = vcmp.lt.s32.totalorder %v4417_v22, %v3945_v26 }
  0x78   : > { %v787_v53 = vsel %vm686_vm14, %v3872_v11, %v588_v51  ;;  %vm885_vm6 = vmand %vm819_vm9, %vm853_vm10  ;;  %vm1814_vm9 = vcmp.ge.s32.totalorder %v4417_v22, %v3945_v26  ;;  %vm1848_vm10 = vcmp.lt.s32.totalorder %v4417_v22, %v3976_v30 }
  0x79   : > { %v986_v54 = vsel %vm885_vm6, %v3893_v15, %v787_v53  ;;  %vm1084_vm2 = vmand %vm1018_vm12, %vm1052_vm13  ;;  %vm2013_vm12 = vcmp.ge.s32.totalorder %v4417_v22, %v3976_v30  ;;  %vm2047_vm13 = vcmp.lt.s32.totalorder %v4417_v22, %v3984_v32 }
  0x7a   : > { %v1185_v55 = vsel %vm1084_vm2, %v3907_v18, %v986_v54  ;;  %vm1283_vm8 = vmand %vm1217_vm15, %vm1251_vm0  ;;  %vm2212_vm15 = vcmp.ge.s32.totalorder %v4417_v22, %v3984_v32  ;;  %vm2246_vm0 = vcmp.lt.s32.totalorder %v4417_v22, %v4007_v36 }
  0x7b   : > { %v1384_v58 = vsel %vm1283_vm8, %v3927_v21, %v1185_v55  ;;  %vm1482_vm11 = vmand %vm1416_vm7, %vm1450_vm1  ;;  %vm2411_vm7 = vcmp.ge.s32.totalorder %v4417_v22, %v4007_v36  ;;  %vm2445_vm1 = vcmp.lt.s32.totalorder %v4417_v22, %v4015_v38 }
  0x7c   : > { %v1583_v59 = vsel %vm1482_vm11, %v3942_v25, %v1384_v58  ;;  %vm1681_vm14 = vmand %vm1615_vm4, %vm1649_vm5  ;;  %vm2610_vm4 = vcmp.ge.s32.totalorder %v4417_v22, %v4015_v38  ;;  %vm2644_vm5 = vcmp.lt.s32.totalorder %v4417_v22, %v4033_v42 }
  0x7d   : > { %v1782_v60 = vsel %vm1681_vm14, %v3963_v28, %v1583_v59  ;;  %vm1880_vm6 = vmand %vm1814_vm9, %vm1848_vm10  ;;  %vm2809_vm9 = vcmp.ge.s32.totalorder %v4417_v22, %v4033_v42  ;;  %vm2843_vm10 = vcmp.lt.s32.totalorder %v4417_v22, %v4041_v44 }
  0x7e   : > { %v1981_v61 = vsel %vm1880_vm6, %v3981_v31, %v1782_v60  ;;  %vm2079_vm2 = vmand %vm2013_vm12, %vm2047_vm13  ;;  %vm3008_vm12 = vcmp.ge.s32.totalorder %v4417_v22, %v4041_v44  ;;  %vm3042_vm13 = vcmp.lt.s32.totalorder %v4417_v22, %v4060_v48 }
  0x7f   : > { %v2180_v63 = vsel %vm2079_vm2, %v4001_v34, %v1981_v61  ;;  %vm2278_vm8 = vmand %vm2212_vm15, %vm2246_vm0  ;;  %vm3207_vm15 = vcmp.ge.s32.totalorder %v4417_v22, %v4060_v48  ;;  %vm3241_vm0 = vcmp.lt.s32.totalorder %v4417_v22, %v4068_v50 }
  0x80   : > { %v2379_v0 = vsel %vm2278_vm8, %v4012_v37, %v2180_v63  ;;  %vm2477_vm11 = vmand %vm2411_vm7, %vm2445_vm1  ;;  %vm223_vm7 = vcmp.ge.s32.totalorder %v4503_v62, %v3831_v5  ;;  %vm257_vm1 = vcmp.lt.s32.totalorder %v4503_v62, %v3839_v6  ;;  %v4631_v63 = vld [vmem:[%s7777_s2] ss:$0 sm:$0xff] }
  0x81   : > { %v2578_v4 = vsel %vm2477_vm11, %v4027_v40, %v2379_v0  ;;  %vm2676_vm14 = vmand %vm2610_vm4, %vm2644_vm5  ;;  %vm422_vm4 = vcmp.ge.s32.totalorder %v4503_v62, %v3839_v6  ;;  %vm456_vm5 = vcmp.lt.s32.totalorder %v4503_v62, %v3846_v8 }
  0x82   : > { %v2777_v14 = vsel %vm2676_vm14, %v4038_v43, %v2578_v4  ;;  %vm2875_vm6 = vmand %vm2809_vm9, %vm2843_vm10  ;;  %vm621_vm9 = vcmp.ge.s32.totalorder %v4503_v62, %v3846_v8  ;;  %vm655_vm10 = vcmp.lt.s32.totalorder %v4503_v62, %v3867_v10  ;;  %v4641_v4 = vld [vmem:[%s7777_s2 + $0x1] ss:$0 sm:$0xff] }
  0x83   : > { %v2976_v20 = vsel %vm2875_vm6, %v4054_v46, %v2777_v14  ;;  %vm3074_vm2 = vmand %vm3008_vm12, %vm3042_vm13  ;;  %vm820_vm12 = vcmp.ge.s32.totalorder %v4503_v62, %v3867_v10  ;;  %vm854_vm13 = vcmp.lt.s32.totalorder %v4503_v62, %v3874_v12 }
  0x84   : > { %v3175_v23 = vsel %vm3074_vm2, %v4065_v49, %v2976_v20  ;;  %vm3273_vm8 = vmand %vm3207_vm15, %vm3241_vm0  ;;  %vm1019_vm15 = vcmp.ge.s32.totalorder %v4503_v62, %v3874_v12  ;;  %vm1053_vm0 = vcmp.lt.s32.totalorder %v4503_v62, %v3902_v17  ;;  %v4651_v20 = vld [vmem:[%s7777_s2 + $0x2] ss:$0 sm:$0xff] }
  0x85   : > { %v3374_v27 = vsel %vm3273_vm8, %v4080_v52, %v3175_v23  ;;  %vm289_vm11 = vmand %vm223_vm7, %vm257_vm1  ;;  %vm1218_vm7 = vcmp.ge.s32.totalorder %v4503_v62, %v3902_v17  ;;  %vm1252_vm1 = vcmp.lt.s32.totalorder %v4503_v62, %v3910_v19 }
  0x86   : > { %3407 = vst.msk [vmem:[%s4087_s23 + $0x28] sm:$0xff] %vm7780_vm3, %v3374_v27  ;;  %v390_v29 = vsel %vm289_vm11, %v3844_v7, 0.0  ;;  %vm488_vm14 = vmand %vm422_vm4, %vm456_vm5  ;;  %vm1417_vm4 = vcmp.ge.s32.totalorder %v4503_v62, %v3910_v19  ;;  %vm1451_vm5 = vcmp.lt.s32.totalorder %v4503_v62, %v3937_v24 }
  0x87   : > { %v589_v33 = vsel %vm488_vm14, %v3863_v9, %v390_v29  ;;  %vm687_vm6 = vmand %vm621_vm9, %vm655_vm10  ;;  %vm1616_vm9 = vcmp.ge.s32.totalorder %v4503_v62, %v3937_v24  ;;  %vm1650_vm10 = vcmp.lt.s32.totalorder %v4503_v62, %v3945_v26 }
  0x88   : > { %v788_v35 = vsel %vm687_vm6, %v3872_v11, %v589_v33  ;;  %vm886_vm2 = vmand %vm820_vm12, %vm854_vm13  ;;  %vm1815_vm12 = vcmp.ge.s32.totalorder %v4503_v62, %v3945_v26  ;;  %vm1849_vm13 = vcmp.lt.s32.totalorder %v4503_v62, %v3976_v30  ;;  %v157_v11 = vadd.s32 56, %v3820_v2 }
  0x89   : > { %v987_v7 = vsel %vm886_vm2, %v3893_v15, %v788_v35  ;;  %vm1085_vm8 = vmand %vm1019_vm15, %vm1053_vm0  ;;  %vm2014_vm15 = vcmp.ge.s32.totalorder %v4503_v62, %v3976_v30  ;;  %vm2048_vm0 = vcmp.lt.s32.totalorder %v4503_v62, %v3984_v32  ;;  %v158_v33 = vadd.s32 64, %v3820_v2 }
  0x8a   : > { %v1186_v9 = vsel %vm1085_vm8, %v3907_v18, %v987_v7  ;;  %vm1284_vm11 = vmand %vm1218_vm7, %vm1252_vm1  ;;  %vm2213_vm7 = vcmp.ge.s32.totalorder %v4503_v62, %v3984_v32  ;;  %vm2247_vm1 = vcmp.lt.s32.totalorder %v4503_v62, %v4007_v36  ;;  %v4589_v53 = vadd.s32 %v3818_v1, %v157_v11 }
  0x8b   : > { %v1385_v39 = vsel %vm1284_vm11, %v3927_v21, %v1186_v9  ;;  %vm1483_vm14 = vmand %vm1417_vm4, %vm1451_vm5  ;;  %vm2412_vm4 = vcmp.ge.s32.totalorder %v4503_v62, %v4007_v36  ;;  %vm2446_vm5 = vcmp.lt.s32.totalorder %v4503_v62, %v4015_v38  ;;  %v4750_v9 = vld [vmem:[%s7777_s2 + $0x3] ss:$0 sm:$0xff] }
  0x8c   : > { %v1584_v45 = vsel %vm1483_vm14, %v3942_v25, %v1385_v39  ;;  %vm1682_vm6 = vmand %vm1616_vm9, %vm1650_vm10  ;;  %vm2611_vm9 = vcmp.ge.s32.totalorder %v4503_v62, %v4015_v38  ;;  %vm2645_vm10 = vcmp.lt.s32.totalorder %v4503_v62, %v4033_v42  ;;  %v4760_v39 = vld [vmem:[%s7777_s2 + $0x4] ss:$0 sm:$0xff] }
  0x8d   : > { %v1783_v47 = vsel %vm1682_vm6, %v3963_v28, %v1584_v45  ;;  %vm1881_vm2 = vmand %vm1815_vm12, %vm1849_vm13  ;;  %vm2810_vm12 = vcmp.ge.s32.totalorder %v4503_v62, %v4033_v42  ;;  %vm2844_vm13 = vcmp.lt.s32.totalorder %v4503_v62, %v4041_v44 }
  0x8e   : > { %v1982_v51 = vsel %vm1881_vm2, %v3981_v31, %v1783_v47  ;;  %vm2080_vm8 = vmand %vm2014_vm15, %vm2048_vm0  ;;  %vm3009_vm15 = vcmp.ge.s32.totalorder %v4503_v62, %v4041_v44  ;;  %vm3043_vm0 = vcmp.lt.s32.totalorder %v4503_v62, %v4060_v48  ;;  %v159_v47 = vadd.s32 72, %v3820_v2 }
  0x8f   : > { %v2181_v54 = vsel %vm2080_vm8, %v4001_v34, %v1982_v51  ;;  %vm2279_vm11 = vmand %vm2213_vm7, %vm2247_vm1  ;;  %vm3208_vm7 = vcmp.ge.s32.totalorder %v4503_v62, %v4060_v48  ;;  %vm3242_vm1 = vcmp.lt.s32.totalorder %v4503_v62, %v4068_v50  ;;  %v4771_v51 = vld [vmem:[%s7777_s2 + $0x5] ss:$0 sm:$0xff] }
  0x90   : > { %v2380_v55 = vsel %vm2279_vm11, %v4012_v37, %v2181_v54  ;;  %vm2478_vm14 = vmand %vm2412_vm4, %vm2446_vm5  ;;  %vm224_vm4 = vcmp.ge.s32.totalorder %v4589_v53, %v3831_v5  ;;  %vm258_vm5 = vcmp.lt.s32.totalorder %v4589_v53, %v3839_v6 }
  0x91   : > { %v2579_v56 = vsel %vm2478_vm14, %v4027_v40, %v2380_v55  ;;  %vm2677_vm6 = vmand %vm2611_vm9, %vm2645_vm10  ;;  %vm423_vm9 = vcmp.ge.s32.totalorder %v4589_v53, %v3839_v6  ;;  %vm457_vm10 = vcmp.lt.s32.totalorder %v4589_v53, %v3846_v8  ;;  %v4784_v55 = vld [vmem:[%s7777_s2 + $0x6] ss:$0 sm:$0xff] }
  0x92   : > { %v2778_v58 = vsel %vm2677_vm6, %v4038_v43, %v2579_v56  ;;  %vm2876_vm2 = vmand %vm2810_vm12, %vm2844_vm13  ;;  %vm622_vm12 = vcmp.ge.s32.totalorder %v4589_v53, %v3846_v8  ;;  %vm656_vm13 = vcmp.lt.s32.totalorder %v4589_v53, %v3867_v10 }
  0x93   : > { %v2977_v59 = vsel %vm2876_vm2, %v4054_v46, %v2778_v58  ;;  %vm3075_vm8 = vmand %vm3009_vm15, %vm3043_vm0  ;;  %vm821_vm15 = vcmp.ge.s32.totalorder %v4589_v53, %v3867_v10  ;;  %vm855_vm0 = vcmp.lt.s32.totalorder %v4589_v53, %v3874_v12  ;;  %v4797_v58 = vld [vmem:[%s7777_s2 + $0x7] ss:$0 sm:$0xff] }
  0x94   : > { %v3176_v60 = vsel %vm3075_vm8, %v4065_v49, %v2977_v59  ;;  %vm3274_vm11 = vmand %vm3208_vm7, %vm3242_vm1  ;;  %vm1020_vm7 = vcmp.ge.s32.totalorder %v4589_v53, %v3874_v12  ;;  %vm1054_vm1 = vcmp.lt.s32.totalorder %v4589_v53, %v3902_v17 }
  0x95   : > { %v3375_v61 = vsel %vm3274_vm11, %v4080_v52, %v3176_v60  ;;  %vm290_vm14 = vmand %vm224_vm4, %vm258_vm5  ;;  %vm1219_vm4 = vcmp.ge.s32.totalorder %v4589_v53, %v3902_v17  ;;  %vm1253_vm5 = vcmp.lt.s32.totalorder %v4589_v53, %v3910_v19  ;;  %v4810_v60 = vld [vmem:[%s7777_s2 + $0x8] ss:$0 sm:$0xff] }
  0x96   : > { %3408 = vst.msk [vmem:[%s4087_s23 + $0x30] sm:$0xff] %vm7780_vm3, %v3375_v61  ;;  %v391_v0 = vsel %vm290_vm14, %v4631_v63, 0.0  ;;  %vm489_vm6 = vmand %vm423_vm9, %vm457_vm10  ;;  %vm1418_vm9 = vcmp.ge.s32.totalorder %v4589_v53, %v3910_v19  ;;  %vm1452_vm10 = vcmp.lt.s32.totalorder %v4589_v53, %v3937_v24 }
  0x97   : > { %v590_v14 = vsel %vm489_vm6, %v4641_v4, %v391_v0  ;;  %vm688_vm2 = vmand %vm622_vm12, %vm656_vm13  ;;  %vm1617_vm12 = vcmp.ge.s32.totalorder %v4589_v53, %v3937_v24  ;;  %vm1651_vm13 = vcmp.lt.s32.totalorder %v4589_v53, %v3945_v26  ;;  %v4818_v0 = vadd.s32 %v3818_v1, %v159_v47 }
  0x98   : > { %v789_v23 = vsel %vm688_vm2, %v4651_v20, %v590_v14  ;;  %vm887_vm8 = vmand %vm821_vm15, %vm855_vm0  ;;  %vm1816_vm15 = vcmp.ge.s32.totalorder %v4589_v53, %v3945_v26  ;;  %vm1850_vm0 = vcmp.lt.s32.totalorder %v4589_v53, %v3976_v30  ;;  %v4823_v14 = vld [vmem:[%s7777_s2 + $0x9] ss:$0 sm:$0xff] }
  0x99   : > { %v988_v27 = vsel %vm887_vm8, %v3893_v15, %v789_v23  ;;  %vm1086_vm11 = vmand %vm1020_vm7, %vm1054_vm1  ;;  %vm2015_vm7 = vcmp.ge.s32.totalorder %v4589_v53, %v3976_v30  ;;  %vm2049_vm1 = vcmp.lt.s32.totalorder %v4589_v53, %v3984_v32 }
  0x9a   : > { %v1187_v29 = vsel %vm1086_vm11, %v3907_v18, %v988_v27  ;;  %vm1285_vm14 = vmand %vm1219_vm4, %vm1253_vm5  ;;  %vm2214_vm4 = vcmp.ge.s32.totalorder %v4589_v53, %v3984_v32  ;;  %vm2248_vm5 = vcmp.lt.s32.totalorder %v4589_v53, %v4007_v36  ;;  %v4836_v27 = vld [vmem:[%s7777_s2 + $0xa] ss:$0 sm:$0xff] }
  0x9b   : > { %v1386_v15 = vsel %vm1285_vm14, %v3927_v21, %v1187_v29  ;;  %vm1484_vm6 = vmand %vm1418_vm9, %vm1452_vm10  ;;  %vm2413_vm9 = vcmp.ge.s32.totalorder %v4589_v53, %v4007_v36  ;;  %vm2447_vm10 = vcmp.lt.s32.totalorder %v4589_v53, %v4015_v38 }
  0x9c   : > { %v1585_v18 = vsel %vm1484_vm6, %v3942_v25, %v1386_v15  ;;  %vm1683_vm2 = vmand %vm1617_vm12, %vm1651_vm13  ;;  %vm2612_vm12 = vcmp.ge.s32.totalorder %v4589_v53, %v4015_v38  ;;  %vm2646_vm13 = vcmp.lt.s32.totalorder %v4589_v53, %v4033_v42  ;;  %v4693_v25 = vadd.s32 %v3818_v1, %v158_v33  ;;  %v4849_v33 = vld [vmem:[%s7777_s2 + $0xb] ss:$0 sm:$0xff] }
  0x9d   : > { %v1784_v35 = vsel %vm1683_vm2, %v3963_v28, %v1585_v18  ;;  %vm1882_vm8 = vmand %vm1816_vm15, %vm1850_vm0  ;;  %vm2811_vm15 = vcmp.ge.s32.totalorder %v4589_v53, %v4033_v42  ;;  %vm2845_vm0 = vcmp.lt.s32.totalorder %v4589_v53, %v4041_v44  ;;  %v4862_v18 = vld [vmem:[%s7777_s2 + $0xc] ss:$0 sm:$0xff] }
  0x9e   : > { %v1983_v21 = vsel %vm1882_vm8, %v3981_v31, %v1784_v35  ;;  %vm2081_vm11 = vmand %vm2015_vm7, %vm2049_vm1  ;;  %vm3010_vm7 = vcmp.ge.s32.totalorder %v4589_v53, %v4041_v44  ;;  %vm3044_vm1 = vcmp.lt.s32.totalorder %v4589_v53, %v4060_v48 }
  0x9f   : > { %v2182_v28 = vsel %vm2081_vm11, %v4001_v34, %v1983_v21  ;;  %vm2280_vm14 = vmand %vm2214_vm4, %vm2248_vm5  ;;  %vm3209_vm4 = vcmp.ge.s32.totalorder %v4589_v53, %v4060_v48  ;;  %vm3243_vm5 = vcmp.lt.s32.totalorder %v4589_v53, %v4068_v50  ;;  %v4872_v21 = vld [vmem:[%s7777_s2 + $0xd] ss:$0 sm:$0xff] }
  0xa0   : > { %v2381_v31 = vsel %vm2280_vm14, %v4012_v37, %v2182_v28  ;;  %vm2479_vm6 = vmand %vm2413_vm9, %vm2447_vm10  ;;  %vm225_vm9 = vcmp.ge.s32.totalorder %v4693_v25, %v3831_v5  ;;  %vm259_vm10 = vcmp.lt.s32.totalorder %v4693_v25, %v3839_v6 }
  0xa1   : > { %v2580_v7 = vsel %vm2479_vm6, %v4027_v40, %v2381_v31  ;;  %vm2678_vm2 = vmand %vm2612_vm12, %vm2646_vm13  ;;  %vm424_vm12 = vcmp.ge.s32.totalorder %v4693_v25, %v3839_v6  ;;  %vm458_vm13 = vcmp.lt.s32.totalorder %v4693_v25, %v3846_v8  ;;  %v4882_v31 = vld [vmem:[%s7777_s2 + $0xe] ss:$0 sm:$0xff] }
  0xa2   : > { %v2779_v34 = vsel %vm2678_vm2, %v4038_v43, %v2580_v7  ;;  %vm2877_vm8 = vmand %vm2811_vm15, %vm2845_vm0  ;;  %vm623_vm15 = vcmp.ge.s32.totalorder %v4693_v25, %v3846_v8  ;;  %vm657_vm0 = vcmp.lt.s32.totalorder %v4693_v25, %v3867_v10 }
  0xa3   : > { %v2978_v37 = vsel %vm2877_vm8, %v4054_v46, %v2779_v34  ;;  %vm3076_vm11 = vmand %vm3010_vm7, %vm3044_vm1  ;;  %vm822_vm7 = vcmp.ge.s32.totalorder %v4693_v25, %v3867_v10  ;;  %vm856_vm1 = vcmp.lt.s32.totalorder %v4693_v25, %v3874_v12  ;;  %v4892_v34 = vld [vmem:[%s7777_s2 + $0xf] ss:$0 sm:$0xff] }
  0xa4   : > { %v3177_v40 = vsel %vm3076_vm11, %v4065_v49, %v2978_v37  ;;  %vm3275_vm14 = vmand %vm3209_vm4, %vm3243_vm5  ;;  %vm1021_vm4 = vcmp.ge.s32.totalorder %v4693_v25, %v3874_v12  ;;  %vm1055_vm5 = vcmp.lt.s32.totalorder %v4693_v25, %v3902_v17 }
  0xa5   : > { %v3376_v43 = vsel %vm3275_vm14, %v4080_v52, %v3177_v40  ;;  %vm291_vm6 = vmand %vm225_vm9, %vm259_vm10  ;;  %vm1220_vm9 = vcmp.ge.s32.totalorder %v4693_v25, %v3902_v17  ;;  %vm1254_vm10 = vcmp.lt.s32.totalorder %v4693_v25, %v3910_v19 }
  0xa6   : > { %3409 = vst.msk [vmem:[%s4087_s23 + $0x38] sm:$0xff] %vm7780_vm3, %v3376_v43  ;;  %v392_v46 = vsel %vm291_vm6, %v4631_v63, 0.0  ;;  %vm490_vm2 = vmand %vm424_vm12, %vm458_vm13  ;;  %vm1419_vm12 = vcmp.ge.s32.totalorder %v4693_v25, %v3910_v19  ;;  %vm1453_vm13 = vcmp.lt.s32.totalorder %v4693_v25, %v3937_v24 }
  0xa7   : > { %v591_v49 = vsel %vm490_vm2, %v4641_v4, %v392_v46  ;;  %vm689_vm8 = vmand %vm623_vm15, %vm657_vm0  ;;  %vm1618_vm15 = vcmp.ge.s32.totalorder %v4693_v25, %v3937_v24  ;;  %vm1652_vm0 = vcmp.lt.s32.totalorder %v4693_v25, %v3945_v26 }
  0xa8   : > { %v790_v52 = vsel %vm689_vm8, %v4651_v20, %v591_v49  ;;  %vm888_vm11 = vmand %vm822_vm7, %vm856_vm1  ;;  %vm1817_vm7 = vcmp.ge.s32.totalorder %v4693_v25, %v3945_v26  ;;  %vm1851_vm1 = vcmp.lt.s32.totalorder %v4693_v25, %v3976_v30 }
  0xa9   : > { %v989_v11 = vsel %vm888_vm11, %v4750_v9, %v790_v52  ;;  %vm1087_vm14 = vmand %vm1021_vm4, %vm1055_vm5  ;;  %vm2016_vm4 = vcmp.ge.s32.totalorder %v4693_v25, %v3976_v30  ;;  %vm2050_vm5 = vcmp.lt.s32.totalorder %v4693_v25, %v3984_v32 }
  0xaa   : > { %v1188_v45 = vsel %vm1087_vm14, %v4760_v39, %v989_v11  ;;  %vm1286_vm6 = vmand %vm1220_vm9, %vm1254_vm10  ;;  %vm2215_vm9 = vcmp.ge.s32.totalorder %v4693_v25, %v3984_v32  ;;  %vm2249_vm10 = vcmp.lt.s32.totalorder %v4693_v25, %v4007_v36  ;;  %v160_v11 = vadd.s32 80, %v3820_v2 }
  0xab   : > { %v1387_v54 = vsel %vm1286_vm6, %v4771_v51, %v1188_v45  ;;  %vm1485_vm2 = vmand %vm1419_vm12, %vm1453_vm13  ;;  %vm2414_vm12 = vcmp.ge.s32.totalorder %v4693_v25, %v4007_v36  ;;  %vm2448_vm13 = vcmp.lt.s32.totalorder %v4693_v25, %v4015_v38 }
  0xac   : > { %v1586_v56 = vsel %vm1485_vm2, %v4784_v55, %v1387_v54  ;;  %vm1684_vm8 = vmand %vm1618_vm15, %vm1652_vm0  ;;  %vm2613_vm15 = vcmp.ge.s32.totalorder %v4693_v25, %v4015_v38  ;;  %vm2647_vm0 = vcmp.lt.s32.totalorder %v4693_v25, %v4033_v42 }
  0xad   : > { %v1785_v59 = vsel %vm1684_vm8, %v4797_v58, %v1586_v56  ;;  %vm1883_vm11 = vmand %vm1817_vm7, %vm1851_vm1  ;;  %vm2812_vm7 = vcmp.ge.s32.totalorder %v4693_v25, %v4033_v42  ;;  %vm2846_vm1 = vcmp.lt.s32.totalorder %v4693_v25, %v4041_v44 }
  0xae   : > { %v1984_v61 = vsel %vm1883_vm11, %v4810_v60, %v1785_v59  ;;  %vm2082_vm14 = vmand %vm2016_vm4, %vm2050_vm5  ;;  %vm3011_vm4 = vcmp.ge.s32.totalorder %v4693_v25, %v4041_v44  ;;  %vm3045_vm5 = vcmp.lt.s32.totalorder %v4693_v25, %v4060_v48  ;;  %v4948_v59 = vadd.s32 %v3818_v1, %v160_v11 }
  0xaf   : > { %v2183_v23 = vsel %vm2082_vm14, %v4823_v14, %v1984_v61  ;;  %vm2281_vm6 = vmand %vm2215_vm9, %vm2249_vm10  ;;  %vm3210_vm9 = vcmp.ge.s32.totalorder %v4693_v25, %v4060_v48  ;;  %vm3244_vm10 = vcmp.lt.s32.totalorder %v4693_v25, %v4068_v50 }
  0xb0   : > { %v2382_v29 = vsel %vm2281_vm6, %v4836_v27, %v2183_v23  ;;  %vm2480_vm2 = vmand %vm2414_vm12, %vm2448_vm13  ;;  %vm226_vm12 = vcmp.ge.s32.totalorder %v4818_v0, %v3831_v5  ;;  %vm260_vm13 = vcmp.lt.s32.totalorder %v4818_v0, %v3839_v6 }
  0xb1   : > { %v2581_v15 = vsel %vm2480_vm2, %v4849_v33, %v2382_v29  ;;  %vm2679_vm8 = vmand %vm2613_vm15, %vm2647_vm0  ;;  %vm425_vm15 = vcmp.ge.s32.totalorder %v4818_v0, %v3839_v6  ;;  %vm459_vm0 = vcmp.lt.s32.totalorder %v4818_v0, %v3846_v8 }
  0xb2   : > { %v2780_v35 = vsel %vm2679_vm8, %v4862_v18, %v2581_v15  ;;  %vm2878_vm11 = vmand %vm2812_vm7, %vm2846_vm1  ;;  %vm624_vm7 = vcmp.ge.s32.totalorder %v4818_v0, %v3846_v8  ;;  %vm658_vm1 = vcmp.lt.s32.totalorder %v4818_v0, %v3867_v10 }
  0xb3   : > { %v2979_v28 = vsel %vm2878_vm11, %v4872_v21, %v2780_v35  ;;  %vm3077_vm14 = vmand %vm3011_vm4, %vm3045_vm5  ;;  %vm823_vm4 = vcmp.ge.s32.totalorder %v4818_v0, %v3867_v10  ;;  %vm857_vm5 = vcmp.lt.s32.totalorder %v4818_v0, %v3874_v12 }
  0xb4   : > { %v3178_v7 = vsel %vm3077_vm14, %v4882_v31, %v2979_v28  ;;  %vm3276_vm6 = vmand %vm3210_vm9, %vm3244_vm10  ;;  %vm1022_vm9 = vcmp.ge.s32.totalorder %v4818_v0, %v3874_v12  ;;  %vm1056_vm10 = vcmp.lt.s32.totalorder %v4818_v0, %v3902_v17 }
  0xb5   : > { %v3377_v37 = vsel %vm3276_vm6, %v4892_v34, %v3178_v7  ;;  %vm292_vm2 = vmand %vm226_vm12, %vm260_vm13  ;;  %vm1221_vm12 = vcmp.ge.s32.totalorder %v4818_v0, %v3902_v17  ;;  %vm1255_vm13 = vcmp.lt.s32.totalorder %v4818_v0, %v3910_v19 }
  0xb6   : > { %3410 = vst.msk [vmem:[%s4087_s23 + $0x40] sm:$0xff] %vm7780_vm3, %v3377_v37  ;;  %v393_v40 = vsel %vm292_vm2, %v4631_v63, 0.0  ;;  %vm491_vm8 = vmand %vm425_vm15, %vm459_vm0  ;;  %vm1420_vm15 = vcmp.ge.s32.totalorder %v4818_v0, %v3910_v19  ;;  %vm1454_vm0 = vcmp.lt.s32.totalorder %v4818_v0, %v3937_v24 }
  0xb7   : > { %v592_v43 = vsel %vm491_vm8, %v4641_v4, %v393_v40  ;;  %vm690_vm11 = vmand %vm624_vm7, %vm658_vm1  ;;  %vm1619_vm7 = vcmp.ge.s32.totalorder %v4818_v0, %v3937_v24  ;;  %vm1653_vm1 = vcmp.lt.s32.totalorder %v4818_v0, %v3945_v26 }
  0xb8   : > { %v791_v46 = vsel %vm690_vm11, %v4651_v20, %v592_v43  ;;  %vm889_vm14 = vmand %vm823_vm4, %vm857_vm5  ;;  %vm1818_vm4 = vcmp.ge.s32.totalorder %v4818_v0, %v3945_v26  ;;  %vm1852_vm5 = vcmp.lt.s32.totalorder %v4818_v0, %v3976_v30 }
  0xb9   : > { %v990_v49 = vsel %vm889_vm14, %v4750_v9, %v791_v46  ;;  %vm1088_vm6 = vmand %vm1022_vm9, %vm1056_vm10  ;;  %vm2017_vm9 = vcmp.ge.s32.totalorder %v4818_v0, %v3976_v30  ;;  %vm2051_vm10 = vcmp.lt.s32.totalorder %v4818_v0, %v3984_v32 }
  0xba   : > { %v1189_v52 = vsel %vm1088_vm6, %v4760_v39, %v990_v49  ;;  %vm1287_vm2 = vmand %vm1221_vm12, %vm1255_vm13  ;;  %vm2216_vm12 = vcmp.ge.s32.totalorder %v4818_v0, %v3984_v32  ;;  %vm2250_vm13 = vcmp.lt.s32.totalorder %v4818_v0, %v4007_v36 }
  0xbb   : > { %v1388_v45 = vsel %vm1287_vm2, %v4771_v51, %v1189_v52  ;;  %vm1486_vm8 = vmand %vm1420_vm15, %vm1454_vm0  ;;  %vm2415_vm15 = vcmp.ge.s32.totalorder %v4818_v0, %v4007_v36  ;;  %vm2449_vm0 = vcmp.lt.s32.totalorder %v4818_v0, %v4015_v38  ;;  %v161_v52 = vadd.s32 88, %v3820_v2 }
  0xbc   : > { %v1587_v47 = vsel %vm1486_vm8, %v4784_v55, %v1388_v45  ;;  %vm1685_vm11 = vmand %vm1619_vm7, %vm1653_vm1  ;;  %vm2614_vm7 = vcmp.ge.s32.totalorder %v4818_v0, %v4015_v38  ;;  %vm2648_vm1 = vcmp.lt.s32.totalorder %v4818_v0, %v4033_v42 }
  0xbd   : > { %v1786_v54 = vsel %vm1685_vm11, %v4797_v58, %v1587_v47  ;;  %vm1884_vm14 = vmand %vm1818_vm4, %vm1852_vm5  ;;  %vm2813_vm4 = vcmp.ge.s32.totalorder %v4818_v0, %v4033_v42  ;;  %vm2847_vm5 = vcmp.lt.s32.totalorder %v4818_v0, %v4041_v44 }
  0xbe   : > { %v1985_v56 = vsel %vm1884_vm14, %v4810_v60, %v1786_v54  ;;  %vm2083_vm6 = vmand %vm2017_vm9, %vm2051_vm10  ;;  %vm3012_vm9 = vcmp.ge.s32.totalorder %v4818_v0, %v4041_v44  ;;  %vm3046_vm10 = vcmp.lt.s32.totalorder %v4818_v0, %v4060_v48 }
  0xbf   : > { %v2184_v61 = vsel %vm2083_vm6, %v4823_v14, %v1985_v56  ;;  %vm2282_vm2 = vmand %vm2216_vm12, %vm2250_vm13  ;;  %vm3211_vm12 = vcmp.ge.s32.totalorder %v4818_v0, %v4060_v48  ;;  %vm3245_vm13 = vcmp.lt.s32.totalorder %v4818_v0, %v4068_v50  ;;  %v5034_v56 = vadd.s32 %v3818_v1, %v161_v52 }
  0xc0   : > { %v2383_v23 = vsel %vm2282_vm2, %v4836_v27, %v2184_v61  ;;  %vm2481_vm8 = vmand %vm2415_vm15, %vm2449_vm0  ;;  %vm227_vm15 = vcmp.ge.s32.totalorder %v4948_v59, %v3831_v5  ;;  %vm261_vm0 = vcmp.lt.s32.totalorder %v4948_v59, %v3839_v6  ;;  %v162_v52 = vadd.s32 96, %v3820_v2 }
  0xc1   : > { %v2582_v29 = vsel %vm2481_vm8, %v4849_v33, %v2383_v23  ;;  %vm2680_vm11 = vmand %vm2614_vm7, %vm2648_vm1  ;;  %vm426_vm7 = vcmp.ge.s32.totalorder %v4948_v59, %v3839_v6  ;;  %vm460_vm1 = vcmp.lt.s32.totalorder %v4948_v59, %v3846_v8 }
  0xc2   : > { %v2781_v15 = vsel %vm2680_vm11, %v4862_v18, %v2582_v29  ;;  %vm2879_vm14 = vmand %vm2813_vm4, %vm2847_vm5  ;;  %vm625_vm4 = vcmp.ge.s32.totalorder %v4948_v59, %v3846_v8  ;;  %vm659_vm5 = vcmp.lt.s32.totalorder %v4948_v59, %v3867_v10 }
  0xc3   : > { %v2980_v35 = vsel %vm2879_vm14, %v4872_v21, %v2781_v15  ;;  %vm3078_vm6 = vmand %vm3012_vm9, %vm3046_vm10  ;;  %vm824_vm9 = vcmp.ge.s32.totalorder %v4948_v59, %v3867_v10  ;;  %vm858_vm10 = vcmp.lt.s32.totalorder %v4948_v59, %v3874_v12 }
  0xc4   : > { %v3179_v28 = vsel %vm3078_vm6, %v4882_v31, %v2980_v35  ;;  %vm3277_vm2 = vmand %vm3211_vm12, %vm3245_vm13  ;;  %vm1023_vm12 = vcmp.ge.s32.totalorder %v4948_v59, %v3874_v12  ;;  %vm1057_vm13 = vcmp.lt.s32.totalorder %v4948_v59, %v3902_v17 }
  0xc5   : > { %v3378_v7 = vsel %vm3277_vm2, %v4892_v34, %v3179_v28  ;;  %vm293_vm8 = vmand %vm227_vm15, %vm261_vm0  ;;  %vm1222_vm15 = vcmp.ge.s32.totalorder %v4948_v59, %v3902_v17  ;;  %vm1256_vm0 = vcmp.lt.s32.totalorder %v4948_v59, %v3910_v19 }
  0xc6   : > { %3411 = vst.msk [vmem:[%s4087_s23 + $0x48] sm:$0xff] %vm7780_vm3, %v3378_v7  ;;  %v394_v37 = vsel %vm293_vm8, %v4631_v63, 0.0  ;;  %vm492_vm11 = vmand %vm426_vm7, %vm460_vm1  ;;  %vm1421_vm7 = vcmp.ge.s32.totalorder %v4948_v59, %v3910_v19  ;;  %vm1455_vm1 = vcmp.lt.s32.totalorder %v4948_v59, %v3937_v24 }
  0xc7   : > { %v593_v40 = vsel %vm492_vm11, %v4641_v4, %v394_v37  ;;  %vm691_vm14 = vmand %vm625_vm4, %vm659_vm5  ;;  %vm1620_vm4 = vcmp.ge.s32.totalorder %v4948_v59, %v3937_v24  ;;  %vm1654_vm5 = vcmp.lt.s32.totalorder %v4948_v59, %v3945_v26 }
  0xc8   : > { %v792_v43 = vsel %vm691_vm14, %v4651_v20, %v593_v40  ;;  %vm890_vm6 = vmand %vm824_vm9, %vm858_vm10  ;;  %vm1819_vm9 = vcmp.ge.s32.totalorder %v4948_v59, %v3945_v26  ;;  %vm1853_vm10 = vcmp.lt.s32.totalorder %v4948_v59, %v3976_v30 }
  0xc9   : > { %v991_v46 = vsel %vm890_vm6, %v4750_v9, %v792_v43  ;;  %vm1089_vm2 = vmand %vm1023_vm12, %vm1057_vm13  ;;  %vm2018_vm12 = vcmp.ge.s32.totalorder %v4948_v59, %v3976_v30  ;;  %vm2052_vm13 = vcmp.lt.s32.totalorder %v4948_v59, %v3984_v32 }
  0xca   : > { %v1190_v49 = vsel %vm1089_vm2, %v4760_v39, %v991_v46  ;;  %vm1288_vm8 = vmand %vm1222_vm15, %vm1256_vm0  ;;  %vm2217_vm15 = vcmp.ge.s32.totalorder %v4948_v59, %v3984_v32  ;;  %vm2251_vm0 = vcmp.lt.s32.totalorder %v4948_v59, %v4007_v36 }
  0xcb   : > { %v1389_v11 = vsel %vm1288_vm8, %v4771_v51, %v1190_v49  ;;  %vm1487_vm11 = vmand %vm1421_vm7, %vm1455_vm1  ;;  %vm2416_vm7 = vcmp.ge.s32.totalorder %v4948_v59, %v4007_v36  ;;  %vm2450_vm1 = vcmp.lt.s32.totalorder %v4948_v59, %v4015_v38 }
  0xcc   : > { %v1588_v45 = vsel %vm1487_vm11, %v4784_v55, %v1389_v11  ;;  %vm1686_vm14 = vmand %vm1620_vm4, %vm1654_vm5  ;;  %vm2615_vm4 = vcmp.ge.s32.totalorder %v4948_v59, %v4015_v38  ;;  %vm2649_vm5 = vcmp.lt.s32.totalorder %v4948_v59, %v4033_v42 }
  0xcd   : > { %v1787_v47 = vsel %vm1686_vm14, %v4797_v58, %v1588_v45  ;;  %vm1885_vm6 = vmand %vm1819_vm9, %vm1853_vm10  ;;  %vm2814_vm9 = vcmp.ge.s32.totalorder %v4948_v59, %v4033_v42  ;;  %vm2848_vm10 = vcmp.lt.s32.totalorder %v4948_v59, %v4041_v44 }
  0xce   : > { %v1986_v54 = vsel %vm1885_vm6, %v4810_v60, %v1787_v47  ;;  %vm2084_vm2 = vmand %vm2018_vm12, %vm2052_vm13  ;;  %vm3013_vm12 = vcmp.ge.s32.totalorder %v4948_v59, %v4041_v44  ;;  %vm3047_vm13 = vcmp.lt.s32.totalorder %v4948_v59, %v4060_v48 }
  0xcf   : > { %v2185_v61 = vsel %vm2084_vm2, %v4823_v14, %v1986_v54  ;;  %vm2283_vm8 = vmand %vm2217_vm15, %vm2251_vm0  ;;  %vm3212_vm15 = vcmp.ge.s32.totalorder %v4948_v59, %v4060_v48  ;;  %vm3246_vm0 = vcmp.lt.s32.totalorder %v4948_v59, %v4068_v50 }
  0xd0   : > { %v2384_v23 = vsel %vm2283_vm8, %v4836_v27, %v2185_v61  ;;  %vm2482_vm11 = vmand %vm2416_vm7, %vm2450_vm1  ;;  %vm228_vm7 = vcmp.ge.s32.totalorder %v5034_v56, %v3831_v5  ;;  %vm262_vm1 = vcmp.lt.s32.totalorder %v5034_v56, %v3839_v6  ;;  %v5120_v61 = vadd.s32 %v3818_v1, %v162_v52 }
  0xd1   : > { %v2583_v29 = vsel %vm2482_vm11, %v4849_v33, %v2384_v23  ;;  %vm2681_vm14 = vmand %vm2615_vm4, %vm2649_vm5  ;;  %vm427_vm4 = vcmp.ge.s32.totalorder %v5034_v56, %v3839_v6  ;;  %vm461_vm5 = vcmp.lt.s32.totalorder %v5034_v56, %v3846_v8 }
  0xd2   : > { %v2782_v15 = vsel %vm2681_vm14, %v4862_v18, %v2583_v29  ;;  %vm2880_vm6 = vmand %vm2814_vm9, %vm2848_vm10  ;;  %vm626_vm9 = vcmp.ge.s32.totalorder %v5034_v56, %v3846_v8  ;;  %vm660_vm10 = vcmp.lt.s32.totalorder %v5034_v56, %v3867_v10 }
  0xd3   : > { %v2981_v35 = vsel %vm2880_vm6, %v4872_v21, %v2782_v15  ;;  %vm3079_vm2 = vmand %vm3013_vm12, %vm3047_vm13  ;;  %vm825_vm12 = vcmp.ge.s32.totalorder %v5034_v56, %v3867_v10  ;;  %vm859_vm13 = vcmp.lt.s32.totalorder %v5034_v56, %v3874_v12 }
  0xd4   : > { %v3180_v28 = vsel %vm3079_vm2, %v4882_v31, %v2981_v35  ;;  %vm3278_vm8 = vmand %vm3212_vm15, %vm3246_vm0  ;;  %vm1024_vm15 = vcmp.ge.s32.totalorder %v5034_v56, %v3874_v12  ;;  %vm1058_vm0 = vcmp.lt.s32.totalorder %v5034_v56, %v3902_v17 }
  0xd5   : > { %v3379_v7 = vsel %vm3278_vm8, %v4892_v34, %v3180_v28  ;;  %vm294_vm11 = vmand %vm228_vm7, %vm262_vm1  ;;  %vm1223_vm7 = vcmp.ge.s32.totalorder %v5034_v56, %v3902_v17  ;;  %vm1257_vm1 = vcmp.lt.s32.totalorder %v5034_v56, %v3910_v19 }
  0xd6   : > { %3412 = vst.msk [vmem:[%s4087_s23 + $0x50] sm:$0xff] %vm7780_vm3, %v3379_v7  ;;  %v395_v37 = vsel %vm294_vm11, %v4631_v63, 0.0  ;;  %vm493_vm14 = vmand %vm427_vm4, %vm461_vm5  ;;  %vm1422_vm4 = vcmp.ge.s32.totalorder %v5034_v56, %v3910_v19  ;;  %vm1456_vm5 = vcmp.lt.s32.totalorder %v5034_v56, %v3937_v24 }
  0xd7   : > { %v594_v40 = vsel %vm493_vm14, %v4641_v4, %v395_v37  ;;  %vm692_vm6 = vmand %vm626_vm9, %vm660_vm10  ;;  %vm1621_vm9 = vcmp.ge.s32.totalorder %v5034_v56, %v3937_v24  ;;  %vm1655_vm10 = vcmp.lt.s32.totalorder %v5034_v56, %v3945_v26 }
  0xd8   : > { %v793_v43 = vsel %vm692_vm6, %v4651_v20, %v594_v40  ;;  %vm891_vm2 = vmand %vm825_vm12, %vm859_vm13  ;;  %vm1820_vm12 = vcmp.ge.s32.totalorder %v5034_v56, %v3945_v26  ;;  %vm1854_vm13 = vcmp.lt.s32.totalorder %v5034_v56, %v3976_v30 }
  0xd9   : > { %v992_v46 = vsel %vm891_vm2, %v4750_v9, %v793_v43  ;;  %vm1090_vm8 = vmand %vm1024_vm15, %vm1058_vm0  ;;  %vm2019_vm15 = vcmp.ge.s32.totalorder %v5034_v56, %v3976_v30  ;;  %vm2053_vm0 = vcmp.lt.s32.totalorder %v5034_v56, %v3984_v32 }
  0xda   : > { %v1191_v49 = vsel %vm1090_vm8, %v4760_v39, %v992_v46  ;;  %vm1289_vm11 = vmand %vm1223_vm7, %vm1257_vm1  ;;  %vm2218_vm7 = vcmp.ge.s32.totalorder %v5034_v56, %v3984_v32  ;;  %vm2252_vm1 = vcmp.lt.s32.totalorder %v5034_v56, %v4007_v36 }
  0xdb   : > { %v1390_v11 = vsel %vm1289_vm11, %v4771_v51, %v1191_v49  ;;  %vm1488_vm14 = vmand %vm1422_vm4, %vm1456_vm5  ;;  %vm2417_vm4 = vcmp.ge.s32.totalorder %v5034_v56, %v4007_v36  ;;  %vm2451_vm5 = vcmp.lt.s32.totalorder %v5034_v56, %v4015_v38 }
  0xdc   : > { %v1589_v45 = vsel %vm1488_vm14, %v4784_v55, %v1390_v11  ;;  %vm1687_vm6 = vmand %vm1621_vm9, %vm1655_vm10  ;;  %vm2616_vm9 = vcmp.ge.s32.totalorder %v5034_v56, %v4015_v38  ;;  %vm2650_vm10 = vcmp.lt.s32.totalorder %v5034_v56, %v4033_v42  ;;  %v163_v11 = vadd.s32 104, %v3820_v2 }
  0xdd   : > { %v1788_v47 = vsel %vm1687_vm6, %v4797_v58, %v1589_v45  ;;  %vm1886_vm2 = vmand %vm1820_vm12, %vm1854_vm13  ;;  %vm2815_vm12 = vcmp.ge.s32.totalorder %v5034_v56, %v4033_v42  ;;  %vm2849_vm13 = vcmp.lt.s32.totalorder %v5034_v56, %v4041_v44 }
  0xde   : > { %v1987_v54 = vsel %vm1886_vm2, %v4810_v60, %v1788_v47  ;;  %vm2085_vm8 = vmand %vm2019_vm15, %vm2053_vm0  ;;  %vm3014_vm15 = vcmp.ge.s32.totalorder %v5034_v56, %v4041_v44  ;;  %vm3048_vm0 = vcmp.lt.s32.totalorder %v5034_v56, %v4060_v48 }
  0xdf   : > { %v2186_v23 = vsel %vm2085_vm8, %v4823_v14, %v1987_v54  ;;  %vm2284_vm11 = vmand %vm2218_vm7, %vm2252_vm1  ;;  %vm3213_vm7 = vcmp.ge.s32.totalorder %v5034_v56, %v4060_v48  ;;  %vm3247_vm1 = vcmp.lt.s32.totalorder %v5034_v56, %v4068_v50 }
  0xe0   : > { %v2385_v29 = vsel %vm2284_vm11, %v4836_v27, %v2186_v23  ;;  %vm2483_vm14 = vmand %vm2417_vm4, %vm2451_vm5  ;;  %vm229_vm4 = vcmp.ge.s32.totalorder %v5120_v61, %v3831_v5  ;;  %vm263_vm5 = vcmp.lt.s32.totalorder %v5120_v61, %v3839_v6 }
  0xe1   : > { %v2584_v15 = vsel %vm2483_vm14, %v4849_v33, %v2385_v29  ;;  %vm2682_vm6 = vmand %vm2616_vm9, %vm2650_vm10  ;;  %vm428_vm9 = vcmp.ge.s32.totalorder %v5120_v61, %v3839_v6  ;;  %vm462_vm10 = vcmp.lt.s32.totalorder %v5120_v61, %v3846_v8  ;;  %v5206_v29 = vadd.s32 %v3818_v1, %v163_v11 }
  0xe2   : > { %v2783_v35 = vsel %vm2682_vm6, %v4862_v18, %v2584_v15  ;;  %vm2881_vm2 = vmand %vm2815_vm12, %vm2849_vm13  ;;  %vm627_vm12 = vcmp.ge.s32.totalorder %v5120_v61, %v3846_v8  ;;  %vm661_vm13 = vcmp.lt.s32.totalorder %v5120_v61, %v3867_v10 }
  0xe3   : > { %v2982_v28 = vsel %vm2881_vm2, %v4872_v21, %v2783_v35  ;;  %vm3080_vm8 = vmand %vm3014_vm15, %vm3048_vm0  ;;  %vm826_vm15 = vcmp.ge.s32.totalorder %v5120_v61, %v3867_v10  ;;  %vm860_vm0 = vcmp.lt.s32.totalorder %v5120_v61, %v3874_v12 }
  0xe4   : > { %v3181_v7 = vsel %vm3080_vm8, %v4882_v31, %v2982_v28  ;;  %vm3279_vm11 = vmand %vm3213_vm7, %vm3247_vm1  ;;  %vm1025_vm7 = vcmp.ge.s32.totalorder %v5120_v61, %v3874_v12  ;;  %vm1059_vm1 = vcmp.lt.s32.totalorder %v5120_v61, %v3902_v17 }
  0xe5   : > { %v3380_v37 = vsel %vm3279_vm11, %v4892_v34, %v3181_v7  ;;  %vm295_vm14 = vmand %vm229_vm4, %vm263_vm5  ;;  %vm1224_vm4 = vcmp.ge.s32.totalorder %v5120_v61, %v3902_v17  ;;  %vm1258_vm5 = vcmp.lt.s32.totalorder %v5120_v61, %v3910_v19 }
  0xe6   : > { %3413 = vst.msk [vmem:[%s4087_s23 + $0x58] sm:$0xff] %vm7780_vm3, %v3380_v37  ;;  %v396_v40 = vsel %vm295_vm14, %v4631_v63, 0.0  ;;  %vm494_vm6 = vmand %vm428_vm9, %vm462_vm10  ;;  %vm1423_vm9 = vcmp.ge.s32.totalorder %v5120_v61, %v3910_v19  ;;  %vm1457_vm10 = vcmp.lt.s32.totalorder %v5120_v61, %v3937_v24 }
  0xe7   : > { %v595_v43 = vsel %vm494_vm6, %v4641_v4, %v396_v40  ;;  %vm693_vm2 = vmand %vm627_vm12, %vm661_vm13  ;;  %vm1622_vm12 = vcmp.ge.s32.totalorder %v5120_v61, %v3937_v24  ;;  %vm1656_vm13 = vcmp.lt.s32.totalorder %v5120_v61, %v3945_v26 }
  0xe8   : > { %v794_v46 = vsel %vm693_vm2, %v4651_v20, %v595_v43  ;;  %vm892_vm8 = vmand %vm826_vm15, %vm860_vm0  ;;  %vm1821_vm15 = vcmp.ge.s32.totalorder %v5120_v61, %v3945_v26  ;;  %vm1855_vm0 = vcmp.lt.s32.totalorder %v5120_v61, %v3976_v30 }
  0xe9   : > { %v993_v49 = vsel %vm892_vm8, %v4750_v9, %v794_v46  ;;  %vm1091_vm11 = vmand %vm1025_vm7, %vm1059_vm1  ;;  %vm2020_vm7 = vcmp.ge.s32.totalorder %v5120_v61, %v3976_v30  ;;  %vm2054_vm1 = vcmp.lt.s32.totalorder %v5120_v61, %v3984_v32 }
  0xea   : > { %v1192_v52 = vsel %vm1091_vm11, %v4760_v39, %v993_v49  ;;  %vm1290_vm14 = vmand %vm1224_vm4, %vm1258_vm5  ;;  %vm2219_vm4 = vcmp.ge.s32.totalorder %v5120_v61, %v3984_v32  ;;  %vm2253_vm5 = vcmp.lt.s32.totalorder %v5120_v61, %v4007_v36 }
  0xeb   : > { %v1391_v45 = vsel %vm1290_vm14, %v4771_v51, %v1192_v52  ;;  %vm1489_vm6 = vmand %vm1423_vm9, %vm1457_vm10  ;;  %vm2418_vm9 = vcmp.ge.s32.totalorder %v5120_v61, %v4007_v36  ;;  %vm2452_vm10 = vcmp.lt.s32.totalorder %v5120_v61, %v4015_v38 }
  0xec   : > { %v1590_v47 = vsel %vm1489_vm6, %v4784_v55, %v1391_v45  ;;  %vm1688_vm2 = vmand %vm1622_vm12, %vm1656_vm13  ;;  %vm2617_vm12 = vcmp.ge.s32.totalorder %v5120_v61, %v4015_v38  ;;  %vm2651_vm13 = vcmp.lt.s32.totalorder %v5120_v61, %v4033_v42 }
  0xed   : > { %v1789_v54 = vsel %vm1688_vm2, %v4797_v58, %v1590_v47  ;;  %vm1887_vm8 = vmand %vm1821_vm15, %vm1855_vm0  ;;  %vm2816_vm15 = vcmp.ge.s32.totalorder %v5120_v61, %v4033_v42  ;;  %vm2850_vm0 = vcmp.lt.s32.totalorder %v5120_v61, %v4041_v44  ;;  %v164_v47 = vadd.s32 112, %v3820_v2 }
  0xee   : > { %v1988_v23 = vsel %vm1887_vm8, %v4810_v60, %v1789_v54  ;;  %vm2086_vm11 = vmand %vm2020_vm7, %vm2054_vm1  ;;  %vm3015_vm7 = vcmp.ge.s32.totalorder %v5120_v61, %v4041_v44  ;;  %vm3049_vm1 = vcmp.lt.s32.totalorder %v5120_v61, %v4060_v48 }
  0xef   : > { %v2187_v15 = vsel %vm2086_vm11, %v4823_v14, %v1988_v23  ;;  %vm2285_vm14 = vmand %vm2219_vm4, %vm2253_vm5  ;;  %vm3214_vm4 = vcmp.ge.s32.totalorder %v5120_v61, %v4060_v48  ;;  %vm3248_vm5 = vcmp.lt.s32.totalorder %v5120_v61, %v4068_v50 }
  0xf0   : > { %v2386_v35 = vsel %vm2285_vm14, %v4836_v27, %v2187_v15  ;;  %vm2484_vm6 = vmand %vm2418_vm9, %vm2452_vm10  ;;  %vm230_vm9 = vcmp.ge.s32.totalorder %v5206_v29, %v3831_v5  ;;  %vm264_vm10 = vcmp.lt.s32.totalorder %v5206_v29, %v3839_v6 }
  0xf1   : > { %v2585_v28 = vsel %vm2484_vm6, %v4849_v33, %v2386_v35  ;;  %vm2683_vm2 = vmand %vm2617_vm12, %vm2651_vm13  ;;  %vm429_vm12 = vcmp.ge.s32.totalorder %v5206_v29, %v3839_v6  ;;  %vm463_vm13 = vcmp.lt.s32.totalorder %v5206_v29, %v3846_v8 }
  0xf2   : > { %v2784_v7 = vsel %vm2683_vm2, %v4862_v18, %v2585_v28  ;;  %vm2882_vm8 = vmand %vm2816_vm15, %vm2850_vm0  ;;  %vm628_vm15 = vcmp.ge.s32.totalorder %v5206_v29, %v3846_v8  ;;  %vm662_vm0 = vcmp.lt.s32.totalorder %v5206_v29, %v3867_v10  ;;  %v5292_v28 = vadd.s32 %v3818_v1, %v164_v47 }
  0xf3   : > { %v2983_v37 = vsel %vm2882_vm8, %v4872_v21, %v2784_v7  ;;  %vm3081_vm11 = vmand %vm3015_vm7, %vm3049_vm1  ;;  %vm827_vm7 = vcmp.ge.s32.totalorder %v5206_v29, %v3867_v10  ;;  %vm861_vm1 = vcmp.lt.s32.totalorder %v5206_v29, %v3874_v12 }
  0xf4   : > { %v3182_v40 = vsel %vm3081_vm11, %v4882_v31, %v2983_v37  ;;  %vm3280_vm14 = vmand %vm3214_vm4, %vm3248_vm5  ;;  %vm1026_vm4 = vcmp.ge.s32.totalorder %v5206_v29, %v3874_v12  ;;  %vm1060_vm5 = vcmp.lt.s32.totalorder %v5206_v29, %v3902_v17 }
  0xf5   : > { %v3381_v43 = vsel %vm3280_vm14, %v4892_v34, %v3182_v40  ;;  %vm296_vm6 = vmand %vm230_vm9, %vm264_vm10  ;;  %vm1225_vm9 = vcmp.ge.s32.totalorder %v5206_v29, %v3902_v17  ;;  %vm1259_vm10 = vcmp.lt.s32.totalorder %v5206_v29, %v3910_v19 }
  0xf6   : > { %3414 = vst.msk [vmem:[%s4087_s23 + $0x60] sm:$0xff] %vm7780_vm3, %v3381_v43  ;;  %v397_v46 = vsel %vm296_vm6, %v4631_v63, 0.0  ;;  %vm495_vm2 = vmand %vm429_vm12, %vm463_vm13  ;;  %vm1424_vm12 = vcmp.ge.s32.totalorder %v5206_v29, %v3910_v19  ;;  %vm1458_vm13 = vcmp.lt.s32.totalorder %v5206_v29, %v3937_v24 }
  0xf7   : > { %v596_v49 = vsel %vm495_vm2, %v4641_v4, %v397_v46  ;;  %vm694_vm8 = vmand %vm628_vm15, %vm662_vm0  ;;  %vm1623_vm15 = vcmp.ge.s32.totalorder %v5206_v29, %v3937_v24  ;;  %vm1657_vm0 = vcmp.lt.s32.totalorder %v5206_v29, %v3945_v26 }
  0xf8   : > { %v795_v52 = vsel %vm694_vm8, %v4651_v20, %v596_v49  ;;  %vm893_vm11 = vmand %vm827_vm7, %vm861_vm1  ;;  %vm1822_vm7 = vcmp.ge.s32.totalorder %v5206_v29, %v3945_v26  ;;  %vm1856_vm1 = vcmp.lt.s32.totalorder %v5206_v29, %v3976_v30 }
  0xf9   : > { %v994_v11 = vsel %vm893_vm11, %v4750_v9, %v795_v52  ;;  %vm1092_vm14 = vmand %vm1026_vm4, %vm1060_vm5  ;;  %vm2021_vm4 = vcmp.ge.s32.totalorder %v5206_v29, %v3976_v30  ;;  %vm2055_vm5 = vcmp.lt.s32.totalorder %v5206_v29, %v3984_v32 }
  0xfa   : > { %v1193_v45 = vsel %vm1092_vm14, %v4760_v39, %v994_v11  ;;  %vm1291_vm6 = vmand %vm1225_vm9, %vm1259_vm10  ;;  %vm2220_vm9 = vcmp.ge.s32.totalorder %v5206_v29, %v3984_v32  ;;  %vm2254_vm10 = vcmp.lt.s32.totalorder %v5206_v29, %v4007_v36 }
  0xfb   : > { %v1392_v54 = vsel %vm1291_vm6, %v4771_v51, %v1193_v45  ;;  %vm1490_vm2 = vmand %vm1424_vm12, %vm1458_vm13  ;;  %vm2419_vm12 = vcmp.ge.s32.totalorder %v5206_v29, %v4007_v36  ;;  %vm2453_vm13 = vcmp.lt.s32.totalorder %v5206_v29, %v4015_v38 }
  0xfc   : > { %v1591_v23 = vsel %vm1490_vm2, %v4784_v55, %v1392_v54  ;;  %vm1689_vm8 = vmand %vm1623_vm15, %vm1657_vm0  ;;  %vm2618_vm15 = vcmp.ge.s32.totalorder %v5206_v29, %v4015_v38  ;;  %vm2652_vm0 = vcmp.lt.s32.totalorder %v5206_v29, %v4033_v42 }
  0xfd   : > { %v1790_v15 = vsel %vm1689_vm8, %v4797_v58, %v1591_v23  ;;  %vm1888_vm11 = vmand %vm1822_vm7, %vm1856_vm1  ;;  %vm2817_vm7 = vcmp.ge.s32.totalorder %v5206_v29, %v4033_v42  ;;  %vm2851_vm1 = vcmp.lt.s32.totalorder %v5206_v29, %v4041_v44 }
  0xfe   : > { %v1989_v35 = vsel %vm1888_vm11, %v4810_v60, %v1790_v15  ;;  %vm2087_vm14 = vmand %vm2021_vm4, %vm2055_vm5  ;;  %vm3016_vm4 = vcmp.ge.s32.totalorder %v5206_v29, %v4041_v44  ;;  %vm3050_vm5 = vcmp.lt.s32.totalorder %v5206_v29, %v4060_v48 }
  0xff   : > { %v2188_v7 = vsel %vm2087_vm14, %v4823_v14, %v1989_v35  ;;  %vm2286_vm6 = vmand %vm2220_vm9, %vm2254_vm10  ;;  %vm3215_vm9 = vcmp.ge.s32.totalorder %v5206_v29, %v4060_v48  ;;  %vm3249_vm10 = vcmp.lt.s32.totalorder %v5206_v29, %v4068_v50 }
 0x100   : > { %v2387_v37 = vsel %vm2286_vm6, %v4836_v27, %v2188_v7  ;;  %vm2485_vm2 = vmand %vm2419_vm12, %vm2453_vm13  ;;  %vm231_vm12 = vcmp.ge.s32.totalorder %v5292_v28, %v3831_v5  ;;  %vm265_vm13 = vcmp.lt.s32.totalorder %v5292_v28, %v3839_v6 }
 0x101   : > { %v2586_v40 = vsel %vm2485_vm2, %v4849_v33, %v2387_v37  ;;  %vm2684_vm8 = vmand %vm2618_vm15, %vm2652_vm0  ;;  %vm430_vm15 = vcmp.ge.s32.totalorder %v5292_v28, %v3839_v6  ;;  %vm464_vm0 = vcmp.lt.s32.totalorder %v5292_v28, %v3846_v8 }
 0x102   : > { %v2785_v43 = vsel %vm2684_vm8, %v4862_v18, %v2586_v40  ;;  %vm2883_vm11 = vmand %vm2817_vm7, %vm2851_vm1  ;;  %vm629_vm7 = vcmp.ge.s32.totalorder %v5292_v28, %v3846_v8  ;;  %vm663_vm1 = vcmp.lt.s32.totalorder %v5292_v28, %v3867_v10 }
 0x103   : > { %v2984_v46 = vsel %vm2883_vm11, %v4872_v21, %v2785_v43  ;;  %vm3082_vm14 = vmand %vm3016_vm4, %vm3050_vm5  ;;  %vm828_vm4 = vcmp.ge.s32.totalorder %v5292_v28, %v3867_v10  ;;  %vm862_vm5 = vcmp.lt.s32.totalorder %v5292_v28, %v3874_v12 }
 0x104   : > { %v3183_v49 = vsel %vm3082_vm14, %v4882_v31, %v2984_v46  ;;  %vm3281_vm6 = vmand %vm3215_vm9, %vm3249_vm10  ;;  %vm1027_vm9 = vcmp.ge.s32.totalorder %v5292_v28, %v3874_v12  ;;  %vm1061_vm10 = vcmp.lt.s32.totalorder %v5292_v28, %v3902_v17 }
 0x105   : > { %v3382_v52 = vsel %vm3281_vm6, %v4892_v34, %v3183_v49  ;;  %vm297_vm2 = vmand %vm231_vm12, %vm265_vm13  ;;  %vm1226_vm12 = vcmp.ge.s32.totalorder %v5292_v28, %v3902_v17  ;;  %vm1260_vm13 = vcmp.lt.s32.totalorder %v5292_v28, %v3910_v19 }
 0x106   : > { %3415 = vst.msk [vmem:[%s4087_s23 + $0x68] sm:$0xff] %vm7780_vm3, %v3382_v52  ;;  %v398_v11 = vsel %vm297_vm2, %v4631_v63, 0.0  ;;  %vm496_vm8 = vmand %vm430_vm15, %vm464_vm0  ;;  %vm1425_vm15 = vcmp.ge.s32.totalorder %v5292_v28, %v3910_v19  ;;  %vm1459_vm0 = vcmp.lt.s32.totalorder %v5292_v28, %v3937_v24 }
 0x107   : > { %v597_v45 = vsel %vm496_vm8, %v4641_v4, %v398_v11  ;;  %vm695_vm11 = vmand %vm629_vm7, %vm663_vm1  ;;  %vm1624_vm7 = vcmp.ge.s32.totalorder %v5292_v28, %v3937_v24  ;;  %vm1658_vm1 = vcmp.lt.s32.totalorder %v5292_v28, %v3945_v26 }
 0x108   : > { %v796_v47 = vsel %vm695_vm11, %v4651_v20, %v597_v45  ;;  %vm894_vm14 = vmand %vm828_vm4, %vm862_vm5  ;;  %vm1823_vm4 = vcmp.ge.s32.totalorder %v5292_v28, %v3945_v26  ;;  %vm1857_vm5 = vcmp.lt.s32.totalorder %v5292_v28, %v3976_v30  ;;  %v165_v20 = vadd.s32 120, %v3820_v2  ;;  %v5420_v45 = vld [vmem:[%s7777_s2] ss:$0 sm:$0xff] }
 0x109   : > { %v995_v63 = vsel %vm894_vm14, %v4750_v9, %v796_v47  ;;  %vm1093_vm6 = vmand %vm1027_vm9, %vm1061_vm10  ;;  %vm2022_vm9 = vcmp.ge.s32.totalorder %v5292_v28, %v3976_v30  ;;  %vm2056_vm10 = vcmp.lt.s32.totalorder %v5292_v28, %v3984_v32 }
 0x10a   : > { %v1194_v4 = vsel %vm1093_vm6, %v4760_v39, %v995_v63  ;;  %vm1292_vm2 = vmand %vm1226_vm12, %vm1260_vm13  ;;  %vm2221_vm12 = vcmp.ge.s32.totalorder %v5292_v28, %v3984_v32  ;;  %vm2255_vm13 = vcmp.lt.s32.totalorder %v5292_v28, %v4007_v36  ;;  %v5378_v7 = vadd.s32 %v3818_v1, %v165_v20  ;;  %v5430_v63 = vld [vmem:[%s7777_s2 + $0x1] ss:$0 sm:$0xff]  ;;  %v5440_v20 = vld [vmem:[%s7777_s2 + $0x2] ss:$0 sm:$0xff] }
 0x10b   : > { %v1393_v54 = vsel %vm1292_vm2, %v4771_v51, %v1194_v4  ;;  %vm1491_vm8 = vmand %vm1425_vm15, %vm1459_vm0  ;;  %vm2420_vm15 = vcmp.ge.s32.totalorder %v5292_v28, %v4007_v36  ;;  %vm2454_vm0 = vcmp.lt.s32.totalorder %v5292_v28, %v4015_v38 }
 0x10c   : > { %v1592_v23 = vsel %vm1491_vm8, %v4784_v55, %v1393_v54  ;;  %vm1690_vm11 = vmand %vm1624_vm7, %vm1658_vm1  ;;  %vm2619_vm7 = vcmp.ge.s32.totalorder %v5292_v28, %v4015_v38  ;;  %vm2653_vm1 = vcmp.lt.s32.totalorder %v5292_v28, %v4033_v42 }
 0x10d   : > { %v1791_v15 = vsel %vm1690_vm11, %v4797_v58, %v1592_v23  ;;  %vm1889_vm14 = vmand %vm1823_vm4, %vm1857_vm5  ;;  %vm2818_vm4 = vcmp.ge.s32.totalorder %v5292_v28, %v4033_v42  ;;  %vm2852_vm5 = vcmp.lt.s32.totalorder %v5292_v28, %v4041_v44 }
 0x10e   : > { %v1990_v35 = vsel %vm1889_vm14, %v4810_v60, %v1791_v15  ;;  %vm2088_vm6 = vmand %vm2022_vm9, %vm2056_vm10  ;;  %vm3017_vm9 = vcmp.ge.s32.totalorder %v5292_v28, %v4041_v44  ;;  %vm3051_vm10 = vcmp.lt.s32.totalorder %v5292_v28, %v4060_v48 }
 0x10f   : > { %v2189_v37 = vsel %vm2088_vm6, %v4823_v14, %v1990_v35  ;;  %vm2287_vm2 = vmand %vm2221_vm12, %vm2255_vm13  ;;  %vm3216_vm12 = vcmp.ge.s32.totalorder %v5292_v28, %v4060_v48  ;;  %vm3250_vm13 = vcmp.lt.s32.totalorder %v5292_v28, %v4068_v50  ;;  %v166_v35 = vadd.s32 128, %v3820_v2 }
 0x110   : > { %v2388_v40 = vsel %vm2287_vm2, %v4836_v27, %v2189_v37  ;;  %vm2486_vm8 = vmand %vm2420_vm15, %vm2454_vm0  ;;  %vm232_vm15 = vcmp.ge.s32.totalorder %v5378_v7, %v3831_v5  ;;  %vm266_vm0 = vcmp.lt.s32.totalorder %v5378_v7, %v3839_v6 }
 0x111   : > { %v2587_v43 = vsel %vm2486_vm8, %v4849_v33, %v2388_v40  ;;  %vm2685_vm11 = vmand %vm2619_vm7, %vm2653_vm1  ;;  %vm431_vm7 = vcmp.ge.s32.totalorder %v5378_v7, %v3839_v6  ;;  %vm465_vm1 = vcmp.lt.s32.totalorder %v5378_v7, %v3846_v8 }
 0x112   : > { %v2786_v46 = vsel %vm2685_vm11, %v4862_v18, %v2587_v43  ;;  %vm2884_vm14 = vmand %vm2818_vm4, %vm2852_vm5  ;;  %vm630_vm4 = vcmp.ge.s32.totalorder %v5378_v7, %v3846_v8  ;;  %vm664_vm5 = vcmp.lt.s32.totalorder %v5378_v7, %v3867_v10  ;;  %v5539_v43 = vld [vmem:[%s7777_s2 + $0x3] ss:$0 sm:$0xff] }
 0x113   : > { %v2985_v49 = vsel %vm2884_vm14, %v4872_v21, %v2786_v46  ;;  %vm3083_vm6 = vmand %vm3017_vm9, %vm3051_vm10  ;;  %vm829_vm9 = vcmp.ge.s32.totalorder %v5378_v7, %v3867_v10  ;;  %vm863_vm10 = vcmp.lt.s32.totalorder %v5378_v7, %v3874_v12 }
 0x114   : > { %v3184_v52 = vsel %vm3083_vm6, %v4882_v31, %v2985_v49  ;;  %vm3282_vm2 = vmand %vm3216_vm12, %vm3250_vm13  ;;  %vm1028_vm12 = vcmp.ge.s32.totalorder %v5378_v7, %v3874_v12  ;;  %vm1062_vm13 = vcmp.lt.s32.totalorder %v5378_v7, %v3902_v17  ;;  %v5549_v49 = vld [vmem:[%s7777_s2 + $0x4] ss:$0 sm:$0xff] }
 0x115   : > { %v3383_v11 = vsel %vm3282_vm2, %v4892_v34, %v3184_v52  ;;  %vm298_vm8 = vmand %vm232_vm15, %vm266_vm0  ;;  %vm1227_vm15 = vcmp.ge.s32.totalorder %v5378_v7, %v3902_v17  ;;  %vm1261_vm0 = vcmp.lt.s32.totalorder %v5378_v7, %v3910_v19 }
 0x116   : > { %3416 = vst.msk [vmem:[%s4087_s23 + $0x70] sm:$0xff] %vm7780_vm3, %v3383_v11  ;;  %v399_v47 = vsel %vm298_vm8, %v5420_v45, 0.0  ;;  %vm497_vm11 = vmand %vm431_vm7, %vm465_vm1  ;;  %vm1426_vm7 = vcmp.ge.s32.totalorder %v5378_v7, %v3910_v19  ;;  %vm1460_vm1 = vcmp.lt.s32.totalorder %v5378_v7, %v3937_v24  ;;  %v167_v11 = vadd.s32 136, %v3820_v2 }
 0x117   : > { %v598_v4 = vsel %vm497_vm11, %v5430_v63, %v399_v47  ;;  %vm696_vm14 = vmand %vm630_vm4, %vm664_vm5  ;;  %vm1625_vm4 = vcmp.ge.s32.totalorder %v5378_v7, %v3937_v24  ;;  %vm1659_vm5 = vcmp.lt.s32.totalorder %v5378_v7, %v3945_v26  ;;  %v5560_v47 = vld [vmem:[%s7777_s2 + $0x5] ss:$0 sm:$0xff] }
 0x118   : > { %v797_v54 = vsel %vm696_vm14, %v5440_v20, %v598_v4  ;;  %vm895_vm6 = vmand %vm829_vm9, %vm863_vm10  ;;  %vm1824_vm9 = vcmp.ge.s32.totalorder %v5378_v7, %v3945_v26  ;;  %vm1858_vm10 = vcmp.lt.s32.totalorder %v5378_v7, %v3976_v30 }
 0x119   : > { %v996_v23 = vsel %vm895_vm6, %v4750_v9, %v797_v54  ;;  %vm1094_vm2 = vmand %vm1028_vm12, %vm1062_vm13  ;;  %vm2023_vm12 = vcmp.ge.s32.totalorder %v5378_v7, %v3976_v30  ;;  %vm2057_vm13 = vcmp.lt.s32.totalorder %v5378_v7, %v3984_v32  ;;  %v5573_v54 = vld [vmem:[%s7777_s2 + $0x6] ss:$0 sm:$0xff] }
 0x11a   : > { %v1195_v15 = vsel %vm1094_vm2, %v4760_v39, %v996_v23  ;;  %vm1293_vm8 = vmand %vm1227_vm15, %vm1261_vm0  ;;  %vm2222_vm15 = vcmp.ge.s32.totalorder %v5378_v7, %v3984_v32  ;;  %vm2256_vm0 = vcmp.lt.s32.totalorder %v5378_v7, %v4007_v36 }
 0x11b   : > { %v1394_v9 = vsel %vm1293_vm8, %v4771_v51, %v1195_v15  ;;  %vm1492_vm11 = vmand %vm1426_vm7, %vm1460_vm1  ;;  %vm2421_vm7 = vcmp.ge.s32.totalorder %v5378_v7, %v4007_v36  ;;  %vm2455_vm1 = vcmp.lt.s32.totalorder %v5378_v7, %v4015_v38  ;;  %v5586_v15 = vld [vmem:[%s7777_s2 + $0x7] ss:$0 sm:$0xff] }
 0x11c   : > { %v1593_v39 = vsel %vm1492_vm11, %v4784_v55, %v1394_v9  ;;  %vm1691_vm14 = vmand %vm1625_vm4, %vm1659_vm5  ;;  %vm2620_vm4 = vcmp.ge.s32.totalorder %v5378_v7, %v4015_v38  ;;  %vm2654_vm5 = vcmp.lt.s32.totalorder %v5378_v7, %v4033_v42  ;;  %v5482_v55 = vadd.s32 %v3818_v1, %v166_v35  ;;  %v5599_v9 = vld [vmem:[%s7777_s2 + $0x8] ss:$0 sm:$0xff] }
 0x11d   : > { %v1792_v37 = vsel %vm1691_vm14, %v4797_v58, %v1593_v39  ;;  %vm1890_vm6 = vmand %vm1824_vm9, %vm1858_vm10  ;;  %vm2819_vm9 = vcmp.ge.s32.totalorder %v5378_v7, %v4033_v42  ;;  %vm2853_vm10 = vcmp.lt.s32.totalorder %v5378_v7, %v4041_v44 }
 0x11e   : > { %v1991_v51 = vsel %vm1890_vm6, %v4810_v60, %v1792_v37  ;;  %vm2089_vm2 = vmand %vm2023_vm12, %vm2057_vm13  ;;  %vm3018_vm12 = vcmp.ge.s32.totalorder %v5378_v7, %v4041_v44  ;;  %vm3052_vm13 = vcmp.lt.s32.totalorder %v5378_v7, %v4060_v48  ;;  %v5607_v37 = vadd.s32 %v3818_v1, %v167_v11 }
 0x11f   : > { %v2190_v58 = vsel %vm2089_vm2, %v4823_v14, %v1991_v51  ;;  %vm2288_vm8 = vmand %vm2222_vm15, %vm2256_vm0  ;;  %vm3217_vm15 = vcmp.ge.s32.totalorder %v5378_v7, %v4060_v48  ;;  %vm3251_vm0 = vcmp.lt.s32.totalorder %v5378_v7, %v4068_v50  ;;  %v5612_v51 = vld [vmem:[%s7777_s2 + $0x9] ss:$0 sm:$0xff] }
 0x120   : > { %v2389_v60 = vsel %vm2288_vm8, %v4836_v27, %v2190_v58  ;;  %vm2487_vm11 = vmand %vm2421_vm7, %vm2455_vm1  ;;  %vm233_vm7 = vcmp.ge.s32.totalorder %v5482_v55, %v3831_v5  ;;  %vm267_vm1 = vcmp.lt.s32.totalorder %v5482_v55, %v3839_v6 }
 0x121   : > { %v2588_v40 = vsel %vm2487_vm11, %v4849_v33, %v2389_v60  ;;  %vm2686_vm14 = vmand %vm2620_vm4, %vm2654_vm5  ;;  %vm432_vm4 = vcmp.ge.s32.totalorder %v5482_v55, %v3839_v6  ;;  %vm466_vm5 = vcmp.lt.s32.totalorder %v5482_v55, %v3846_v8  ;;  %v5625_v60 = vld [vmem:[%s7777_s2 + $0xa] ss:$0 sm:$0xff] }
 0x122   : > { %v2787_v14 = vsel %vm2686_vm14, %v4862_v18, %v2588_v40  ;;  %vm2885_vm6 = vmand %vm2819_vm9, %vm2853_vm10  ;;  %vm631_vm9 = vcmp.ge.s32.totalorder %v5482_v55, %v3846_v8  ;;  %vm665_vm10 = vcmp.lt.s32.totalorder %v5482_v55, %v3867_v10 }
 0x123   : > { %v2986_v27 = vsel %vm2885_vm6, %v4872_v21, %v2787_v14  ;;  %vm3084_vm2 = vmand %vm3018_vm12, %vm3052_vm13  ;;  %vm830_vm12 = vcmp.ge.s32.totalorder %v5482_v55, %v3867_v10  ;;  %vm864_vm13 = vcmp.lt.s32.totalorder %v5482_v55, %v3874_v12  ;;  %v5638_v14 = vld [vmem:[%s7777_s2 + $0xb] ss:$0 sm:$0xff] }
 0x124   : > { %v3185_v33 = vsel %vm3084_vm2, %v4882_v31, %v2986_v27  ;;  %vm3283_vm8 = vmand %vm3217_vm15, %vm3251_vm0  ;;  %vm1029_vm15 = vcmp.ge.s32.totalorder %v5482_v55, %v3874_v12  ;;  %vm1063_vm0 = vcmp.lt.s32.totalorder %v5482_v55, %v3902_v17 }
 0x125   : > { %v3384_v18 = vsel %vm3283_vm8, %v4892_v34, %v3185_v33  ;;  %vm299_vm11 = vmand %vm233_vm7, %vm267_vm1  ;;  %vm1228_vm7 = vcmp.ge.s32.totalorder %v5482_v55, %v3902_v17  ;;  %vm1262_vm1 = vcmp.lt.s32.totalorder %v5482_v55, %v3910_v19  ;;  %v5651_v33 = vld [vmem:[%s7777_s2 + $0xc] ss:$0 sm:$0xff] }
 0x126   : > { %3417 = vst.msk [vmem:[%s4087_s23 + $0x78] sm:$0xff] %vm7780_vm3, %v3384_v18  ;;  %v400_v21 = vsel %vm299_vm11, %v5420_v45, 0.0  ;;  %vm498_vm14 = vmand %vm432_vm4, %vm466_vm5  ;;  %vm1427_vm4 = vcmp.ge.s32.totalorder %v5482_v55, %v3910_v19  ;;  %vm1461_vm5 = vcmp.lt.s32.totalorder %v5482_v55, %v3937_v24 }
 0x127   : > { %v599_v31 = vsel %vm498_vm14, %v5430_v63, %v400_v21  ;;  %vm697_vm6 = vmand %vm631_vm9, %vm665_vm10  ;;  %vm1626_vm9 = vcmp.ge.s32.totalorder %v5482_v55, %v3937_v24  ;;  %vm1660_vm10 = vcmp.lt.s32.totalorder %v5482_v55, %v3945_v26  ;;  %v5661_v21 = vld [vmem:[%s7777_s2 + $0xd] ss:$0 sm:$0xff] }
 0x128   : > { %v798_v34 = vsel %vm697_vm6, %v5440_v20, %v599_v31  ;;  %vm896_vm2 = vmand %vm830_vm12, %vm864_vm13  ;;  %vm1825_vm12 = vcmp.ge.s32.totalorder %v5482_v55, %v3945_v26  ;;  %vm1859_vm13 = vcmp.lt.s32.totalorder %v5482_v55, %v3976_v30 }
 0x129   : > { %v997_v46 = vsel %vm896_vm2, %v5539_v43, %v798_v34  ;;  %vm1095_vm8 = vmand %vm1029_vm15, %vm1063_vm0  ;;  %vm2024_vm15 = vcmp.ge.s32.totalorder %v5482_v55, %v3976_v30  ;;  %vm2058_vm0 = vcmp.lt.s32.totalorder %v5482_v55, %v3984_v32  ;;  %v5671_v34 = vld [vmem:[%s7777_s2 + $0xe] ss:$0 sm:$0xff] }
 0x12a   : > { %v1196_v52 = vsel %vm1095_vm8, %v5549_v49, %v997_v46  ;;  %vm1294_vm11 = vmand %vm1228_vm7, %vm1262_vm1  ;;  %vm2223_vm7 = vcmp.ge.s32.totalorder %v5482_v55, %v3984_v32  ;;  %vm2257_vm1 = vcmp.lt.s32.totalorder %v5482_v55, %v4007_v36 }
 0x12b   : > { %v1395_v4 = vsel %vm1294_vm11, %v5560_v47, %v1196_v52  ;;  %vm1493_vm14 = vmand %vm1427_vm4, %vm1461_vm5  ;;  %vm2422_vm4 = vcmp.ge.s32.totalorder %v5482_v55, %v4007_v36  ;;  %vm2456_vm5 = vcmp.lt.s32.totalorder %v5482_v55, %v4015_v38  ;;  %v5681_v52 = vld [vmem:[%s7777_s2 + $0xf] ss:$0 sm:$0xff] }
 0x12c   : > { %v1594_v23 = vsel %vm1493_vm14, %v5573_v54, %v1395_v4  ;;  %vm1692_vm6 = vmand %vm1626_vm9, %vm1660_vm10  ;;  %vm2621_vm9 = vcmp.ge.s32.totalorder %v5482_v55, %v4015_v38  ;;  %vm2655_vm10 = vcmp.lt.s32.totalorder %v5482_v55, %v4033_v42 }
 0x12d   : > { %v1793_v35 = vsel %vm1692_vm6, %v5586_v15, %v1594_v23  ;;  %vm1891_vm2 = vmand %vm1825_vm12, %vm1859_vm13  ;;  %vm2820_vm12 = vcmp.ge.s32.totalorder %v5482_v55, %v4033_v42  ;;  %vm2854_vm13 = vcmp.lt.s32.totalorder %v5482_v55, %v4041_v44 }
 0x12e   : > { %v1992_v39 = vsel %vm1891_vm2, %v5599_v9, %v1793_v35  ;;  %vm2090_vm8 = vmand %vm2024_vm15, %vm2058_vm0  ;;  %vm3019_vm15 = vcmp.ge.s32.totalorder %v5482_v55, %v4041_v44  ;;  %vm3053_vm0 = vcmp.lt.s32.totalorder %v5482_v55, %v4060_v48 }
 0x12f   : > { %v2191_v58 = vsel %vm2090_vm8, %v5612_v51, %v1992_v39  ;;  %vm2289_vm11 = vmand %vm2223_vm7, %vm2257_vm1  ;;  %vm3218_vm7 = vcmp.ge.s32.totalorder %v5482_v55, %v4060_v48  ;;  %vm3252_vm1 = vcmp.lt.s32.totalorder %v5482_v55, %v4068_v50 }
 0x130   : > { %v2390_v40 = vsel %vm2289_vm11, %v5625_v60, %v2191_v58  ;;  %vm2488_vm14 = vmand %vm2422_vm4, %vm2456_vm5  ;;  %vm234_vm4 = vcmp.ge.s32.totalorder %v5607_v37, %v3831_v5  ;;  %vm268_vm5 = vcmp.lt.s32.totalorder %v5607_v37, %v3839_v6 }
 0x131   : > { %v2589_v27 = vsel %vm2488_vm14, %v5638_v14, %v2390_v40  ;;  %vm2687_vm6 = vmand %vm2621_vm9, %vm2655_vm10  ;;  %vm433_vm9 = vcmp.ge.s32.totalorder %v5607_v37, %v3839_v6  ;;  %vm467_vm10 = vcmp.lt.s32.totalorder %v5607_v37, %v3846_v8  ;;  %v168_v40 = vadd.s32 144, %v3820_v2 }
 0x132   : > { %v2788_v18 = vsel %vm2687_vm6, %v5651_v33, %v2589_v27  ;;  %vm2886_vm2 = vmand %vm2820_vm12, %vm2854_vm13  ;;  %vm632_vm12 = vcmp.ge.s32.totalorder %v5607_v37, %v3846_v8  ;;  %vm666_vm13 = vcmp.lt.s32.totalorder %v5607_v37, %v3867_v10 }
 0x133   : > { %v2987_v31 = vsel %vm2886_vm2, %v5661_v21, %v2788_v18  ;;  %vm3085_vm8 = vmand %vm3019_vm15, %vm3053_vm0  ;;  %vm831_vm15 = vcmp.ge.s32.totalorder %v5607_v37, %v3867_v10  ;;  %vm865_vm0 = vcmp.lt.s32.totalorder %v5607_v37, %v3874_v12 }
 0x134   : > { %v3186_v46 = vsel %vm3085_vm8, %v5671_v34, %v2987_v31  ;;  %vm3284_vm11 = vmand %vm3218_vm7, %vm3252_vm1  ;;  %vm1030_vm7 = vcmp.ge.s32.totalorder %v5607_v37, %v3874_v12  ;;  %vm1064_vm1 = vcmp.lt.s32.totalorder %v5607_v37, %v3902_v17 }
 0x135   : > { %v3385_v11 = vsel %vm3284_vm11, %v5681_v52, %v3186_v46  ;;  %vm300_vm14 = vmand %vm234_vm4, %vm268_vm5  ;;  %vm1229_vm4 = vcmp.ge.s32.totalorder %v5607_v37, %v3902_v17  ;;  %vm1263_vm5 = vcmp.lt.s32.totalorder %v5607_v37, %v3910_v19 }
 0x136   : > { %3418 = vst.msk [vmem:[%s4087_s23 + $0x80] sm:$0xff] %vm7780_vm3, %v3385_v11  ;;  %v401_v4 = vsel %vm300_vm14, %v5420_v45, 0.0  ;;  %vm499_vm6 = vmand %vm433_vm9, %vm467_vm10  ;;  %vm1428_vm9 = vcmp.ge.s32.totalorder %v5607_v37, %v3910_v19  ;;  %vm1462_vm10 = vcmp.lt.s32.totalorder %v5607_v37, %v3937_v24  ;;  %v5737_v11 = vadd.s32 %v3818_v1, %v168_v40 }
 0x137   : > { %v600_v23 = vsel %vm499_vm6, %v5430_v63, %v401_v4  ;;  %vm698_vm2 = vmand %vm632_vm12, %vm666_vm13  ;;  %vm1627_vm12 = vcmp.ge.s32.totalorder %v5607_v37, %v3937_v24  ;;  %vm1661_vm13 = vcmp.lt.s32.totalorder %v5607_v37, %v3945_v26 }
 0x138   : > { %v799_v35 = vsel %vm698_vm2, %v5440_v20, %v600_v23  ;;  %vm897_vm8 = vmand %vm831_vm15, %vm865_vm0  ;;  %vm1826_vm15 = vcmp.ge.s32.totalorder %v5607_v37, %v3945_v26  ;;  %vm1860_vm0 = vcmp.lt.s32.totalorder %v5607_v37, %v3976_v30 }
 0x139   : > { %v998_v39 = vsel %vm897_vm8, %v5539_v43, %v799_v35  ;;  %vm1096_vm11 = vmand %vm1030_vm7, %vm1064_vm1  ;;  %vm2025_vm7 = vcmp.ge.s32.totalorder %v5607_v37, %v3976_v30  ;;  %vm2059_vm1 = vcmp.lt.s32.totalorder %v5607_v37, %v3984_v32 }
 0x13a   : > { %v1197_v58 = vsel %vm1096_vm11, %v5549_v49, %v998_v39  ;;  %vm1295_vm14 = vmand %vm1229_vm4, %vm1263_vm5  ;;  %vm2224_vm4 = vcmp.ge.s32.totalorder %v5607_v37, %v3984_v32  ;;  %vm2258_vm5 = vcmp.lt.s32.totalorder %v5607_v37, %v4007_v36 }
 0x13b   : > { %v1396_v27 = vsel %vm1295_vm14, %v5560_v47, %v1197_v58  ;;  %vm1494_vm6 = vmand %vm1428_vm9, %vm1462_vm10  ;;  %vm2423_vm9 = vcmp.ge.s32.totalorder %v5607_v37, %v4007_v36  ;;  %vm2457_vm10 = vcmp.lt.s32.totalorder %v5607_v37, %v4015_v38 }
 0x13c   : > { %v1595_v18 = vsel %vm1494_vm6, %v5573_v54, %v1396_v27  ;;  %vm1693_vm2 = vmand %vm1627_vm12, %vm1661_vm13  ;;  %vm2622_vm12 = vcmp.ge.s32.totalorder %v5607_v37, %v4015_v38  ;;  %vm2656_vm13 = vcmp.lt.s32.totalorder %v5607_v37, %v4033_v42 }
 0x13d   : > { %v1794_v31 = vsel %vm1693_vm2, %v5586_v15, %v1595_v18  ;;  %vm1892_vm8 = vmand %vm1826_vm15, %vm1860_vm0  ;;  %vm2821_vm15 = vcmp.ge.s32.totalorder %v5607_v37, %v4033_v42  ;;  %vm2855_vm0 = vcmp.lt.s32.totalorder %v5607_v37, %v4041_v44 }
 0x13e   : > { %v1993_v46 = vsel %vm1892_vm8, %v5599_v9, %v1794_v31  ;;  %vm2091_vm11 = vmand %vm2025_vm7, %vm2059_vm1  ;;  %vm3020_vm7 = vcmp.ge.s32.totalorder %v5607_v37, %v4041_v44  ;;  %vm3054_vm1 = vcmp.lt.s32.totalorder %v5607_v37, %v4060_v48 }
 0x13f   : > { %v2192_v4 = vsel %vm2091_vm11, %v5612_v51, %v1993_v46  ;;  %vm2290_vm14 = vmand %vm2224_vm4, %vm2258_vm5  ;;  %vm3219_vm4 = vcmp.ge.s32.totalorder %v5607_v37, %v4060_v48  ;;  %vm3253_vm5 = vcmp.lt.s32.totalorder %v5607_v37, %v4068_v50 }
 0x140   : > { %v2391_v23 = vsel %vm2290_vm14, %v5625_v60, %v2192_v4  ;;  %vm2489_vm6 = vmand %vm2423_vm9, %vm2457_vm10  ;;  %vm235_vm9 = vcmp.ge.s32.totalorder %v5737_v11, %v3831_v5  ;;  %vm269_vm10 = vcmp.lt.s32.totalorder %v5737_v11, %v3839_v6 }
 0x141   : > { %v2590_v35 = vsel %vm2489_vm6, %v5638_v14, %v2391_v23  ;;  %vm2688_vm2 = vmand %vm2622_vm12, %vm2656_vm13  ;;  %vm434_vm12 = vcmp.ge.s32.totalorder %v5737_v11, %v3839_v6  ;;  %vm468_vm13 = vcmp.lt.s32.totalorder %v5737_v11, %v3846_v8 }
 0x142   : > { %v2789_v39 = vsel %vm2688_vm2, %v5651_v33, %v2590_v35  ;;  %vm2887_vm8 = vmand %vm2821_vm15, %vm2855_vm0  ;;  %vm633_vm15 = vcmp.ge.s32.totalorder %v5737_v11, %v3846_v8  ;;  %vm667_vm0 = vcmp.lt.s32.totalorder %v5737_v11, %v3867_v10  ;;  %v169_v35 = vadd.s32 152, %v3820_v2 }
 0x143   : > { %v2988_v58 = vsel %vm2887_vm8, %v5661_v21, %v2789_v39  ;;  %vm3086_vm11 = vmand %vm3020_vm7, %vm3054_vm1  ;;  %vm832_vm7 = vcmp.ge.s32.totalorder %v5737_v11, %v3867_v10  ;;  %vm866_vm1 = vcmp.lt.s32.totalorder %v5737_v11, %v3874_v12 }
 0x144   : > { %v3187_v40 = vsel %vm3086_vm11, %v5671_v34, %v2988_v58  ;;  %vm3285_vm14 = vmand %vm3219_vm4, %vm3253_vm5  ;;  %vm1031_vm4 = vcmp.ge.s32.totalorder %v5737_v11, %v3874_v12  ;;  %vm1065_vm5 = vcmp.lt.s32.totalorder %v5737_v11, %v3902_v17 }
 0x145   : > { %v3386_v27 = vsel %vm3285_vm14, %v5681_v52, %v3187_v40  ;;  %vm301_vm6 = vmand %vm235_vm9, %vm269_vm10  ;;  %vm1230_vm9 = vcmp.ge.s32.totalorder %v5737_v11, %v3902_v17  ;;  %vm1264_vm10 = vcmp.lt.s32.totalorder %v5737_v11, %v3910_v19 }
 0x146   : > { %3419 = vst.msk [vmem:[%s4087_s23 + $0x88] sm:$0xff] %vm7780_vm3, %v3386_v27  ;;  %v402_v18 = vsel %vm301_vm6, %v5420_v45, 0.0  ;;  %vm500_vm2 = vmand %vm434_vm12, %vm468_vm13  ;;  %vm1429_vm12 = vcmp.ge.s32.totalorder %v5737_v11, %v3910_v19  ;;  %vm1463_vm13 = vcmp.lt.s32.totalorder %v5737_v11, %v3937_v24 }
 0x147   : > { %v601_v31 = vsel %vm500_vm2, %v5430_v63, %v402_v18  ;;  %vm699_vm8 = vmand %vm633_vm15, %vm667_vm0  ;;  %vm1628_vm15 = vcmp.ge.s32.totalorder %v5737_v11, %v3937_v24  ;;  %vm1662_vm0 = vcmp.lt.s32.totalorder %v5737_v11, %v3945_v26  ;;  %v5823_v18 = vadd.s32 %v3818_v1, %v169_v35 }
 0x148   : > { %v800_v46 = vsel %vm699_vm8, %v5440_v20, %v601_v31  ;;  %vm898_vm11 = vmand %vm832_vm7, %vm866_vm1  ;;  %vm1827_vm7 = vcmp.ge.s32.totalorder %v5737_v11, %v3945_v26  ;;  %vm1861_vm1 = vcmp.lt.s32.totalorder %v5737_v11, %v3976_v30 }
 0x149   : > { %v999_v4 = vsel %vm898_vm11, %v5539_v43, %v800_v46  ;;  %vm1097_vm14 = vmand %vm1031_vm4, %vm1065_vm5  ;;  %vm2026_vm4 = vcmp.ge.s32.totalorder %v5737_v11, %v3976_v30  ;;  %vm2060_vm5 = vcmp.lt.s32.totalorder %v5737_v11, %v3984_v32 }
 0x14a   : > { %v1198_v23 = vsel %vm1097_vm14, %v5549_v49, %v999_v4  ;;  %vm1296_vm6 = vmand %vm1230_vm9, %vm1264_vm10  ;;  %vm2225_vm9 = vcmp.ge.s32.totalorder %v5737_v11, %v3984_v32  ;;  %vm2259_vm10 = vcmp.lt.s32.totalorder %v5737_v11, %v4007_v36 }
 0x14b   : > { %v1397_v39 = vsel %vm1296_vm6, %v5560_v47, %v1198_v23  ;;  %vm1495_vm2 = vmand %vm1429_vm12, %vm1463_vm13  ;;  %vm2424_vm12 = vcmp.ge.s32.totalorder %v5737_v11, %v4007_v36  ;;  %vm2458_vm13 = vcmp.lt.s32.totalorder %v5737_v11, %v4015_v38 }
 0x14c   : > { %v1596_v58 = vsel %vm1495_vm2, %v5573_v54, %v1397_v39  ;;  %vm1694_vm8 = vmand %vm1628_vm15, %vm1662_vm0  ;;  %vm2623_vm15 = vcmp.ge.s32.totalorder %v5737_v11, %v4015_v38  ;;  %vm2657_vm0 = vcmp.lt.s32.totalorder %v5737_v11, %v4033_v42 }
 0x14d   : > { %v1795_v40 = vsel %vm1694_vm8, %v5586_v15, %v1596_v58  ;;  %vm1893_vm11 = vmand %vm1827_vm7, %vm1861_vm1  ;;  %vm2822_vm7 = vcmp.ge.s32.totalorder %v5737_v11, %v4033_v42  ;;  %vm2856_vm1 = vcmp.lt.s32.totalorder %v5737_v11, %v4041_v44 }
 0x14e   : > { %v1994_v27 = vsel %vm1893_vm11, %v5599_v9, %v1795_v40  ;;  %vm2092_vm14 = vmand %vm2026_vm4, %vm2060_vm5  ;;  %vm3021_vm4 = vcmp.ge.s32.totalorder %v5737_v11, %v4041_v44  ;;  %vm3055_vm5 = vcmp.lt.s32.totalorder %v5737_v11, %v4060_v48 }
 0x14f   : > { %v2193_v31 = vsel %vm2092_vm14, %v5612_v51, %v1994_v27  ;;  %vm2291_vm6 = vmand %vm2225_vm9, %vm2259_vm10  ;;  %vm3220_vm9 = vcmp.ge.s32.totalorder %v5737_v11, %v4060_v48  ;;  %vm3254_vm10 = vcmp.lt.s32.totalorder %v5737_v11, %v4068_v50 }
 0x150   : > { %v2392_v46 = vsel %vm2291_vm6, %v5625_v60, %v2193_v31  ;;  %vm2490_vm2 = vmand %vm2424_vm12, %vm2458_vm13  ;;  %vm236_vm12 = vcmp.ge.s32.totalorder %v5823_v18, %v3831_v5  ;;  %vm270_vm13 = vcmp.lt.s32.totalorder %v5823_v18, %v3839_v6 }
 0x151   : > { %v2591_v4 = vsel %vm2490_vm2, %v5638_v14, %v2392_v46  ;;  %vm2689_vm8 = vmand %vm2623_vm15, %vm2657_vm0  ;;  %vm435_vm15 = vcmp.ge.s32.totalorder %v5823_v18, %v3839_v6  ;;  %vm469_vm0 = vcmp.lt.s32.totalorder %v5823_v18, %v3846_v8 }
 0x152   : > { %v2790_v23 = vsel %vm2689_vm8, %v5651_v33, %v2591_v4  ;;  %vm2888_vm11 = vmand %vm2822_vm7, %vm2856_vm1  ;;  %vm634_vm7 = vcmp.ge.s32.totalorder %v5823_v18, %v3846_v8  ;;  %vm668_vm1 = vcmp.lt.s32.totalorder %v5823_v18, %v3867_v10 }
 0x153   : > { %v2989_v35 = vsel %vm2888_vm11, %v5661_v21, %v2790_v23  ;;  %vm3087_vm14 = vmand %vm3021_vm4, %vm3055_vm5  ;;  %vm833_vm4 = vcmp.ge.s32.totalorder %v5823_v18, %v3867_v10  ;;  %vm867_vm5 = vcmp.lt.s32.totalorder %v5823_v18, %v3874_v12  ;;  %v170_v23 = vadd.s32 160, %v3820_v2 }
 0x154   : > { %v3188_v39 = vsel %vm3087_vm14, %v5671_v34, %v2989_v35  ;;  %vm3286_vm6 = vmand %vm3220_vm9, %vm3254_vm10  ;;  %vm1032_vm9 = vcmp.ge.s32.totalorder %v5823_v18, %v3874_v12  ;;  %vm1066_vm10 = vcmp.lt.s32.totalorder %v5823_v18, %v3902_v17 }
 0x155   : > { %v3387_v58 = vsel %vm3286_vm6, %v5681_v52, %v3188_v39  ;;  %vm302_vm2 = vmand %vm236_vm12, %vm270_vm13  ;;  %vm1231_vm12 = vcmp.ge.s32.totalorder %v5823_v18, %v3902_v17  ;;  %vm1265_vm13 = vcmp.lt.s32.totalorder %v5823_v18, %v3910_v19 }
 0x156   : > { %3420 = vst.msk [vmem:[%s4087_s23 + $0x90] sm:$0xff] %vm7780_vm3, %v3387_v58  ;;  %v403_v40 = vsel %vm302_vm2, %v5420_v45, 0.0  ;;  %vm501_vm8 = vmand %vm435_vm15, %vm469_vm0  ;;  %vm1430_vm15 = vcmp.ge.s32.totalorder %v5823_v18, %v3910_v19  ;;  %vm1464_vm0 = vcmp.lt.s32.totalorder %v5823_v18, %v3937_v24 }
 0x157   : > { %v602_v27 = vsel %vm501_vm8, %v5430_v63, %v403_v40  ;;  %vm700_vm11 = vmand %vm634_vm7, %vm668_vm1  ;;  %vm1629_vm7 = vcmp.ge.s32.totalorder %v5823_v18, %v3937_v24  ;;  %vm1663_vm1 = vcmp.lt.s32.totalorder %v5823_v18, %v3945_v26 }
 0x158   : > { %v801_v31 = vsel %vm700_vm11, %v5440_v20, %v602_v27  ;;  %vm899_vm14 = vmand %vm833_vm4, %vm867_vm5  ;;  %vm1828_vm4 = vcmp.ge.s32.totalorder %v5823_v18, %v3945_v26  ;;  %vm1862_vm5 = vcmp.lt.s32.totalorder %v5823_v18, %v3976_v30  ;;  %v5909_v27 = vadd.s32 %v3818_v1, %v170_v23 }
 0x159   : > { %v1000_v46 = vsel %vm899_vm14, %v5539_v43, %v801_v31  ;;  %vm1098_vm6 = vmand %vm1032_vm9, %vm1066_vm10  ;;  %vm2027_vm9 = vcmp.ge.s32.totalorder %v5823_v18, %v3976_v30  ;;  %vm2061_vm10 = vcmp.lt.s32.totalorder %v5823_v18, %v3984_v32 }
 0x15a   : > { %v1199_v4 = vsel %vm1098_vm6, %v5549_v49, %v1000_v46  ;;  %vm1297_vm2 = vmand %vm1231_vm12, %vm1265_vm13  ;;  %vm2226_vm12 = vcmp.ge.s32.totalorder %v5823_v18, %v3984_v32  ;;  %vm2260_vm13 = vcmp.lt.s32.totalorder %v5823_v18, %v4007_v36 }
 0x15b   : > { %v1398_v35 = vsel %vm1297_vm2, %v5560_v47, %v1199_v4  ;;  %vm1496_vm8 = vmand %vm1430_vm15, %vm1464_vm0  ;;  %vm2425_vm15 = vcmp.ge.s32.totalorder %v5823_v18, %v4007_v36  ;;  %vm2459_vm0 = vcmp.lt.s32.totalorder %v5823_v18, %v4015_v38 }
 0x15c   : > { %v1597_v39 = vsel %vm1496_vm8, %v5573_v54, %v1398_v35  ;;  %vm1695_vm11 = vmand %vm1629_vm7, %vm1663_vm1  ;;  %vm2624_vm7 = vcmp.ge.s32.totalorder %v5823_v18, %v4015_v38  ;;  %vm2658_vm1 = vcmp.lt.s32.totalorder %v5823_v18, %v4033_v42 }
 0x15d   : > { %v1796_v58 = vsel %vm1695_vm11, %v5586_v15, %v1597_v39  ;;  %vm1894_vm14 = vmand %vm1828_vm4, %vm1862_vm5  ;;  %vm2823_vm4 = vcmp.ge.s32.totalorder %v5823_v18, %v4033_v42  ;;  %vm2857_vm5 = vcmp.lt.s32.totalorder %v5823_v18, %v4041_v44 }
 0x15e   : > { %v1995_v40 = vsel %vm1894_vm14, %v5599_v9, %v1796_v58  ;;  %vm2093_vm6 = vmand %vm2027_vm9, %vm2061_vm10  ;;  %vm3022_vm9 = vcmp.ge.s32.totalorder %v5823_v18, %v4041_v44  ;;  %vm3056_vm10 = vcmp.lt.s32.totalorder %v5823_v18, %v4060_v48 }
 0x15f   : > { %v2194_v31 = vsel %vm2093_vm6, %v5612_v51, %v1995_v40  ;;  %vm2292_vm2 = vmand %vm2226_vm12, %vm2260_vm13  ;;  %vm3221_vm12 = vcmp.ge.s32.totalorder %v5823_v18, %v4060_v48  ;;  %vm3255_vm13 = vcmp.lt.s32.totalorder %v5823_v18, %v4068_v50 }
 0x160   : > { %v2393_v46 = vsel %vm2292_vm2, %v5625_v60, %v2194_v31  ;;  %vm2491_vm8 = vmand %vm2425_vm15, %vm2459_vm0  ;;  %vm237_vm15 = vcmp.ge.s32.totalorder %v5909_v27, %v3831_v5  ;;  %vm271_vm0 = vcmp.lt.s32.totalorder %v5909_v27, %v3839_v6 }
 0x161   : > { %v2592_v4 = vsel %vm2491_vm8, %v5638_v14, %v2393_v46  ;;  %vm2690_vm11 = vmand %vm2624_vm7, %vm2658_vm1  ;;  %vm436_vm7 = vcmp.ge.s32.totalorder %v5909_v27, %v3839_v6  ;;  %vm470_vm1 = vcmp.lt.s32.totalorder %v5909_v27, %v3846_v8 }
 0x162   : > { %v2791_v23 = vsel %vm2690_vm11, %v5651_v33, %v2592_v4  ;;  %vm2889_vm14 = vmand %vm2823_vm4, %vm2857_vm5  ;;  %vm635_vm4 = vcmp.ge.s32.totalorder %v5909_v27, %v3846_v8  ;;  %vm669_vm5 = vcmp.lt.s32.totalorder %v5909_v27, %v3867_v10 }
 0x163   : > { %v2990_v35 = vsel %vm2889_vm14, %v5661_v21, %v2791_v23  ;;  %vm3088_vm6 = vmand %vm3022_vm9, %vm3056_vm10  ;;  %vm834_vm9 = vcmp.ge.s32.totalorder %v5909_v27, %v3867_v10  ;;  %vm868_vm10 = vcmp.lt.s32.totalorder %v5909_v27, %v3874_v12 }
 0x164   : > { %v3189_v39 = vsel %vm3088_vm6, %v5671_v34, %v2990_v35  ;;  %vm3287_vm2 = vmand %vm3221_vm12, %vm3255_vm13  ;;  %vm1033_vm12 = vcmp.ge.s32.totalorder %v5909_v27, %v3874_v12  ;;  %vm1067_vm13 = vcmp.lt.s32.totalorder %v5909_v27, %v3902_v17  ;;  %v171_v35 = vadd.s32 168, %v3820_v2 }
 0x165   : > { %v3388_v58 = vsel %vm3287_vm2, %v5681_v52, %v3189_v39  ;;  %vm303_vm8 = vmand %vm237_vm15, %vm271_vm0  ;;  %vm1232_vm15 = vcmp.ge.s32.totalorder %v5909_v27, %v3902_v17  ;;  %vm1266_vm0 = vcmp.lt.s32.totalorder %v5909_v27, %v3910_v19 }
 0x166   : > { %3421 = vst.msk [vmem:[%s4087_s23 + $0x98] sm:$0xff] %vm7780_vm3, %v3388_v58  ;;  %v404_v40 = vsel %vm303_vm8, %v5420_v45, 0.0  ;;  %vm502_vm11 = vmand %vm436_vm7, %vm470_vm1  ;;  %vm1431_vm7 = vcmp.ge.s32.totalorder %v5909_v27, %v3910_v19  ;;  %vm1465_vm1 = vcmp.lt.s32.totalorder %v5909_v27, %v3937_v24 }
 0x167   : > { %v603_v31 = vsel %vm502_vm11, %v5430_v63, %v404_v40  ;;  %vm701_vm14 = vmand %vm635_vm4, %vm669_vm5  ;;  %vm1630_vm4 = vcmp.ge.s32.totalorder %v5909_v27, %v3937_v24  ;;  %vm1664_vm5 = vcmp.lt.s32.totalorder %v5909_v27, %v3945_v26 }
 0x168   : > { %v802_v46 = vsel %vm701_vm14, %v5440_v20, %v603_v31  ;;  %vm900_vm6 = vmand %vm834_vm9, %vm868_vm10  ;;  %vm1829_vm9 = vcmp.ge.s32.totalorder %v5909_v27, %v3945_v26  ;;  %vm1863_vm10 = vcmp.lt.s32.totalorder %v5909_v27, %v3976_v30 }
 0x169   : > { %v1001_v4 = vsel %vm900_vm6, %v5539_v43, %v802_v46  ;;  %vm1099_vm2 = vmand %vm1033_vm12, %vm1067_vm13  ;;  %vm2028_vm12 = vcmp.ge.s32.totalorder %v5909_v27, %v3976_v30  ;;  %vm2062_vm13 = vcmp.lt.s32.totalorder %v5909_v27, %v3984_v32  ;;  %v5995_v46 = vadd.s32 %v3818_v1, %v171_v35 }
 0x16a   : > { %v1200_v23 = vsel %vm1099_vm2, %v5549_v49, %v1001_v4  ;;  %vm1298_vm8 = vmand %vm1232_vm15, %vm1266_vm0  ;;  %vm2227_vm15 = vcmp.ge.s32.totalorder %v5909_v27, %v3984_v32  ;;  %vm2261_vm0 = vcmp.lt.s32.totalorder %v5909_v27, %v4007_v36 }
 0x16b   : > { %v1399_v39 = vsel %vm1298_vm8, %v5560_v47, %v1200_v23  ;;  %vm1497_vm11 = vmand %vm1431_vm7, %vm1465_vm1  ;;  %vm2426_vm7 = vcmp.ge.s32.totalorder %v5909_v27, %v4007_v36  ;;  %vm2460_vm1 = vcmp.lt.s32.totalorder %v5909_v27, %v4015_v38 }
 0x16c   : > { %v1598_v58 = vsel %vm1497_vm11, %v5573_v54, %v1399_v39  ;;  %vm1696_vm14 = vmand %vm1630_vm4, %vm1664_vm5  ;;  %vm2625_vm4 = vcmp.ge.s32.totalorder %v5909_v27, %v4015_v38  ;;  %vm2659_vm5 = vcmp.lt.s32.totalorder %v5909_v27, %v4033_v42 }
 0x16d   : > { %v1797_v40 = vsel %vm1696_vm14, %v5586_v15, %v1598_v58  ;;  %vm1895_vm6 = vmand %vm1829_vm9, %vm1863_vm10  ;;  %vm2824_vm9 = vcmp.ge.s32.totalorder %v5909_v27, %v4033_v42  ;;  %vm2858_vm10 = vcmp.lt.s32.totalorder %v5909_v27, %v4041_v44 }
 0x16e   : > { %v1996_v31 = vsel %vm1895_vm6, %v5599_v9, %v1797_v40  ;;  %vm2094_vm2 = vmand %vm2028_vm12, %vm2062_vm13  ;;  %vm3023_vm12 = vcmp.ge.s32.totalorder %v5909_v27, %v4041_v44  ;;  %vm3057_vm13 = vcmp.lt.s32.totalorder %v5909_v27, %v4060_v48 }
 0x16f   : > { %v2195_v4 = vsel %vm2094_vm2, %v5612_v51, %v1996_v31  ;;  %vm2293_vm8 = vmand %vm2227_vm15, %vm2261_vm0  ;;  %vm3222_vm15 = vcmp.ge.s32.totalorder %v5909_v27, %v4060_v48  ;;  %vm3256_vm0 = vcmp.lt.s32.totalorder %v5909_v27, %v4068_v50 }
 0x170   : > { %v2394_v23 = vsel %vm2293_vm8, %v5625_v60, %v2195_v4  ;;  %vm2492_vm11 = vmand %vm2426_vm7, %vm2460_vm1  ;;  %vm238_vm7 = vcmp.ge.s32.totalorder %v5995_v46, %v3831_v5  ;;  %vm272_vm1 = vcmp.lt.s32.totalorder %v5995_v46, %v3839_v6 }
 0x171   : > { %v2593_v35 = vsel %vm2492_vm11, %v5638_v14, %v2394_v23  ;;  %vm2691_vm14 = vmand %vm2625_vm4, %vm2659_vm5  ;;  %vm437_vm4 = vcmp.ge.s32.totalorder %v5995_v46, %v3839_v6  ;;  %vm471_vm5 = vcmp.lt.s32.totalorder %v5995_v46, %v3846_v8 }
 0x172   : > { %v2792_v39 = vsel %vm2691_vm14, %v5651_v33, %v2593_v35  ;;  %vm2890_vm6 = vmand %vm2824_vm9, %vm2858_vm10  ;;  %vm636_vm9 = vcmp.ge.s32.totalorder %v5995_v46, %v3846_v8  ;;  %vm670_vm10 = vcmp.lt.s32.totalorder %v5995_v46, %v3867_v10 }
 0x173   : > { %v2991_v58 = vsel %vm2890_vm6, %v5661_v21, %v2792_v39  ;;  %vm3089_vm2 = vmand %vm3023_vm12, %vm3057_vm13  ;;  %vm835_vm12 = vcmp.ge.s32.totalorder %v5995_v46, %v3867_v10  ;;  %vm869_vm13 = vcmp.lt.s32.totalorder %v5995_v46, %v3874_v12 }
 0x174   : > { %v3190_v40 = vsel %vm3089_vm2, %v5671_v34, %v2991_v58  ;;  %vm3288_vm8 = vmand %vm3222_vm15, %vm3256_vm0  ;;  %vm1034_vm15 = vcmp.ge.s32.totalorder %v5995_v46, %v3874_v12  ;;  %vm1068_vm0 = vcmp.lt.s32.totalorder %v5995_v46, %v3902_v17 }
 0x175   : > { %v3389_v31 = vsel %vm3288_vm8, %v5681_v52, %v3190_v40  ;;  %vm304_vm11 = vmand %vm238_vm7, %vm272_vm1  ;;  %vm1233_vm7 = vcmp.ge.s32.totalorder %v5995_v46, %v3902_v17  ;;  %vm1267_vm1 = vcmp.lt.s32.totalorder %v5995_v46, %v3910_v19  ;;  %v172_v40 = vadd.s32 176, %v3820_v2 }
 0x176   : > { %3422 = vst.msk [vmem:[%s4087_s23 + $0xa0] sm:$0xff] %vm7780_vm3, %v3389_v31  ;;  %v405_v4 = vsel %vm304_vm11, %v5420_v45, 0.0  ;;  %vm503_vm14 = vmand %vm437_vm4, %vm471_vm5  ;;  %vm1432_vm4 = vcmp.ge.s32.totalorder %v5995_v46, %v3910_v19  ;;  %vm1466_vm5 = vcmp.lt.s32.totalorder %v5995_v46, %v3937_v24 }
 0x177   : > { %v604_v23 = vsel %vm503_vm14, %v5430_v63, %v405_v4  ;;  %vm702_vm6 = vmand %vm636_vm9, %vm670_vm10  ;;  %vm1631_vm9 = vcmp.ge.s32.totalorder %v5995_v46, %v3937_v24  ;;  %vm1665_vm10 = vcmp.lt.s32.totalorder %v5995_v46, %v3945_v26 }
 0x178   : > { %v803_v35 = vsel %vm702_vm6, %v5440_v20, %v604_v23  ;;  %vm901_vm2 = vmand %vm835_vm12, %vm869_vm13  ;;  %vm1830_vm12 = vcmp.ge.s32.totalorder %v5995_v46, %v3945_v26  ;;  %vm1864_vm13 = vcmp.lt.s32.totalorder %v5995_v46, %v3976_v30 }
 0x179   : > { %v1002_v39 = vsel %vm901_vm2, %v5539_v43, %v803_v35  ;;  %vm1100_vm8 = vmand %vm1034_vm15, %vm1068_vm0  ;;  %vm2029_vm15 = vcmp.ge.s32.totalorder %v5995_v46, %v3976_v30  ;;  %vm2063_vm0 = vcmp.lt.s32.totalorder %v5995_v46, %v3984_v32 }
 0x17a   : > { %v1201_v58 = vsel %vm1100_vm8, %v5549_v49, %v1002_v39  ;;  %vm1299_vm11 = vmand %vm1233_vm7, %vm1267_vm1  ;;  %vm2228_vm7 = vcmp.ge.s32.totalorder %v5995_v46, %v3984_v32  ;;  %vm2262_vm1 = vcmp.lt.s32.totalorder %v5995_v46, %v4007_v36  ;;  %v6081_v39 = vadd.s32 %v3818_v1, %v172_v40 }
 0x17b   : > { %v1400_v31 = vsel %vm1299_vm11, %v5560_v47, %v1201_v58  ;;  %vm1498_vm14 = vmand %vm1432_vm4, %vm1466_vm5  ;;  %vm2427_vm4 = vcmp.ge.s32.totalorder %v5995_v46, %v4007_v36  ;;  %vm2461_vm5 = vcmp.lt.s32.totalorder %v5995_v46, %v4015_v38 }
 0x17c   : > { %v1599_v4 = vsel %vm1498_vm14, %v5573_v54, %v1400_v31  ;;  %vm1697_vm6 = vmand %vm1631_vm9, %vm1665_vm10  ;;  %vm2626_vm9 = vcmp.ge.s32.totalorder %v5995_v46, %v4015_v38  ;;  %vm2660_vm10 = vcmp.lt.s32.totalorder %v5995_v46, %v4033_v42  ;;  %7785 = vst [vmem:[#allocation6_spill] sm:$0xff] %v6081_v39 }
 0x17d   : > { %v1798_v23 = vsel %vm1697_vm6, %v5586_v15, %v1599_v4  ;;  %vm1896_vm2 = vmand %vm1830_vm12, %vm1864_vm13  ;;  %vm2825_vm12 = vcmp.ge.s32.totalorder %v5995_v46, %v4033_v42  ;;  %vm2859_vm13 = vcmp.lt.s32.totalorder %v5995_v46, %v4041_v44 }
 0x17e   : > { %v1997_v35 = vsel %vm1896_vm2, %v5599_v9, %v1798_v23  ;;  %vm2095_vm8 = vmand %vm2029_vm15, %vm2063_vm0  ;;  %vm3024_vm15 = vcmp.ge.s32.totalorder %v5995_v46, %v4041_v44  ;;  %vm3058_vm0 = vcmp.lt.s32.totalorder %v5995_v46, %v4060_v48 }
 0x17f   : > { %v2196_v58 = vsel %vm2095_vm8, %v5612_v51, %v1997_v35  ;;  %vm2294_vm11 = vmand %vm2228_vm7, %vm2262_vm1  ;;  %vm3223_vm7 = vcmp.ge.s32.totalorder %v5995_v46, %v4060_v48  ;;  %vm3257_vm1 = vcmp.lt.s32.totalorder %v5995_v46, %v4068_v50  ;;  %v173_v35 = vadd.s32 184, %v3820_v2 }
 0x180   : > { %v2395_v31 = vsel %vm2294_vm11, %v5625_v60, %v2196_v58  ;;  %vm2493_vm14 = vmand %vm2427_vm4, %vm2461_vm5  ;;  %vm239_vm4 = vcmp.ge.s32.totalorder %v6081_v39, %v3831_v5  ;;  %vm273_vm5 = vcmp.lt.s32.totalorder %v6081_v39, %v3839_v6 }
 0x181   : > { %v2594_v40 = vsel %vm2493_vm14, %v5638_v14, %v2395_v31  ;;  %vm2692_vm6 = vmand %vm2626_vm9, %vm2660_vm10  ;;  %vm438_vm9 = vcmp.ge.s32.totalorder %v6081_v39, %v3839_v6  ;;  %vm472_vm10 = vcmp.lt.s32.totalorder %v6081_v39, %v3846_v8 }
 0x182   : > { %v2793_v4 = vsel %vm2692_vm6, %v5651_v33, %v2594_v40  ;;  %vm2891_vm2 = vmand %vm2825_vm12, %vm2859_vm13  ;;  %vm637_vm12 = vcmp.ge.s32.totalorder %v6081_v39, %v3846_v8  ;;  %vm671_vm13 = vcmp.lt.s32.totalorder %v6081_v39, %v3867_v10 }
 0x183   : > { %v2992_v23 = vsel %vm2891_vm2, %v5661_v21, %v2793_v4  ;;  %vm3090_vm8 = vmand %vm3024_vm15, %vm3058_vm0  ;;  %vm836_vm15 = vcmp.ge.s32.totalorder %v6081_v39, %v3867_v10  ;;  %vm870_vm0 = vcmp.lt.s32.totalorder %v6081_v39, %v3874_v12 }
 0x184   : > { %v3191_v58 = vsel %vm3090_vm8, %v5671_v34, %v2992_v23  ;;  %vm3289_vm11 = vmand %vm3223_vm7, %vm3257_vm1  ;;  %vm1035_vm7 = vcmp.ge.s32.totalorder %v6081_v39, %v3874_v12  ;;  %vm1069_vm1 = vcmp.lt.s32.totalorder %v6081_v39, %v3902_v17  ;;  %v6132_v23 = vadd.s32 %v3818_v1, %v173_v35 }
 0x185   : > { %v3390_v31 = vsel %vm3289_vm11, %v5681_v52, %v3191_v58  ;;  %vm305_vm14 = vmand %vm239_vm4, %vm273_vm5  ;;  %vm1234_vm4 = vcmp.ge.s32.totalorder %v6081_v39, %v3902_v17  ;;  %vm1268_vm5 = vcmp.lt.s32.totalorder %v6081_v39, %v3910_v19  ;;  %vm1632_vm11 = vcmp.ge.s32.totalorder %v6081_v39, %v3937_v24 }
 0x186   : > { %3423 = vst.msk [vmem:[%s4087_s23 + $0xa8] sm:$0xff] %vm7780_vm3, %v3390_v31  ;;  %v406_v40 = vsel %vm305_vm14, %v5420_v45, 0.0  ;;  %vm504_vm6 = vmand %vm438_vm9, %vm472_vm10  ;;  %vm1433_vm9 = vcmp.ge.s32.totalorder %v6081_v39, %v3910_v19  ;;  %vm1467_vm10 = vcmp.lt.s32.totalorder %v6081_v39, %v3937_v24  ;;  %vm1831_vm14 = vcmp.ge.s32.totalorder %v6081_v39, %v3945_v26 }
 0x187   : > { %v605_v4 = vsel %vm504_vm6, %v5430_v63, %v406_v40  ;;  %vm703_vm2 = vmand %vm637_vm12, %vm671_vm13  ;;  %vm1666_vm13 = vcmp.lt.s32.totalorder %v6081_v39, %v3945_v26  ;;  %vm2030_vm6 = vcmp.ge.s32.totalorder %v6081_v39, %v3976_v30  ;;  %vm2428_vm3 = vcmp.ge.s32.totalorder %v6081_v39, %v4007_v36 }
 0x188   : > { %v804_v45 = vsel %vm703_vm2, %v5440_v20, %v605_v4  ;;  %vm902_vm8 = vmand %vm836_vm15, %vm870_vm0  ;;  %vm1865_vm15 = vcmp.lt.s32.totalorder %v6081_v39, %v3976_v30  ;;  %vm2064_vm2 = vcmp.lt.s32.totalorder %v6081_v39, %v3984_v32 }
 0x189   : > { %v1003_v63 = vsel %vm902_vm8, %v5539_v43, %v804_v45  ;;  %vm1101_vm12 = vmand %vm1035_vm7, %vm1069_vm1  ;;  %vm2229_vm7 = vcmp.ge.s32.totalorder %v6081_v39, %v3984_v32  ;;  %vm2263_vm8 = vcmp.lt.s32.totalorder %v6081_v39, %v4007_v36 }
 0x18a   : > { %v1202_v20 = vsel %vm1101_vm12, %v5549_v49, %v1003_v63  ;;  %vm1300_vm0 = vmand %vm1234_vm4, %vm1268_vm5  ;;  %vm2462_vm4 = vcmp.lt.s32.totalorder %v6081_v39, %v4015_v38  ;;  %vm2627_vm12 = vcmp.ge.s32.totalorder %v6081_v39, %v4015_v38 }
 0x18b   : > { %v1401_v35 = vsel %vm1300_vm0, %v5560_v47, %v1202_v20  ;;  %vm1499_vm1 = vmand %vm1433_vm9, %vm1467_vm10  ;;  %vm2661_vm9 = vcmp.lt.s32.totalorder %v6081_v39, %v4033_v42  ;;  %vm2826_vm10 = vcmp.ge.s32.totalorder %v6081_v39, %v4033_v42 }
 0x18c   : > { %v1600_v58 = vsel %vm1499_vm1, %v5573_v54, %v1401_v35  ;;  %vm1698_vm5 = vmand %vm1632_vm11, %vm1666_vm13  ;;  %vm2860_vm11 = vcmp.lt.s32.totalorder %v6081_v39, %v4041_v44  ;;  %vm3059_vm1 = vcmp.lt.s32.totalorder %v6081_v39, %v4060_v48  ;;  %vm240_vm13 = vcmp.ge.s32.totalorder %v6132_v23, %v3831_v5 }
 0x18d   : > { %v1799_v31 = vsel %vm1698_vm5, %v5586_v15, %v1600_v58  ;;  %vm1897_vm0 = vmand %vm1831_vm14, %vm1865_vm15  ;;  %vm3258_vm15 = vcmp.lt.s32.totalorder %v6081_v39, %v4068_v50  ;;  %vm473_vm14 = vcmp.lt.s32.totalorder %v6132_v23, %v3846_v8  ;;  %v174_v58 = vadd.s32 192, %v3820_v2 }
 0x18e   : > { %v1998_v40 = vsel %vm1897_vm0, %v5599_v9, %v1799_v31  ;;  %vm2096_vm5 = vmand %vm2030_vm6, %vm2064_vm2  ;;  %vm274_vm6 = vcmp.lt.s32.totalorder %v6132_v23, %v3839_v6  ;;  %vm837_vm2 = vcmp.ge.s32.totalorder %v6132_v23, %v3867_v10 }
 0x18f   : > { %v2197_v4 = vsel %vm2096_vm5, %v5612_v51, %v1998_v40  ;;  %vm2295_vm0 = vmand %vm2229_vm7, %vm2263_vm8  ;;  %vm672_vm8 = vcmp.lt.s32.totalorder %v6132_v23, %v3867_v10 }
 0x190   : > { %v2396_v45 = vsel %vm2295_vm0, %v5625_v60, %v2197_v4  ;;  %vm2494_vm5 = vmand %vm2428_vm3, %vm2462_vm4  ;;  %vm871_vm3 = vcmp.lt.s32.totalorder %v6132_v23, %v3874_v12  ;;  %v6293_v4 = vld [vmem:[%s7777_s2] ss:$0 sm:$0xff] }
 0x191   : > { %v2595_v63 = vsel %vm2494_vm5, %v5638_v14, %v2396_v45  ;;  %vm2693_vm0 = vmand %vm2627_vm12, %vm2661_vm9  ;;  %vm1235_vm12 = vcmp.ge.s32.totalorder %v6132_v23, %v3902_v17  ;;  %vm1269_vm9 = vcmp.lt.s32.totalorder %v6132_v23, %v3910_v19 }
 0x192   : > { %v2794_v20 = vsel %vm2693_vm0, %v5651_v33, %v2595_v63  ;;  %vm2892_vm5 = vmand %vm2826_vm10, %vm2860_vm11  ;;  %vm7786_vm0 = vcmp.ge.s32.totalorder %v6081_v39, %v4041_v44  ;;  %vm1468_vm10 = vcmp.lt.s32.totalorder %v6132_v23, %v3937_v24  ;;  %vm1866_vm11 = vcmp.lt.s32.totalorder %v6132_v23, %v3976_v30 }
 0x193   : > { %v2993_v35 = vsel %vm2892_vm5, %v5661_v21, %v2794_v20  ;;  %vm3091_vm7 = vmand %vm7786_vm0, %vm3059_vm1  ;;  %vm7787_vm5 = vcmp.ge.s32.totalorder %v6081_v39, %v4060_v48  ;;  %vm7788_vm1 = vcmask 261120   ;;  %v175_v63 = vadd.s32 200, %v3820_v2  ;;  %v6310_v20 = vld [vmem:[%s7777_s2 + $0x1] ss:$0 sm:$0xff]  ;;  %v6328_v39 = vld [vmem:[%s7777_s2 + $0x2] ss:$0 sm:$0xff] }
 0x194   : > { %v3192_v31 = vsel %vm3091_vm7, %v5671_v34, %v2993_v35  ;;  %vm3290_vm4 = vmand %vm7787_vm5, %vm3258_vm15  ;;  %vm2031_vm15 = vcmp.ge.s32.totalorder %v6132_v23, %v3976_v30  ;;  %vm2065_vm5 = vcmp.lt.s32.totalorder %v6132_v23, %v3984_v32 }
 0x195   : > { %v3391_v40 = vsel %vm3290_vm4, %v5681_v52, %v3192_v31  ;;  %vm306_vm7 = vmand %vm240_vm13, %vm274_vm6  ;;  %vm7789_vm13 = vcmp.ge.s32.totalorder %v6132_v23, %v3839_v6  ;;  %vm2264_vm4 = vcmp.lt.s32.totalorder %v6132_v23, %v4007_v36  ;;  %v6322_v31 = vadd.s32 %v3818_v1, %v174_v58 }
 0x196   : > { %3424 = vst.msk [vmem:[%s4087_s23 + $0xb0] sm:$0xff] %vm7788_vm1, %v3391_v40  ;;  %v407_v45 = vsel %vm306_vm7, %v6293_v4, 0.0  ;;  %vm505_vm6 = vmand %vm7789_vm13, %vm473_vm14  ;;  %vm7790_vm14 = vcmp.ge.s32.totalorder %v6132_v23, %v3846_v8  ;;  %v176_v40 = vadd.s32 208, %v3820_v2  ;;  %vm2827_vm1 = vcmp.ge.s32.totalorder %v6132_v23, %v4033_v42 }
 0x197   : > { %v606_v35 = vsel %vm505_vm6, %v6310_v20, %v407_v45  ;;  %vm704_vm7 = vmand %vm7790_vm14, %vm672_vm8  ;;  %vm2662_vm14 = vcmp.lt.s32.totalorder %v6132_v23, %v4033_v42  ;;  %vm7792_vm13 = vcmp.ge.s32.totalorder %v6132_v23, %v3874_v12  ;;  %vm3060_vm6 = vcmp.lt.s32.totalorder %v6132_v23, %v4060_v48 }
 0x198   : > { %v805_v45 = vsel %vm704_vm7, %v6328_v39, %v606_v35  ;;  %vm903_vm8 = vmand %vm837_vm2, %vm871_vm3  ;;  %vm7791_vm7 = vcmp.lt.s32.totalorder %v6132_v23, %v3902_v17  ;;  %vm2861_vm2 = vcmp.lt.s32.totalorder %v6132_v23, %v4041_v44 }
 0x199   : > { %v1004_v58 = vsel %vm903_vm8, %v5539_v43, %v805_v45  ;;  %vm1102_vm0 = vmand %vm7792_vm13, %vm7791_vm7  ;;  %v6368_v43 = vadd.s32 %v3818_v1, %v175_v63  ;;  %vm7795_vm13 = vcmp.ge.s32.totalorder %v6132_v23, %v3937_v24 }
 0x19a   : > { %v1203_v35 = vsel %vm1102_vm0, %v5549_v49, %v1004_v58  ;;  %vm1301_vm8 = vmand %vm1235_vm12, %vm1269_vm9  ;;  %vm7793_vm0 = vcmp.ge.s32.totalorder %v6132_v23, %v3910_v19  ;;  %v6382_v49 = vadd.s32 %v3818_v1, %v176_v40  ;;  %vm639_vm12 = vcmp.ge.s32.totalorder %v6322_v31, %v3846_v8 }
 0x19b   : > { %v1402_v45 = vsel %vm1301_vm8, %v5560_v47, %v1203_v35  ;;  %vm1500_vm3 = vmand %vm7793_vm0, %vm1468_vm10  ;;  %vm7794_vm8 = vcmp.lt.s32.totalorder %v6132_v23, %v3945_v26  ;;  %vm474_vm0 = vcmp.lt.s32.totalorder %v6322_v31, %v3846_v8  ;;  %vm872_vm10 = vcmp.lt.s32.totalorder %v6322_v31, %v3874_v12 }
 0x19c   : > { %v1601_v63 = vsel %vm1500_vm3, %v5573_v54, %v1402_v45  ;;  %vm1699_vm7 = vmand %vm7795_vm13, %vm7794_vm8  ;;  %vm7796_vm3 = vcmp.ge.s32.totalorder %v6132_v23, %v3945_v26  ;;  %vm673_vm13 = vcmp.lt.s32.totalorder %v6322_v31, %v3867_v10  ;;  %v178_v40 = vadd.s32 224, %v3820_v2 }
 0x19d   : > { %v1800_v47 = vsel %vm1699_vm7, %v5586_v15, %v1601_v63  ;;  %vm1898_vm9 = vmand %vm7796_vm3, %vm1866_vm11  ;;  %v177_v15 = vadd.s32 216, %v3820_v2  ;;  %v179_v58 = vadd.s32 232, %v3820_v2  ;;  %v181_v45 = vadd.s32 248, %v3820_v2 }
 0x19e   : > { %v1999_v54 = vsel %vm1898_vm9, %v5599_v9, %v1800_v47  ;;  %vm2097_vm11 = vmand %vm2031_vm15, %vm2065_vm5  ;;  %vm7797_vm9 = vcmp.ge.s32.totalorder %v6132_v23, %v3984_v32  ;;  %v180_v9 = vadd.s32 240, %v3820_v2  ;;  %vm7798_vm5 = vcmp.lt.s32.totalorder %v6132_v23, %v4015_v38 }
 0x19f   : > { %v2198_v35 = vsel %vm2097_vm11, %v5612_v51, %v1999_v54  ;;  %vm2296_vm3 = vmand %vm7797_vm9, %vm2264_vm4  ;;  %vm7799_vm11 = vcmp.ge.s32.totalorder %v6132_v23, %v4007_v36  ;;  %vm1270_vm4 = vcmp.lt.s32.totalorder %v6322_v31, %v3910_v19  ;;  %vm2629_vm8 = vcmp.ge.s32.totalorder %v6322_v31, %v4015_v38 }
 0x1a0   : > { %v2397_v63 = vsel %vm2296_vm3, %v5625_v60, %v2198_v35  ;;  %vm2495_vm7 = vmand %vm7799_vm11, %vm7798_vm5  ;;  %vm7800_vm3 = vcmp.ge.s32.totalorder %v6132_v23, %v4015_v38  ;;  %vm1469_vm5 = vcmp.lt.s32.totalorder %v6322_v31, %v3937_v24  ;;  %v6473_v60 = vadd.s32 %v3818_v1, %v177_v15 }
 0x1a1   : > { %v2596_v2 = vsel %vm2495_vm7, %v5638_v14, %v2397_v63  ;;  %vm2694_vm15 = vmand %vm7800_vm3, %vm2662_vm14  ;;  %v6476_v14 = vadd.s32 %v3818_v1, %v178_v40  ;;  %v6493_v54 = vadd.s32 %v3818_v1, %v180_v9  ;;  %v6496_v15 = vadd.s32 %v3818_v1, %v181_v45 }
 0x1a2   : > { %v2795_v51 = vsel %vm2694_vm15, %v5651_v33, %v2596_v2  ;;  %vm2893_vm7 = vmand %vm2827_vm1, %vm2861_vm2  ;;  %v6479_v33 = vadd.s32 %v3818_v1, %v179_v58  ;;  %vm7801_vm1 = vcmp.ge.s32.totalorder %v6132_v23, %v4041_v44  ;;  %v3468_v1 = vadd.s32 1, %v3824_v3 }
 0x1a3   : > { %v2994_v47 = vsel %vm2893_vm7, %v5661_v21, %v2795_v51  ;;  %vm3092_vm2 = vmand %vm7801_vm1, %vm3060_vm6  ;;  %v6499_v21 = vstv %s6410_s0  ;;  %vm7802_vm6 = vcmp.lt.s32.totalorder %v6132_v23, %v4068_v50  ;;  %vm7803_vm7 = vcmp.ge.s32.totalorder %v6132_v23, %v4060_v48 }
 0x1a4   : > { %v3193_v40 = vsel %vm3092_vm2, %v5671_v34, %v2994_v47  ;;  %vm3291_vm1 = vmand %vm7803_vm7, %vm7802_vm6  ;;  %vm3436_vm3 = vcmp.lt.s32.totalorder %v3824_v3, %v6499_v21  ;;  %vm3437_vm2 = vcmp.lt.s32.totalorder %v3881_v13, %v6499_v21  ;;  %vm7804_vm11 = vcmp.lt.s32.totalorder %v6322_v31, %v3839_v6 }
 0x1a5   : > { %v3392_v34 = vsel %vm3291_vm1, %v5681_v52, %v3193_v40  ;;  %vm7805_vm6 = vcmp.ge.s32.totalorder %v6322_v31, %v3831_v5  ;;  %vm3532_vm1 = vcmask 7168   ;;  %v3469_v52 = vadd.s32 1, %v3881_v13 }
 0x1a6   : > { %vm6524_vm7 = vmand %vm7805_vm6, %vm7804_vm11  ;;  %vm3438_vm11 = vcmp.lt.s32.totalorder %v4164_v16, %v6499_v21  ;;  %vm7808_vm6 = vcmask 261120   ;;  %vm7809_vm15 = vcmp.ge.s32.totalorder %v6322_v31, %v3839_v6  ;;  %vm2663_vm9 = vcmp.lt.s32.totalorder %v6322_v31, %v4033_v42 }
 0x1a7   : > { %3425 = vst.msk [vmem:[%s4087_s23 + $0xb8] sm:$0xff] %vm7808_vm6, %v3392_v34  ;;  %v408_v35 = vsel %vm6524_vm7, %v6293_v4, 0.0  ;;  %vm506_vm14 = vmand %vm7809_vm15, %vm474_vm0  ;;  %v3500_v9 = vsel %vm3436_vm3, %v3468_v1, 0  ;;  %v3470_v45 = vadd.s32 1, %v4164_v16  ;;  %vm3439_vm7 = vcmp.lt.s32.totalorder %v4245_v57, %v6499_v21  ;;  %v6610_v1 = vld [vmem:[%s7777_s2 + $0x3] ss:$0 sm:$0xff] }
 0x1a8   : > { %v607_v63 = vsel %vm506_vm14, %v6310_v20, %v408_v35  ;;  %vm6570_vm0 = vmand %vm639_vm12, %vm673_vm13  ;;  %vm2828_vm3 = vcmp.ge.s32.totalorder %v6322_v31, %v4033_v42  ;;  %vm2862_vm15 = vcmp.lt.s32.totalorder %v6322_v31, %v4041_v44  ;;  %3533 = vst.msk [vmem:[%s6537_s25] sm:$0xff] %vm3532_vm1, %v3500_v9  ;;  %v3501_v3 = vsel %vm3437_vm2, %v3469_v52, 0  ;;  %v6638_v35 = vld [vmem:[%s7777_s2 + $0x4] ss:$0 sm:$0xff] }
 0x1a9   : > { %v3471_v51 = vadd.s32 1, %v4245_v57  ;;  %vm3440_vm12 = vcmp.lt.s32.totalorder %v4331_v41, %v6499_v21  ;;  %v806_v47 = vsel %vm6570_vm0, %v6328_v39, %v607_v63  ;;  %vm7812_vm13 = vcmp.ge.s32.totalorder %v6322_v31, %v3867_v10  ;;  %3534 = vst.msk [vmem:[%s6537_s25 + $0x8] sm:$0xff] %vm3532_vm1, %v3501_v3  ;;  %v6664_v63 = vld [vmem:[%s7777_s2 + $0x5] ss:$0 sm:$0xff] }
 0x1aa   : > { %vm904_vm14 = vmand %vm7812_vm13, %vm872_vm10  ;;  %v3502_v13 = vsel %vm3438_vm11, %v3470_v45, 0  ;;  %v3472_v40 = vadd.s32 1, %v4331_v41  ;;  %vm3441_vm0 = vcmp.lt.s32.totalorder %v4417_v22, %v6499_v21  ;;  %vm7813_vm10 = vcmp.lt.s32.totalorder %v6322_v31, %v3902_v17 }
 0x1ab   : > { %v1005_v34 = vsel %vm904_vm14, %v6610_v1, %v806_v47  ;;  %vm7814_vm13 = vcmp.ge.s32.totalorder %v6322_v31, %v3874_v12  ;;  %vm3260_vm6 = vcmp.lt.s32.totalorder %v6322_v31, %v4068_v50  ;;  %3535 = vst.msk [vmem:[%s6537_s25 + $0x10] sm:$0xff] %vm3532_vm1, %v3502_v13  ;;  %v3503_v58 = vsel %vm3439_vm7, %v3471_v51, 0  ;;  %v6692_v47 = vld [vmem:[%s7777_s2 + $0x6] ss:$0 sm:$0xff] }
 0x1ac   : > { %vm6619_vm11 = vmand %vm7814_vm13, %vm7813_vm10  ;;  %v3473_v52 = vadd.s32 1, %v4417_v22  ;;  %vm3442_vm14 = vcmp.lt.s32.totalorder %v4503_v62, %v6499_v21  ;;  %vm7817_vm7 = vcmp.ge.s32.totalorder %v6322_v31, %v3902_v17  ;;  %vm276_vm2 = vcmp.lt.s32.totalorder %v6368_v43, %v3839_v6  ;;  %3536 = vst.msk [vmem:[%s6537_s25 + $0x18] sm:$0xff] %vm3532_vm1, %v3503_v58 }
 0x1ad   : > { %v1204_v9 = vsel %vm6619_vm11, %v6638_v35, %v1005_v34  ;;  %vm1302_vm10 = vmand %vm7817_vm7, %vm1270_vm4  ;;  %v3504_v57 = vsel %vm3440_vm12, %v3472_v40, 0  ;;  %v3474_v45 = vadd.s32 1, %v4503_v62  ;;  %vm3443_vm11 = vcmp.lt.s32.totalorder %v4589_v53, %v6499_v21  ;;  %v6718_v34 = vld [vmem:[%s7777_s2 + $0x7] ss:$0 sm:$0xff] }
 0x1ae   : > { %v1403_v2 = vsel %vm1302_vm10, %v6664_v63, %v1204_v9  ;;  %vm7818_vm4 = vcmp.ge.s32.totalorder %v6322_v31, %v3910_v19  ;;  %3537 = vst.msk [vmem:[%s6537_s25 + $0x20] sm:$0xff] %vm3532_vm1, %v3504_v57  ;;  %v3505_v3 = vsel %vm3441_vm0, %v3473_v52, 0  ;;  %v3475_v51 = vadd.s32 1, %v4589_v53  ;;  %v6746_v9 = vld [vmem:[%s7777_s2 + $0x8] ss:$0 sm:$0xff] }
 0x1af   : > { %vm6673_vm12 = vmand %vm7818_vm4, %vm1469_vm5  ;;  %vm3444_vm5 = vcmp.lt.s32.totalorder %v4693_v25, %v6499_v21  ;;  %vm7821_vm10 = vcmp.lt.s32.totalorder %v6322_v31, %v3945_v26  ;;  %vm7822_vm0 = vcmp.ge.s32.totalorder %v6322_v31, %v3937_v24  ;;  %3538 = vst.msk [vmem:[%s6537_s25 + $0x28] sm:$0xff] %vm3532_vm1, %v3505_v3  ;;  %v3506_v22 = vsel %vm3442_vm14, %v3474_v45, 0 }
 0x1b0   : > { %v1602_v13 = vsel %vm6673_vm12, %v6692_v47, %v1403_v2  ;;  %vm1700_vm4 = vmand %vm7822_vm0, %vm7821_vm10  ;;  %v3476_v40 = vadd.s32 1, %v4693_v25  ;;  %vm3445_vm12 = vcmp.lt.s32.totalorder %v4818_v0, %v6499_v21  ;;  %vm7823_vm10 = vcmp.lt.s32.totalorder %v6322_v31, %v3976_v30  ;;  %3539 = vst.msk [vmem:[%s6537_s25 + $0x30] sm:$0xff] %vm3532_vm1, %v3506_v22  ;;  %v6772_v2 = vld [vmem:[%s7777_s2 + $0x9] ss:$0 sm:$0xff] }
 0x1b1   : > { %v1801_v16 = vsel %vm1700_vm4, %v6718_v34, %v1602_v13  ;;  %vm7824_vm0 = vcmp.ge.s32.totalorder %v6322_v31, %v3945_v26  ;;  %v3507_v58 = vsel %vm3443_vm11, %v3475_v51, 0  ;;  %v3477_v52 = vadd.s32 1, %v4818_v0  ;;  %v6800_v13 = vld [vmem:[%s7777_s2 + $0xa] ss:$0 sm:$0xff] }
 0x1b2   : > { %vm6727_vm14 = vmand %vm7824_vm0, %vm7823_vm10  ;;  %vm3446_vm4 = vcmp.lt.s32.totalorder %v4948_v59, %v6499_v21  ;;  %vm7827_vm10 = vcmp.lt.s32.totalorder %v6322_v31, %v3984_v32  ;;  %vm7828_vm11 = vcmp.ge.s32.totalorder %v6322_v31, %v3976_v30  ;;  %3540 = vst.msk [vmem:[%s6537_s25 + $0x38] sm:$0xff] %vm3532_vm1, %v3507_v58  ;;  %v3508_v53 = vsel %vm3444_vm5, %v3476_v40, 0 }
 0x1b3   : > { %v2000_v57 = vsel %vm6727_vm14, %v6746_v9, %v1801_v16  ;;  %vm2098_vm0 = vmand %vm7828_vm11, %vm7827_vm10  ;;  %v3478_v45 = vadd.s32 1, %v4948_v59  ;;  %vm3447_vm14 = vcmp.lt.s32.totalorder %v5034_v56, %v6499_v21  ;;  %vm7829_vm10 = vcmp.lt.s32.totalorder %v6322_v31, %v4007_v36  ;;  %3541 = vst.msk [vmem:[%s6537_s25 + $0x40] sm:$0xff] %vm3532_vm1, %v3508_v53  ;;  %v6826_v16 = vld [vmem:[%s7777_s2 + $0xb] ss:$0 sm:$0xff] }
 0x1b4   : > { %v2199_v41 = vsel %vm2098_vm0, %v6772_v2, %v2000_v57  ;;  %vm7830_vm11 = vcmp.ge.s32.totalorder %v6322_v31, %v3984_v32  ;;  %v3509_v3 = vsel %vm3445_vm12, %v3477_v52, 0  ;;  %v3479_v51 = vadd.s32 1, %v5034_v56  ;;  %v6854_v57 = vld [vmem:[%s7777_s2 + $0xc] ss:$0 sm:$0xff] }
 0x1b5   : > { %vm6781_vm5 = vmand %vm7830_vm11, %vm7829_vm10  ;;  %vm3448_vm0 = vcmp.lt.s32.totalorder %v5120_v61, %v6499_v21  ;;  %vm7833_vm10 = vcmp.lt.s32.totalorder %v6322_v31, %v4015_v38  ;;  %vm7834_vm12 = vcmp.ge.s32.totalorder %v6322_v31, %v4007_v36  ;;  %vm1436_vm7 = vcmp.ge.s32.totalorder %v6368_v43, %v3910_v19  ;;  %3542 = vst.msk [vmem:[%s6537_s25 + $0x48] sm:$0xff] %vm3532_vm1, %v3509_v3 }
 0x1b6   : > { %v2398_v22 = vsel %vm6781_vm5, %v6800_v13, %v2199_v41  ;;  %vm2496_vm11 = vmand %vm7834_vm12, %vm7833_vm10  ;;  %vm1470_vm13 = vcmp.lt.s32.totalorder %v6368_v43, %v3937_v24  ;;  %v3510_v0 = vsel %vm3446_vm4, %v3478_v45, 0  ;;  %v3480_v40 = vadd.s32 1, %v5120_v61  ;;  %v6880_v41 = vld [vmem:[%s7777_s2 + $0xd] ss:$0 sm:$0xff] }
 0x1b7   : > { %vm3449_vm5 = vcmp.lt.s32.totalorder %v5206_v29, %v6499_v21  ;;  %v2597_v62 = vsel %vm2496_vm11, %v6826_v16, %v2398_v22  ;;  %vm6835_vm4 = vmand %vm2629_vm8, %vm2663_vm9  ;;  %vm1635_vm10 = vcmp.ge.s32.totalorder %v6368_v43, %v3937_v24  ;;  %vm1669_vm12 = vcmp.lt.s32.totalorder %v6368_v43, %v3945_v26  ;;  %3543 = vst.msk [vmem:[%s6537_s25 + $0x50] sm:$0xff] %vm3532_vm1, %v3510_v0  ;;  %v6908_v22 = vld [vmem:[%s7777_s2 + $0xe] ss:$0 sm:$0xff] }
 0x1b8   : > { %v3511_v58 = vsel %vm3447_vm14, %v3479_v51, 0  ;;  %v3481_v52 = vadd.s32 1, %v5206_v29  ;;  %vm3450_vm8 = vcmp.lt.s32.totalorder %v5292_v28, %v6499_v21  ;;  %v2796_v53 = vsel %vm6835_vm4, %v6854_v57, %v2597_v62  ;;  %vm2894_vm9 = vmand %vm2828_vm3, %vm2862_vm15  ;;  %v6934_v62 = vld [vmem:[%s7777_s2 + $0xf] ss:$0 sm:$0xff] }
 0x1b9   : > { %3544 = vst.msk [vmem:[%s6537_s25 + $0x58] sm:$0xff] %vm3532_vm1, %v3511_v58  ;;  %v3512_v56 = vsel %vm3448_vm0, %v3480_v40, 0  ;;  %v3482_v45 = vadd.s32 1, %v5292_v28  ;;  %vm3451_vm4 = vcmp.lt.s32.totalorder %v5378_v7, %v6499_v21  ;;  %v2995_v25 = vsel %vm2894_vm9, %v6880_v41, %v2796_v53 }
 0x1ba   : > { %vm7837_vm3 = vcmp.lt.s32.totalorder %v6322_v31, %v4060_v48  ;;  %vm7838_vm15 = vcmp.ge.s32.totalorder %v6322_v31, %v4041_v44  ;;  %vm2067_vm11 = vcmp.lt.s32.totalorder %v6368_v43, %v3984_v32  ;;  %3545 = vst.msk [vmem:[%s6537_s25 + $0x60] sm:$0xff] %vm3532_vm1, %v3512_v56  ;;  %v3513_v3 = vsel %vm3449_vm5, %v3481_v52, 0 }
 0x1bb   : > { %vm6889_vm0 = vmand %vm7838_vm15, %vm7837_vm3  ;;  %v3483_v51 = vadd.s32 1, %v5378_v7  ;;  %vm3452_vm9 = vcmp.lt.s32.totalorder %v5482_v55, %v6499_v21  ;;  %vm7841_vm5 = vcmp.ge.s32.totalorder %v6322_v31, %v4060_v48  ;;  %3546 = vst.msk [vmem:[%s6537_s25 + $0x68] sm:$0xff] %vm3532_vm1, %v3513_v3  ;;  %v3514_v29 = vsel %vm3450_vm8, %v3482_v45, 0 }
 0x1bc   : > { %v3194_v0 = vsel %vm6889_vm0, %v6908_v22, %v2995_v25  ;;  %vm3292_vm3 = vmand %vm7841_vm5, %vm3260_vm6  ;;  %v3484_v40 = vadd.s32 1, %v5482_v55  ;;  %vm3453_vm0 = vcmp.lt.s32.totalorder %v5607_v37, %v6499_v21  ;;  %vm7842_vm6 = vcmp.ge.s32.totalorder %v6368_v43, %v3831_v5  ;;  %3547 = vst.msk [vmem:[%s6537_s25 + $0x70] sm:$0xff] %vm3532_vm1, %v3514_v29 }
 0x1bd   : > { %v3393_v59 = vsel %vm3292_vm3, %v6934_v62, %v3194_v0  ;;  %vm6943_vm8 = vmand %vm7842_vm6, %vm276_vm2  ;;  %v3515_v58 = vsel %vm3451_vm4, %v3483_v51, 0  ;;  %v3485_v52 = vadd.s32 1, %v5607_v37  ;;  %vm3454_vm2 = vcmp.lt.s32.totalorder %v5737_v11, %v6499_v21 }
 0x1be   : > { %vm7845_vm3 = vcmask 261120   ;;  %v409_v53 = vsel %vm6943_vm8, %v6293_v4, 0.0  ;;  %vm7846_vm6 = vcmp.lt.s32.totalorder %v6368_v43, %v3846_v8  ;;  %vm7847_vm5 = vcmp.ge.s32.totalorder %v6368_v43, %v3839_v6  ;;  %3548 = vst.msk [vmem:[%s6537_s25 + $0x78] sm:$0xff] %vm3532_vm1, %v3515_v58 }
 0x1bf   : > { %3426 = vst.msk [vmem:[%s4087_s23 + $0xc0] sm:$0xff] %vm7845_vm3, %v3393_v59  ;;  %vm507_vm15 = vmand %vm7847_vm5, %vm7846_vm6  ;;  %vm2664_vm14 = vcmp.lt.s32.totalorder %v6368_v43, %v4033_v42  ;;  %v3516_v7 = vsel %vm3452_vm9, %v3484_v40, 0  ;;  %v3486_v56 = vadd.s32 1, %v5737_v11  ;;  %vm3455_vm8 = vcmp.lt.s32.totalorder %v5823_v18, %v6499_v21  ;;  %v7858_v59 = vld [vmem:[#allocation6_spill] sm:$0xff] }
 0x1c0   : > { %v608_v45 = vsel %vm507_vm15, %v6310_v20, %v409_v53  ;;  %vm7848_vm5 = vcmp.lt.s32.totalorder %v6368_v43, %v3867_v10  ;;  %vm7849_vm3 = vcmp.ge.s32.totalorder %v6368_v43, %v3846_v8  ;;  %3549 = vst.msk [vmem:[%s6537_s25 + $0x80] sm:$0xff] %vm3532_vm1, %v3516_v7  ;;  %v3517_v55 = vsel %vm3453_vm0, %v3485_v52, 0 }
 0x1c1   : > { %vm6989_vm6 = vmand %vm7849_vm3, %vm7848_vm5  ;;  %v3487_v61 = vadd.s32 1, %v5823_v18  ;;  %vm3456_vm15 = vcmp.lt.s32.totalorder %v5909_v27, %v6499_v21  ;;  %vm7852_vm5 = vcmp.lt.s32.totalorder %v6368_v43, %v3874_v12  ;;  %vm7853_vm3 = vcmp.ge.s32.totalorder %v6368_v43, %v3867_v10  ;;  %3550 = vst.msk [vmem:[%s6537_s25 + $0x88] sm:$0xff] %vm3532_vm1, %v3517_v55 }
 0x1c2   : > { %v807_v3 = vsel %vm6989_vm6, %v6328_v39, %v608_v45  ;;  %vm905_vm9 = vmand %vm7853_vm3, %vm7852_vm5  ;;  %v3518_v37 = vsel %vm3454_vm2, %v3486_v56, 0  ;;  %v3488_v51 = vadd.s32 1, %v5909_v27  ;;  %vm3457_vm6 = vcmp.lt.s32.totalorder %v5995_v46, %v6499_v21 }
 0x1c3   : > { %v1006_v0 = vsel %vm905_vm9, %v6610_v1, %v807_v3  ;;  %vm7854_vm5 = vcmp.lt.s32.totalorder %v6368_v43, %v3902_v17  ;;  %vm7855_vm3 = vcmp.ge.s32.totalorder %v6368_v43, %v3874_v12  ;;  %3551 = vst.msk [vmem:[%s6537_s25 + $0x90] sm:$0xff] %vm3532_vm1, %v3518_v37  ;;  %v3519_v11 = vsel %vm3455_vm8, %v3487_v61, 0 }
 0x1c4   : > { %vm7033_vm4 = vmand %vm7855_vm3, %vm7854_vm5  ;;  %v3489_v40 = vadd.s32 1, %v5995_v46  ;;  %vm3458_vm9 = vcmp.lt.s32.totalorder %v7858_v59, %v6499_v21  ;;  %vm7859_vm5 = vcmp.lt.s32.totalorder %v6368_v43, %v3910_v19  ;;  %vm7860_vm3 = vcmp.ge.s32.totalorder %v6368_v43, %v3902_v17  ;;  %3552 = vst.msk [vmem:[%s6537_s25 + $0x98] sm:$0xff] %vm3532_vm1, %v3519_v11 }
 0x1c5   : > { %v1205_v28 = vsel %vm7033_vm4, %v6638_v35, %v1006_v0  ;;  %vm1303_vm2 = vmand %vm7860_vm3, %vm7859_vm5  ;;  %vm243_vm8 = vcmp.ge.s32.totalorder %v6382_v49, %v3831_v5  ;;  %vm277_vm0 = vcmp.lt.s32.totalorder %v6382_v49, %v3839_v6  ;;  %v3520_v18 = vsel %vm3456_vm15, %v3488_v51, 0 }
 0x1c6   : > { %v3490_v58 = vadd.s32 1, %v7858_v59  ;;  %vm3459_vm4 = vcmp.lt.s32.totalorder %v6132_v23, %v6499_v21  ;;  %v1404_v52 = vsel %vm1303_vm2, %v6664_v63, %v1205_v28  ;;  %vm1502_vm5 = vmand %vm1436_vm7, %vm1470_vm13  ;;  %vm442_vm3 = vcmp.ge.s32.totalorder %v6382_v49, %v3839_v6  ;;  %3553 = vst.msk [vmem:[%s6537_s25 + $0xa0] sm:$0xff] %vm3532_vm1, %v3520_v18 }
 0x1c7   : > { %v3521_v27 = vsel %vm3457_vm6, %v3489_v40, 0  ;;  %v3491_v53 = vadd.s32 1, %v6132_v23  ;;  %vm3460_vm15 = vcmp.lt.s32.totalorder %v6322_v31, %v6499_v21  ;;  %v1603_v7 = vsel %vm1502_vm5, %v6692_v47, %v1404_v52  ;;  %vm1701_vm13 = vmand %vm1635_vm10, %vm1669_vm12 }
 0x1c8   : > { %3554 = vst.msk [vmem:[%s6537_s25 + $0xa8] sm:$0xff] %vm3532_vm1, %v3521_v27  ;;  %v3522_v46 = vsel %vm3458_vm9, %v3490_v58, 0  ;;  %v3492_v56 = vadd.s32 1, %v6322_v31  ;;  %vm3461_vm7 = vcmp.lt.s32.totalorder %v6368_v43, %v6499_v21  ;;  %v1802_v45 = vsel %vm1701_vm13, %v6718_v34, %v1603_v7 }
 0x1c9   : > { %vm7861_vm6 = vcmp.lt.s32.totalorder %v6368_v43, %v3976_v30  ;;  %vm7862_vm10 = vcmp.ge.s32.totalorder %v6368_v43, %v3945_v26  ;;  %3555 = vst.msk [vmem:[%s6537_s25 + $0xb0] sm:$0xff] %vm3532_vm1, %v3522_v46  ;;  %v3523_v25 = vsel %vm3459_vm4, %v3491_v53, 0  ;;  %v3493_v55 = vadd.s32 1, %v6368_v43 }
 0x1ca   : > { %vm1900_vm12 = vmand %vm7862_vm10, %vm7861_vm6  ;;  %vm3462_vm2 = vcmp.lt.s32.totalorder %v6382_v49, %v6499_v21  ;;  %vm7863_vm9 = vcmp.ge.s32.totalorder %v6368_v43, %v3976_v30  ;;  %3556 = vst.msk [vmem:[%s6537_s25 + $0xb8] sm:$0xff] %vm3532_vm1, %v3523_v25  ;;  %v3524_v23 = vsel %vm3460_vm15, %v3492_v56, 0  ;;  %v3494_v3 = vadd.s32 1, %v6382_v49 }
 0x1cb   : > { %v2001_v61 = vsel %vm1900_vm12, %v6746_v9, %v1802_v45  ;;  %vm2099_vm5 = vmand %vm7863_vm9, %vm2067_vm11  ;;  %vm3463_vm4 = vcmp.lt.s32.totalorder %v6473_v60, %v6499_v21  ;;  %vm7864_vm13 = vcmp.lt.s32.totalorder %v6368_v43, %v4007_v36  ;;  %vm7865_vm11 = vcmp.ge.s32.totalorder %v6368_v43, %v3984_v32  ;;  %3557 = vst.msk [vmem:[%s6537_s25 + $0xc0] sm:$0xff] %vm3532_vm1, %v3524_v23 }
 0x1cc   : > { %v2200_v37 = vsel %vm2099_vm5, %v6772_v2, %v2001_v61  ;;  %vm2298_vm6 = vmand %vm7865_vm11, %vm7864_vm13  ;;  %v3525_v31 = vsel %vm3461_vm7, %v3493_v55, 0  ;;  %v3495_v51 = vadd.s32 1, %v6473_v60  ;;  %vm3464_vm15 = vcmp.lt.s32.totalorder %v6476_v14, %v6499_v21 }
 0x1cd   : > { %v2399_v0 = vsel %vm2298_vm6, %v6800_v13, %v2200_v37  ;;  %vm7866_vm10 = vcmp.lt.s32.totalorder %v6368_v43, %v4015_v38  ;;  %vm7867_vm12 = vcmp.ge.s32.totalorder %v6368_v43, %v4007_v36  ;;  %3558 = vst.msk [vmem:[%s6537_s25 + $0xc8] sm:$0xff] %vm3532_vm1, %v3525_v31  ;;  %v3526_v29 = vsel %vm3462_vm2, %v3494_v3, 0 }
 0x1ce   : > { %vm2497_vm9 = vmand %vm7867_vm12, %vm7866_vm10  ;;  %v3496_v11 = vadd.s32 1, %v6476_v14  ;;  %vm3465_vm7 = vcmp.lt.s32.totalorder %v6479_v33, %v6499_v21  ;;  %vm7868_vm5 = vcmp.ge.s32.totalorder %v6368_v43, %v4015_v38  ;;  %3559 = vst.msk [vmem:[%s6537_s25 + $0xd0] sm:$0xff] %vm3532_vm1, %v3526_v29  ;;  %v3527_v59 = vsel %vm3463_vm4, %v3495_v51, 0 }
 0x1cf   : > { %v2598_v40 = vsel %vm2497_vm9, %v6826_v16, %v2399_v0  ;;  %vm2696_vm13 = vmand %vm7868_vm5, %vm2664_vm14  ;;  %v3497_v28 = vadd.s32 1, %v6479_v33  ;;  %vm3466_vm2 = vcmp.lt.s32.totalorder %v6493_v54, %v6499_v21  ;;  %vm7869_vm11 = vcmp.lt.s32.totalorder %v6368_v43, %v4041_v44  ;;  %3560 = vst.msk [vmem:[%s6537_s25 + $0xd8] sm:$0xff] %vm3532_vm1, %v3527_v59 }
 0x1d0   : > { %v2797_v18 = vsel %vm2696_vm13, %v6854_v57, %v2598_v40  ;;  %vm7870_vm6 = vcmp.ge.s32.totalorder %v6368_v43, %v4033_v42  ;;  %v3528_v58 = vsel %vm3464_vm15, %v3496_v11, 0  ;;  %v3498_v52 = vadd.s32 1, %v6493_v54 }
 0x1d1   : > { %vm2895_vm14 = vmand %vm7870_vm6, %vm7869_vm11  ;;  %vm3467_vm4 = vcmp.lt.s32.totalorder %v6496_v15, %v6499_v21  ;;  %vm7871_vm10 = vcmp.lt.s32.totalorder %v6368_v43, %v4060_v48  ;;  %vm7872_vm12 = vcmp.ge.s32.totalorder %v6368_v43, %v4041_v44  ;;  %vm476_vm5 = vcmp.lt.s32.totalorder %v6382_v49, %v3846_v8  ;;  %3561 = vst.msk [vmem:[%s6537_s25 + $0xe0] sm:$0xff] %vm3532_vm1, %v3528_v58 }
 0x1d2   : > { %v2996_v27 = vsel %vm2895_vm14, %v6880_v41, %v2797_v18  ;;  %vm3094_vm9 = vmand %vm7872_vm12, %vm7871_vm10  ;;  %v3529_v53 = vsel %vm3465_vm7, %v3497_v28, 0  ;;  %v3499_v7 = vadd.s32 1, %v6496_v15  ;;  %vm7873_vm15 = vcmp.lt.s32.totalorder %v6368_v43, %v4068_v50 }
 0x1d3   : > { %v3195_v46 = vsel %vm3094_vm9, %v6908_v22, %v2996_v27  ;;  %vm7874_vm13 = vcmp.ge.s32.totalorder %v6368_v43, %v4060_v48  ;;  %vm641_vm6 = vcmp.ge.s32.totalorder %v6382_v49, %v3846_v8  ;;  %vm675_vm14 = vcmp.lt.s32.totalorder %v6382_v49, %v3867_v10  ;;  %3562 = vst.msk [vmem:[%s6537_s25 + $0xe8] sm:$0xff] %vm3532_vm1, %v3529_v53  ;;  %vm309_vm7 = vmand %vm243_vm8, %vm277_vm0 }
 0x1d4   : > { %vm3293_vm11 = vmand %vm7874_vm13, %vm7873_vm15  ;;  %v3530_v56 = vsel %vm3466_vm2, %v3498_v52, 0  ;;  %vm840_vm10 = vcmp.ge.s32.totalorder %v6382_v49, %v3867_v10  ;;  %vm874_vm12 = vcmp.lt.s32.totalorder %v6382_v49, %v3874_v12  ;;  %v3531_v43 = vsel %vm3467_vm4, %v3499_v7, 0 }
 0x1d5   : > { %v3394_v45 = vsel %vm3293_vm11, %v6934_v62, %v3195_v46  ;;  %3563 = vst.msk [vmem:[%s6537_s25 + $0xf0] sm:$0xff] %vm3532_vm1, %v3530_v56  ;;  %vm7875_vm2 = vcmask 261120   ;;  %v410_v25 = vsel %vm309_vm7, %v6293_v4, 0.0  ;;  %vm508_vm0 = vmand %vm442_vm3, %vm476_vm5  ;;  %vm1039_vm8 = vcmp.ge.s32.totalorder %v6382_v49, %v3874_v12 }
 0x1d6   : > { %3427 = vst.msk [vmem:[%s4087_s23 + $0xc8] sm:$0xff] %vm7875_vm2, %v3394_v45  ;;  %vm1073_vm9 = vcmp.lt.s32.totalorder %v6382_v49, %v3902_v17  ;;  %v609_v21 = vsel %vm508_vm0, %v6310_v20, %v410_v25  ;;  %vm707_vm4 = vmand %vm641_vm6, %vm675_vm14  ;;  %vm1238_vm3 = vcmp.ge.s32.totalorder %v6382_v49, %v3902_v17  ;;  %vm1272_vm5 = vcmp.lt.s32.totalorder %v6382_v49, %v3910_v19 }
 0x1d7   : > { %3564 = vst.msk [vmem:[%s6537_s25 + $0xf8] sm:$0xff] %vm3532_vm1, %v3531_v43  ;;  %v808_v55 = vsel %vm707_vm4, %v6328_v39, %v609_v21  ;;  %vm906_vm1 = vmand %vm840_vm10, %vm874_vm12  ;;  %vm1437_vm15 = vcmp.ge.s32.totalorder %v6382_v49, %v3910_v19  ;;  %vm1471_vm13 = vcmp.lt.s32.totalorder %v6382_v49, %v3937_v24  ;;  %vm1636_vm6 = vcmp.ge.s32.totalorder %v6382_v49, %v3937_v24 }
 0x1d8   : > { %v1007_v61 = vsel %vm906_vm1, %v6610_v1, %v808_v55  ;;  %vm1105_vm11 = vmand %vm1039_vm8, %vm1073_vm9  ;;  %vm1670_vm14 = vcmp.lt.s32.totalorder %v6382_v49, %v3945_v26  ;;  %vm1835_vm10 = vcmp.ge.s32.totalorder %v6382_v49, %v3945_v26  ;;  %vm1869_vm12 = vcmp.lt.s32.totalorder %v6382_v49, %v3976_v30 }
 0x1d9   : > { %v1206_v23 = vsel %vm1105_vm11, %v6638_v35, %v1007_v61  ;;  %vm1304_vm7 = vmand %vm1238_vm3, %vm1272_vm5  ;;  %vm2034_vm0 = vcmp.ge.s32.totalorder %v6382_v49, %v3976_v30  ;;  %vm2068_vm8 = vcmp.lt.s32.totalorder %v6382_v49, %v3984_v32  ;;  %vm2233_vm4 = vcmp.ge.s32.totalorder %v6382_v49, %v3984_v32 }
 0x1da   : > { %v1405_v3 = vsel %vm1304_vm7, %v6664_v63, %v1206_v23  ;;  %vm1503_vm2 = vmand %vm1437_vm15, %vm1471_vm13  ;;  %vm2267_vm3 = vcmp.lt.s32.totalorder %v6382_v49, %v4007_v36  ;;  %vm2432_vm1 = vcmp.ge.s32.totalorder %v6382_v49, %v4007_v36  ;;  %vm2466_vm15 = vcmp.lt.s32.totalorder %v6382_v49, %v4015_v38 }
 0x1db   : > { %v1604_v37 = vsel %vm1503_vm2, %v6692_v47, %v1405_v3  ;;  %vm1702_vm9 = vmand %vm1636_vm6, %vm1670_vm14  ;;  %vm2631_vm11 = vcmp.ge.s32.totalorder %v6382_v49, %v4015_v38  ;;  %vm2665_vm6 = vcmp.lt.s32.totalorder %v6382_v49, %v4033_v42  ;;  %vm2830_vm7 = vcmp.ge.s32.totalorder %v6382_v49, %v4033_v42 }
 0x1dc   : > { %v1803_v31 = vsel %vm1702_vm9, %v6718_v34, %v1604_v37  ;;  %vm1901_vm5 = vmand %vm1835_vm10, %vm1869_vm12  ;;  %vm2864_vm10 = vcmp.lt.s32.totalorder %v6382_v49, %v4041_v44  ;;  %vm3029_vm2 = vcmp.ge.s32.totalorder %v6382_v49, %v4041_v44  ;;  %vm3228_vm9 = vcmp.ge.s32.totalorder %v6382_v49, %v4060_v48 }
 0x1dd   : > { %v2002_v51 = vsel %vm1901_vm5, %v6746_v9, %v1803_v31  ;;  %vm2100_vm13 = vmand %vm2034_vm0, %vm2068_vm8  ;;  %vm3063_vm0 = vcmp.lt.s32.totalorder %v6382_v49, %v4060_v48  ;;  %vm244_vm5 = vcmp.ge.s32.totalorder %v6473_v60, %v3831_v5 }
 0x1de   : > { %v2201_v0 = vsel %vm2100_vm13, %v6772_v2, %v2002_v51  ;;  %vm2299_vm14 = vmand %vm2233_vm4, %vm2267_vm3  ;;  %vm3262_vm4 = vcmp.lt.s32.totalorder %v6382_v49, %v4068_v50  ;;  %vm443_vm13 = vcmp.ge.s32.totalorder %v6473_v60, %v3839_v6 }
 0x1df   : > { %v2400_v29 = vsel %vm2299_vm14, %v6800_v13, %v2201_v0  ;;  %vm2498_vm12 = vmand %vm2432_vm1, %vm2466_vm15  ;;  %vm278_vm1 = vcmp.lt.s32.totalorder %v6473_v60, %v3839_v6  ;;  %vm642_vm14 = vcmp.ge.s32.totalorder %v6473_v60, %v3846_v8 }
 0x1e0   : > { %v2599_v11 = vsel %vm2498_vm12, %v6826_v16, %v2400_v29  ;;  %vm2697_vm8 = vmand %vm2631_vm11, %vm2665_vm6  ;;  %vm477_vm11 = vcmp.lt.s32.totalorder %v6473_v60, %v3846_v8  ;;  %vm841_vm12 = vcmp.ge.s32.totalorder %v6473_v60, %v3867_v10 }
 0x1e1   : > { %v2798_v40 = vsel %vm2697_vm8, %v6854_v57, %v2599_v11  ;;  %vm2896_vm3 = vmand %vm2830_vm7, %vm2864_vm10  ;;  %vm676_vm7 = vcmp.lt.s32.totalorder %v6473_v60, %v3867_v10 }
 0x1e2   : > { %v2997_v59 = vsel %vm2896_vm3, %v6880_v41, %v2798_v40  ;;  %vm3095_vm15 = vmand %vm3029_vm2, %vm3063_vm0  ;;  %vm875_vm2 = vcmp.lt.s32.totalorder %v6473_v60, %v3874_v12  ;;  %vm7876_vm0 = vcmask 261120  }
 0x1e3   : > { %v3196_v49 = vsel %vm3095_vm15, %v6908_v22, %v2997_v59  ;;  %vm3294_vm6 = vmand %vm3228_vm9, %vm3262_vm4  ;;  %vm1040_vm9 = vcmp.ge.s32.totalorder %v6473_v60, %v3874_v12  ;;  %vm1074_vm4 = vcmp.lt.s32.totalorder %v6473_v60, %v3902_v17 }
 0x1e4   : > { %v3395_v28 = vsel %vm3294_vm6, %v6934_v62, %v3196_v49  ;;  %vm310_vm10 = vmand %vm244_vm5, %vm278_vm1  ;;  %vm1239_vm5 = vcmp.ge.s32.totalorder %v6473_v60, %v3902_v17  ;;  %vm1273_vm1 = vcmp.lt.s32.totalorder %v6473_v60, %v3910_v19 }
 0x1e5   : > { %3428 = vst.msk [vmem:[%s4087_s23 + $0xd0] sm:$0xff] %vm7876_vm0, %v3395_v28  ;;  %v411_v18 = vsel %vm310_vm10, %v6293_v4, 0.0  ;;  %vm509_vm8 = vmand %vm443_vm13, %vm477_vm11  ;;  %vm1438_vm13 = vcmp.ge.s32.totalorder %v6473_v60, %v3910_v19  ;;  %vm1472_vm11 = vcmp.lt.s32.totalorder %v6473_v60, %v3937_v24 }
 0x1e6   : > { %v610_v58 = vsel %vm509_vm8, %v6310_v20, %v411_v18  ;;  %vm708_vm3 = vmand %vm642_vm14, %vm676_vm7  ;;  %vm1637_vm14 = vcmp.ge.s32.totalorder %v6473_v60, %v3937_v24  ;;  %vm1671_vm7 = vcmp.lt.s32.totalorder %v6473_v60, %v3945_v26  ;;  %vm2035_vm8 = vcmp.ge.s32.totalorder %v6473_v60, %v3976_v30 }
 0x1e7   : > { %v809_v52 = vsel %vm708_vm3, %v6328_v39, %v610_v58  ;;  %vm907_vm15 = vmand %vm841_vm12, %vm875_vm2  ;;  %vm1836_vm12 = vcmp.ge.s32.totalorder %v6473_v60, %v3945_v26  ;;  %vm1870_vm2 = vcmp.lt.s32.totalorder %v6473_v60, %v3976_v30  ;;  %vm2234_vm3 = vcmp.ge.s32.totalorder %v6473_v60, %v3984_v32  ;;  %v7507_v58 = vld [vmem:[%s7777_s2] ss:$0 sm:$0xff] }
 0x1e8   : > { %v1008_v27 = vsel %vm907_vm15, %v6610_v1, %v809_v52  ;;  %vm1106_vm6 = vmand %vm1040_vm9, %vm1074_vm4  ;;  %vm2069_vm9 = vcmp.lt.s32.totalorder %v6473_v60, %v3984_v32  ;;  %vm2433_vm15 = vcmp.ge.s32.totalorder %v6473_v60, %v4007_v36 }
 0x1e9   : > { %v1207_v53 = vsel %vm1106_vm6, %v6638_v35, %v1008_v27  ;;  %vm1305_vm10 = vmand %vm1239_vm5, %vm1273_vm1  ;;  %vm2268_vm5 = vcmp.lt.s32.totalorder %v6473_v60, %v4007_v36  ;;  %vm2632_vm6 = vcmp.ge.s32.totalorder %v6473_v60, %v4015_v38  ;;  %v7517_v27 = vld [vmem:[%s7777_s2 + $0x1] ss:$0 sm:$0xff] }
 0x1ea   : > { %v1406_v7 = vsel %vm1305_vm10, %v6664_v63, %v1207_v53  ;;  %vm1504_vm0 = vmand %vm1438_vm13, %vm1472_vm11  ;;  %vm2467_vm13 = vcmp.lt.s32.totalorder %v6473_v60, %v4015_v38  ;;  %vm2831_vm10 = vcmp.ge.s32.totalorder %v6473_v60, %v4033_v42 }
 0x1eb   : > { %v1605_v46 = vsel %vm1504_vm0, %v6692_v47, %v1406_v7  ;;  %vm1703_vm4 = vmand %vm1637_vm14, %vm1671_vm7  ;;  %vm2666_vm14 = vcmp.lt.s32.totalorder %v6473_v60, %v4033_v42  ;;  %vm3030_vm0 = vcmp.ge.s32.totalorder %v6473_v60, %v4041_v44  ;;  %v7527_v7 = vld [vmem:[%s7777_s2 + $0x2] ss:$0 sm:$0xff] }
 0x1ec   : > { %v1804_v56 = vsel %vm1703_vm4, %v6718_v34, %v1605_v46  ;;  %vm1902_vm1 = vmand %vm1836_vm12, %vm1870_vm2  ;;  %vm2865_vm12 = vcmp.lt.s32.totalorder %v6473_v60, %v4041_v44  ;;  %vm3229_vm4 = vcmp.ge.s32.totalorder %v6473_v60, %v4060_v48 }
 0x1ed   : > { %v2003_v45 = vsel %vm1902_vm1, %v6746_v9, %v1804_v56  ;;  %vm2101_vm11 = vmand %vm2035_vm8, %vm2069_vm9  ;;  %vm3064_vm8 = vcmp.lt.s32.totalorder %v6473_v60, %v4060_v48  ;;  %vm245_vm1 = vcmp.ge.s32.totalorder %v6476_v14, %v3831_v5 }
 0x1ee   : > { %v2202_v43 = vsel %vm2101_vm11, %v6772_v2, %v2003_v45  ;;  %vm2300_vm7 = vmand %vm2234_vm3, %vm2268_vm5  ;;  %vm3263_vm3 = vcmp.lt.s32.totalorder %v6473_v60, %v4068_v50  ;;  %vm444_vm11 = vcmp.ge.s32.totalorder %v6476_v14, %v3839_v6 }
 0x1ef   : > { %v2401_v25 = vsel %vm2300_vm7, %v6800_v13, %v2202_v43  ;;  %vm2499_vm2 = vmand %vm2433_vm15, %vm2467_vm13  ;;  %vm279_vm15 = vcmp.lt.s32.totalorder %v6476_v14, %v3839_v6  ;;  %vm643_vm7 = vcmp.ge.s32.totalorder %v6476_v14, %v3846_v8 }
 0x1f0   : > { %v2600_v21 = vsel %vm2499_vm2, %v6826_v16, %v2401_v25  ;;  %vm2698_vm9 = vmand %vm2632_vm6, %vm2666_vm14  ;;  %vm478_vm6 = vcmp.lt.s32.totalorder %v6476_v14, %v3846_v8  ;;  %vm842_vm2 = vcmp.ge.s32.totalorder %v6476_v14, %v3867_v10 }
 0x1f1   : > { %v2799_v55 = vsel %vm2698_vm9, %v6854_v57, %v2600_v21  ;;  %vm2897_vm5 = vmand %vm2831_vm10, %vm2865_vm12  ;;  %vm677_vm10 = vcmp.lt.s32.totalorder %v6476_v14, %v3867_v10 }
 0x1f2   : > { %v2998_v61 = vsel %vm2897_vm5, %v6880_v41, %v2799_v55  ;;  %vm3096_vm13 = vmand %vm3030_vm0, %vm3064_vm8  ;;  %vm876_vm0 = vcmp.lt.s32.totalorder %v6476_v14, %v3874_v12  ;;  %vm7877_vm8 = vcmask 261120  }
 0x1f3   : > { %v3197_v60 = vsel %vm3096_vm13, %v6908_v22, %v2998_v61  ;;  %vm3295_vm14 = vmand %vm3229_vm4, %vm3263_vm3  ;;  %vm1041_vm4 = vcmp.ge.s32.totalorder %v6476_v14, %v3874_v12  ;;  %vm1075_vm3 = vcmp.lt.s32.totalorder %v6476_v14, %v3902_v17 }
 0x1f4   : > { %v3396_v23 = vsel %vm3295_vm14, %v6934_v62, %v3197_v60  ;;  %vm311_vm12 = vmand %vm245_vm1, %vm279_vm15  ;;  %vm1240_vm1 = vcmp.ge.s32.totalorder %v6476_v14, %v3902_v17  ;;  %vm1274_vm15 = vcmp.lt.s32.totalorder %v6476_v14, %v3910_v19 }
 0x1f5   : > { %3429 = vst.msk [vmem:[%s4087_s23 + $0xd8] sm:$0xff] %vm7877_vm8, %v3396_v23  ;;  %v412_v3 = vsel %vm311_vm12, %v6293_v4, 0.0  ;;  %vm510_vm9 = vmand %vm444_vm11, %vm478_vm6  ;;  %vm1439_vm11 = vcmp.ge.s32.totalorder %v6476_v14, %v3910_v19  ;;  %vm1473_vm6 = vcmp.lt.s32.totalorder %v6476_v14, %v3937_v24 }
 0x1f6   : > { %v611_v37 = vsel %vm510_vm9, %v6310_v20, %v412_v3  ;;  %vm709_vm5 = vmand %vm643_vm7, %vm677_vm10  ;;  %vm1638_vm7 = vcmp.ge.s32.totalorder %v6476_v14, %v3937_v24  ;;  %vm1672_vm10 = vcmp.lt.s32.totalorder %v6476_v14, %v3945_v26  ;;  %vm2036_vm9 = vcmp.ge.s32.totalorder %v6476_v14, %v3976_v30 }
 0x1f7   : > { %v810_v31 = vsel %vm709_vm5, %v6328_v39, %v611_v37  ;;  %vm908_vm13 = vmand %vm842_vm2, %vm876_vm0  ;;  %vm1837_vm2 = vcmp.ge.s32.totalorder %v6476_v14, %v3945_v26  ;;  %vm1871_vm0 = vcmp.lt.s32.totalorder %v6476_v14, %v3976_v30  ;;  %vm2235_vm5 = vcmp.ge.s32.totalorder %v6476_v14, %v3984_v32 }
 0x1f8   : > { %v1009_v4 = vsel %vm908_vm13, %v6610_v1, %v810_v31  ;;  %vm1107_vm14 = vmand %vm1041_vm4, %vm1075_vm3  ;;  %vm2070_vm4 = vcmp.lt.s32.totalorder %v6476_v14, %v3984_v32  ;;  %vm2434_vm13 = vcmp.ge.s32.totalorder %v6476_v14, %v4007_v36 }
 0x1f9   : > { %v1208_v20 = vsel %vm1107_vm14, %v6638_v35, %v1009_v4  ;;  %vm1306_vm12 = vmand %vm1240_vm1, %vm1274_vm15  ;;  %vm2269_vm1 = vcmp.lt.s32.totalorder %v6476_v14, %v4007_v36  ;;  %vm2633_vm14 = vcmp.ge.s32.totalorder %v6476_v14, %v4015_v38 }
 0x1fa   : > { %v1407_v39 = vsel %vm1306_vm12, %v6664_v63, %v1208_v20  ;;  %vm1505_vm8 = vmand %vm1439_vm11, %vm1473_vm6  ;;  %vm2468_vm11 = vcmp.lt.s32.totalorder %v6476_v14, %v4015_v38  ;;  %vm2832_vm12 = vcmp.ge.s32.totalorder %v6476_v14, %v4033_v42 }
 0x1fb   : > { %v1606_v51 = vsel %vm1505_vm8, %v6692_v47, %v1407_v39  ;;  %vm1704_vm3 = vmand %vm1638_vm7, %vm1672_vm10  ;;  %vm2667_vm7 = vcmp.lt.s32.totalorder %v6476_v14, %v4033_v42  ;;  %vm3031_vm8 = vcmp.ge.s32.totalorder %v6476_v14, %v4041_v44 }
 0x1fc   : > { %v1805_v0 = vsel %vm1704_vm3, %v6718_v34, %v1606_v51  ;;  %vm1903_vm15 = vmand %vm1837_vm2, %vm1871_vm0  ;;  %vm2866_vm2 = vcmp.lt.s32.totalorder %v6476_v14, %v4041_v44  ;;  %vm3230_vm3 = vcmp.ge.s32.totalorder %v6476_v14, %v4060_v48 }
 0x1fd   : > { %v2004_v29 = vsel %vm1903_vm15, %v6746_v9, %v1805_v0  ;;  %vm2102_vm6 = vmand %vm2036_vm9, %vm2070_vm4  ;;  %vm3065_vm9 = vcmp.lt.s32.totalorder %v6476_v14, %v4060_v48  ;;  %vm246_vm15 = vcmp.ge.s32.totalorder %v6479_v33, %v3831_v5 }
 0x1fe   : > { %v2203_v11 = vsel %vm2102_vm6, %v6772_v2, %v2004_v29  ;;  %vm2301_vm10 = vmand %vm2235_vm5, %vm2269_vm1  ;;  %vm3264_vm5 = vcmp.lt.s32.totalorder %v6476_v14, %v4068_v50  ;;  %vm445_vm6 = vcmp.ge.s32.totalorder %v6479_v33, %v3839_v6 }
 0x1ff   : > { %v2402_v40 = vsel %vm2301_vm10, %v6800_v13, %v2203_v11  ;;  %vm2500_vm0 = vmand %vm2434_vm13, %vm2468_vm11  ;;  %vm280_vm13 = vcmp.lt.s32.totalorder %v6479_v33, %v3839_v6  ;;  %vm644_vm10 = vcmp.ge.s32.totalorder %v6479_v33, %v3846_v8  ;;  %v3749_v11 = vld [vmem:[%s7777_s2 + $0x6] ss:$0 sm:$0xff] }
 0x200   : > { %v2601_v59 = vsel %vm2500_vm0, %v6826_v16, %v2402_v40  ;;  %vm2699_vm4 = vmand %vm2633_vm14, %vm2667_vm7  ;;  %vm479_vm14 = vcmp.lt.s32.totalorder %v6479_v33, %v3846_v8  ;;  %vm843_vm0 = vcmp.ge.s32.totalorder %v6479_v33, %v3867_v10  ;;  %v3750_v40 = vld [vmem:[%s7777_s2 + $0x7] ss:$0 sm:$0xff] }
 0x201   : > { %v2800_v49 = vsel %vm2699_vm4, %v6854_v57, %v2601_v59  ;;  %vm2898_vm1 = vmand %vm2832_vm12, %vm2866_vm2  ;;  %vm678_vm12 = vcmp.lt.s32.totalorder %v6479_v33, %v3867_v10  ;;  %v3751_v59 = vld [vmem:[%s7777_s2 + $0x8] ss:$0 sm:$0xff] }
 0x202   : > { %v2999_v28 = vsel %vm2898_vm1, %v6880_v41, %v2800_v49  ;;  %vm3097_vm11 = vmand %vm3031_vm8, %vm3065_vm9  ;;  %vm877_vm8 = vcmp.lt.s32.totalorder %v6479_v33, %v3874_v12  ;;  %vm7878_vm9 = vcmask 261120   ;;  %v3752_v49 = vld [vmem:[%s7777_s2 + $0x9] ss:$0 sm:$0xff] }
 0x203   : > { %v3198_v14 = vsel %vm3097_vm11, %v6908_v22, %v2999_v28  ;;  %vm3296_vm7 = vmand %vm3230_vm3, %vm3264_vm5  ;;  %vm1042_vm3 = vcmp.ge.s32.totalorder %v6479_v33, %v3874_v12  ;;  %vm1076_vm5 = vcmp.lt.s32.totalorder %v6479_v33, %v3902_v17  ;;  %v3753_v28 = vld [vmem:[%s7777_s2 + $0xa] ss:$0 sm:$0xff] }
 0x204   : > { %v3397_v18 = vsel %vm3296_vm7, %v6934_v62, %v3198_v14  ;;  %vm312_vm2 = vmand %vm246_vm15, %vm280_vm13  ;;  %vm1241_vm15 = vcmp.ge.s32.totalorder %v6479_v33, %v3902_v17  ;;  %vm1275_vm13 = vcmp.lt.s32.totalorder %v6479_v33, %v3910_v19 }
 0x205   : > { %3430 = vst.msk [vmem:[%s4087_s23 + $0xe0] sm:$0xff] %vm7878_vm9, %v3397_v18  ;;  %v413_v52 = vsel %vm312_vm2, %v7507_v58, 0.0  ;;  %vm511_vm4 = vmand %vm445_vm6, %vm479_vm14  ;;  %vm1440_vm6 = vcmp.ge.s32.totalorder %v6479_v33, %v3910_v19  ;;  %vm1474_vm14 = vcmp.lt.s32.totalorder %v6479_v33, %v3937_v24  ;;  %v3755_v18 = vld [vmem:[%s7777_s2 + $0xc] ss:$0 sm:$0xff] }
 0x206   : > { %v612_v53 = vsel %vm511_vm4, %v7517_v27, %v413_v52  ;;  %vm710_vm1 = vmand %vm644_vm10, %vm678_vm12  ;;  %vm1639_vm10 = vcmp.ge.s32.totalorder %v6479_v33, %v3937_v24  ;;  %vm1673_vm12 = vcmp.lt.s32.totalorder %v6479_v33, %v3945_v26  ;;  %vm2037_vm4 = vcmp.ge.s32.totalorder %v6479_v33, %v3976_v30 }
 0x207   : > { %v811_v46 = vsel %vm710_vm1, %v7527_v7, %v612_v53  ;;  %vm909_vm11 = vmand %vm843_vm0, %vm877_vm8  ;;  %vm1838_vm0 = vcmp.ge.s32.totalorder %v6479_v33, %v3945_v26  ;;  %vm1872_vm8 = vcmp.lt.s32.totalorder %v6479_v33, %v3976_v30  ;;  %vm2236_vm1 = vcmp.ge.s32.totalorder %v6479_v33, %v3984_v32 }
 0x208   : > { %v1010_v56 = vsel %vm909_vm11, %v6610_v1, %v811_v46  ;;  %vm1108_vm7 = vmand %vm1042_vm3, %vm1076_vm5  ;;  %vm2071_vm3 = vcmp.lt.s32.totalorder %v6479_v33, %v3984_v32  ;;  %vm2435_vm11 = vcmp.ge.s32.totalorder %v6479_v33, %v4007_v36 }
 0x209   : > { %v1209_v45 = vsel %vm1108_vm7, %v6638_v35, %v1010_v56  ;;  %vm1307_vm2 = vmand %vm1241_vm15, %vm1275_vm13  ;;  %vm2270_vm15 = vcmp.lt.s32.totalorder %v6479_v33, %v4007_v36  ;;  %vm2634_vm7 = vcmp.ge.s32.totalorder %v6479_v33, %v4015_v38 }
 0x20a   : > { %v1408_v43 = vsel %vm1307_vm2, %v6664_v63, %v1209_v45  ;;  %vm1506_vm9 = vmand %vm1440_vm6, %vm1474_vm14  ;;  %vm2469_vm6 = vcmp.lt.s32.totalorder %v6479_v33, %v4015_v38  ;;  %vm2833_vm2 = vcmp.ge.s32.totalorder %v6479_v33, %v4033_v42 }
 0x20b   : > { %v1607_v25 = vsel %vm1506_vm9, %v6692_v47, %v1408_v43  ;;  %vm1705_vm5 = vmand %vm1639_vm10, %vm1673_vm12  ;;  %vm2668_vm10 = vcmp.lt.s32.totalorder %v6479_v33, %v4033_v42  ;;  %vm3032_vm9 = vcmp.ge.s32.totalorder %v6479_v33, %v4041_v44 }
 0x20c   : > { %v1806_v21 = vsel %vm1705_vm5, %v6718_v34, %v1607_v25  ;;  %vm1904_vm13 = vmand %vm1838_vm0, %vm1872_vm8  ;;  %vm2867_vm0 = vcmp.lt.s32.totalorder %v6479_v33, %v4041_v44  ;;  %vm3231_vm5 = vcmp.ge.s32.totalorder %v6479_v33, %v4060_v48 }
 0x20d   : > { %v2005_v55 = vsel %vm1904_vm13, %v6746_v9, %v1806_v21  ;;  %vm2103_vm14 = vmand %vm2037_vm4, %vm2071_vm3  ;;  %vm3066_vm4 = vcmp.lt.s32.totalorder %v6479_v33, %v4060_v48  ;;  %vm247_vm13 = vcmp.ge.s32.totalorder %v6493_v54, %v3831_v5 }
 0x20e   : > { %v2204_v61 = vsel %vm2103_vm14, %v6772_v2, %v2005_v55  ;;  %vm2302_vm12 = vmand %vm2236_vm1, %vm2270_vm15  ;;  %vm3265_vm1 = vcmp.lt.s32.totalorder %v6479_v33, %v4068_v50  ;;  %vm446_vm14 = vcmp.ge.s32.totalorder %v6493_v54, %v3839_v6 }
 0x20f   : > { %v2403_v60 = vsel %vm2302_vm12, %v6800_v13, %v2204_v61  ;;  %vm2501_vm8 = vmand %vm2435_vm11, %vm2469_vm6  ;;  %vm281_vm11 = vcmp.lt.s32.totalorder %v6493_v54, %v3839_v6  ;;  %vm645_vm12 = vcmp.ge.s32.totalorder %v6493_v54, %v3846_v8 }
 0x210   : > { %v2602_v23 = vsel %vm2501_vm8, %v6826_v16, %v2403_v60  ;;  %vm2700_vm3 = vmand %vm2634_vm7, %vm2668_vm10  ;;  %vm480_vm7 = vcmp.lt.s32.totalorder %v6493_v54, %v3846_v8  ;;  %vm844_vm8 = vcmp.ge.s32.totalorder %v6493_v54, %v3867_v10 }
 0x211   : > { %v2801_v3 = vsel %vm2700_vm3, %v6854_v57, %v2602_v23  ;;  %vm2899_vm15 = vmand %vm2833_vm2, %vm2867_vm0  ;;  %vm679_vm2 = vcmp.lt.s32.totalorder %v6493_v54, %v3867_v10 }
 0x212   : > { %v3000_v37 = vsel %vm2899_vm15, %v6880_v41, %v2801_v3  ;;  %vm3098_vm6 = vmand %vm3032_vm9, %vm3066_vm4  ;;  %vm878_vm9 = vcmp.lt.s32.totalorder %v6493_v54, %v3874_v12  ;;  %vm7879_vm4 = vcmask 261120  }
 0x213   : > { %v3199_v33 = vsel %vm3098_vm6, %v6908_v22, %v3000_v37  ;;  %vm3297_vm10 = vmand %vm3231_vm5, %vm3265_vm1  ;;  %vm1043_vm5 = vcmp.ge.s32.totalorder %v6493_v54, %v3874_v12  ;;  %vm1077_vm1 = vcmp.lt.s32.totalorder %v6493_v54, %v3902_v17 }
 0x214   : > { %v3398_v31 = vsel %vm3297_vm10, %v6934_v62, %v3199_v33  ;;  %vm313_vm0 = vmand %vm247_vm13, %vm281_vm11  ;;  %vm1242_vm13 = vcmp.ge.s32.totalorder %v6493_v54, %v3902_v17  ;;  %vm1276_vm11 = vcmp.lt.s32.totalorder %v6493_v54, %v3910_v19 }
 0x215   : > { %3431 = vst.msk [vmem:[%s4087_s23 + $0xe8] sm:$0xff] %vm7879_vm4, %v3398_v31  ;;  %v414_v4 = vsel %vm313_vm0, %v7507_v58, 0.0  ;;  %vm512_vm3 = vmand %vm446_vm14, %vm480_vm7  ;;  %vm1441_vm14 = vcmp.ge.s32.totalorder %v6493_v54, %v3910_v19  ;;  %vm1475_vm7 = vcmp.lt.s32.totalorder %v6493_v54, %v3937_v24 }
 0x216   : > { %v613_v20 = vsel %vm512_vm3, %v7517_v27, %v414_v4  ;;  %vm711_vm15 = vmand %vm645_vm12, %vm679_vm2  ;;  %vm1640_vm12 = vcmp.ge.s32.totalorder %v6493_v54, %v3937_v24  ;;  %vm1674_vm2 = vcmp.lt.s32.totalorder %v6493_v54, %v3945_v26  ;;  %vm2038_vm3 = vcmp.ge.s32.totalorder %v6493_v54, %v3976_v30 }
 0x217   : > { %v812_v39 = vsel %vm711_vm15, %v7527_v7, %v613_v20  ;;  %vm910_vm6 = vmand %vm844_vm8, %vm878_vm9  ;;  %vm1839_vm8 = vcmp.ge.s32.totalorder %v6493_v54, %v3945_v26  ;;  %vm1873_vm9 = vcmp.lt.s32.totalorder %v6493_v54, %v3976_v30  ;;  %vm2237_vm15 = vcmp.ge.s32.totalorder %v6493_v54, %v3984_v32 }
 0x218   : > { %v1011_v51 = vsel %vm910_vm6, %v6610_v1, %v812_v39  ;;  %vm1109_vm10 = vmand %vm1043_vm5, %vm1077_vm1  ;;  %vm2072_vm5 = vcmp.lt.s32.totalorder %v6493_v54, %v3984_v32  ;;  %vm2436_vm6 = vcmp.ge.s32.totalorder %v6493_v54, %v4007_v36 }
 0x219   : > { %v1210_v0 = vsel %vm1109_vm10, %v6638_v35, %v1011_v51  ;;  %vm1308_vm0 = vmand %vm1242_vm13, %vm1276_vm11  ;;  %vm2271_vm13 = vcmp.lt.s32.totalorder %v6493_v54, %v4007_v36  ;;  %vm2635_vm10 = vcmp.ge.s32.totalorder %v6493_v54, %v4015_v38 }
 0x21a   : > { %v1409_v29 = vsel %vm1308_vm0, %v6664_v63, %v1210_v0  ;;  %vm1507_vm4 = vmand %vm1441_vm14, %vm1475_vm7  ;;  %vm2470_vm14 = vcmp.lt.s32.totalorder %v6493_v54, %v4015_v38  ;;  %vm2834_vm0 = vcmp.ge.s32.totalorder %v6493_v54, %v4033_v42 }
 0x21b   : > { %v1608_v1 = vsel %vm1507_vm4, %v6692_v47, %v1409_v29  ;;  %vm1706_vm1 = vmand %vm1640_vm12, %vm1674_vm2  ;;  %vm2669_vm12 = vcmp.lt.s32.totalorder %v6493_v54, %v4033_v42  ;;  %vm3033_vm4 = vcmp.ge.s32.totalorder %v6493_v54, %v4041_v44 }
 0x21c   : > { %v1807_v35 = vsel %vm1706_vm1, %v6718_v34, %v1608_v1  ;;  %vm1905_vm11 = vmand %vm1839_vm8, %vm1873_vm9  ;;  %vm2868_vm8 = vcmp.lt.s32.totalorder %v6493_v54, %v4041_v44  ;;  %vm3232_vm1 = vcmp.ge.s32.totalorder %v6493_v54, %v4060_v48 }
 0x21d   : > { %v2006_v63 = vsel %vm1905_vm11, %v6746_v9, %v1807_v35  ;;  %vm2104_vm7 = vmand %vm2038_vm3, %vm2072_vm5  ;;  %vm3067_vm3 = vcmp.lt.s32.totalorder %v6493_v54, %v4060_v48  ;;  %vm248_vm11 = vcmp.ge.s32.totalorder %v6496_v15, %v3831_v5 }
 0x21e   : > { %v2205_v47 = vsel %vm2104_vm7, %v6772_v2, %v2006_v63  ;;  %vm2303_vm2 = vmand %vm2237_vm15, %vm2271_vm13  ;;  %vm3266_vm15 = vcmp.lt.s32.totalorder %v6493_v54, %v4068_v50  ;;  %vm447_vm7 = vcmp.ge.s32.totalorder %v6496_v15, %v3839_v6 }
 0x21f   : > { %v2404_v34 = vsel %vm2303_vm2, %v6800_v13, %v2205_v47  ;;  %vm2502_vm9 = vmand %vm2436_vm6, %vm2470_vm14  ;;  %vm282_vm6 = vcmp.lt.s32.totalorder %v6496_v15, %v3839_v6  ;;  %vm646_vm2 = vcmp.ge.s32.totalorder %v6496_v15, %v3846_v8 }
 0x220   : > { %v2603_v9 = vsel %vm2502_vm9, %v6826_v16, %v2404_v34  ;;  %vm2701_vm5 = vmand %vm2635_vm10, %vm2669_vm12  ;;  %vm481_vm10 = vcmp.lt.s32.totalorder %v6496_v15, %v3846_v8  ;;  %vm845_vm9 = vcmp.ge.s32.totalorder %v6496_v15, %v3867_v10 }
 0x221   : > { %v2802_v2 = vsel %vm2701_vm5, %v6854_v57, %v2603_v9  ;;  %vm2900_vm13 = vmand %vm2834_vm0, %vm2868_vm8  ;;  %vm680_vm0 = vcmp.lt.s32.totalorder %v6496_v15, %v3867_v10  ;;  %v3748_v57 = vld [vmem:[%s7777_s2 + $0x5] ss:$0 sm:$0xff] }
 0x222   : > { %v3001_v13 = vsel %vm2900_vm13, %v6880_v41, %v2802_v2  ;;  %vm3099_vm14 = vmand %vm3033_vm4, %vm3067_vm3  ;;  %vm879_vm4 = vcmp.lt.s32.totalorder %v6496_v15, %v3874_v12  ;;  %vm7880_vm3 = vcmask 261120  }
 0x223   : > { %v3200_v54 = vsel %vm3099_vm14, %v6908_v22, %v3001_v13  ;;  %vm3298_vm12 = vmand %vm3232_vm1, %vm3266_vm15  ;;  %vm1044_vm1 = vcmp.ge.s32.totalorder %v6496_v15, %v3874_v12  ;;  %vm1078_vm15 = vcmp.lt.s32.totalorder %v6496_v15, %v3902_v17  ;;  %v3746_v12 = vld [vmem:[%s7777_s2 + $0x3] ss:$0 sm:$0xff] }
 0x224   : > { %v3399_v5 = vsel %vm3298_vm12, %v6934_v62, %v3200_v54  ;;  %vm314_vm8 = vmand %vm248_vm11, %vm282_vm6  ;;  %vm1243_vm11 = vcmp.ge.s32.totalorder %v6496_v15, %v3902_v17  ;;  %vm1277_vm6 = vcmp.lt.s32.totalorder %v6496_v15, %v3910_v19  ;;  %v3747_v17 = vld [vmem:[%s7777_s2 + $0x4] ss:$0 sm:$0xff] }
 0x225   : > { %3432 = vst.msk [vmem:[%s4087_s23 + $0xf0] sm:$0xff] %vm7880_vm3, %v3399_v5  ;;  %v415_v6 = vsel %vm314_vm8, %v7507_v58, 0.0  ;;  %vm513_vm5 = vmand %vm447_vm7, %vm481_vm10  ;;  %vm1442_vm7 = vcmp.ge.s32.totalorder %v6496_v15, %v3910_v19  ;;  %vm1476_vm10 = vcmp.lt.s32.totalorder %v6496_v15, %v3937_v24 }
 0x226   : > { %v614_v8 = vsel %vm513_vm5, %v7517_v27, %v415_v6  ;;  %vm712_vm13 = vmand %vm646_vm2, %vm680_vm0  ;;  %vm1641_vm2 = vcmp.ge.s32.totalorder %v6496_v15, %v3937_v24  ;;  %vm1675_vm0 = vcmp.lt.s32.totalorder %v6496_v15, %v3945_v26  ;;  %vm2039_vm5 = vcmp.ge.s32.totalorder %v6496_v15, %v3976_v30 }
 0x227   : > { %v813_v10 = vsel %vm712_vm13, %v7527_v7, %v614_v8  ;;  %vm911_vm14 = vmand %vm845_vm9, %vm879_vm4  ;;  %vm1840_vm9 = vcmp.ge.s32.totalorder %v6496_v15, %v3945_v26  ;;  %vm1874_vm4 = vcmp.lt.s32.totalorder %v6496_v15, %v3976_v30  ;;  %vm2238_vm13 = vcmp.ge.s32.totalorder %v6496_v15, %v3984_v32 }
 0x228   : > { %v1012_v16 = vsel %vm911_vm14, %v3746_v12, %v813_v10  ;;  %vm1110_vm12 = vmand %vm1044_vm1, %vm1078_vm15  ;;  %vm2073_vm1 = vcmp.lt.s32.totalorder %v6496_v15, %v3984_v32  ;;  %vm2437_vm14 = vcmp.ge.s32.totalorder %v6496_v15, %v4007_v36 }
 0x229   : > { %v1211_v19 = vsel %vm1110_vm12, %v3747_v17, %v1012_v16  ;;  %vm1309_vm8 = vmand %vm1243_vm11, %vm1277_vm6  ;;  %vm2272_vm11 = vcmp.lt.s32.totalorder %v6496_v15, %v4007_v36  ;;  %vm2636_vm12 = vcmp.ge.s32.totalorder %v6496_v15, %v4015_v38 }
 0x22a   : > { %v1410_v24 = vsel %vm1309_vm8, %v3748_v57, %v1211_v19  ;;  %vm1508_vm3 = vmand %vm1442_vm7, %vm1476_vm10  ;;  %vm2471_vm7 = vcmp.lt.s32.totalorder %v6496_v15, %v4015_v38  ;;  %vm2835_vm8 = vcmp.ge.s32.totalorder %v6496_v15, %v4033_v42 }
 0x22b   : > { %v1609_v26 = vsel %vm1508_vm3, %v3749_v11, %v1410_v24  ;;  %vm1707_vm15 = vmand %vm1641_vm2, %vm1675_vm0  ;;  %vm2670_vm2 = vcmp.lt.s32.totalorder %v6496_v15, %v4033_v42  ;;  %vm3034_vm3 = vcmp.ge.s32.totalorder %v6496_v15, %v4041_v44  ;;  %v3754_v42 = vld [vmem:[%s7777_s2 + $0xb] ss:$0 sm:$0xff] }
 0x22c   : > { %v1808_v30 = vsel %vm1707_vm15, %v3750_v40, %v1609_v26  ;;  %vm1906_vm6 = vmand %vm1840_vm9, %vm1874_vm4  ;;  %vm2869_vm9 = vcmp.lt.s32.totalorder %v6496_v15, %v4041_v44  ;;  %vm3233_vm15 = vcmp.ge.s32.totalorder %v6496_v15, %v4060_v48 }
 0x22d   : > { %v2007_v32 = vsel %vm1906_vm6, %v3751_v59, %v1808_v30  ;;  %vm2105_vm10 = vmand %vm2039_vm5, %vm2073_vm1  ;;  %vm3068_vm5 = vcmp.lt.s32.totalorder %v6496_v15, %v4060_v48 }
 0x22e   : > { %v2206_v36 = vsel %vm2105_vm10, %v3752_v49, %v2007_v32  ;;  %vm2304_vm0 = vmand %vm2238_vm13, %vm2272_vm11  ;;  %vm3267_vm13 = vcmp.lt.s32.totalorder %v6496_v15, %v4068_v50 }
 0x22f   : > { %v2405_v38 = vsel %vm2304_vm0, %v3753_v28, %v2206_v36  ;;  %vm2503_vm4 = vmand %vm2437_vm14, %vm2471_vm7  ;;  %vm7881_vm7 = vcmask 261120  }
 0x230   : > { %v2604_v14 = vsel %vm2503_vm4, %v3754_v42, %v2405_v38  ;;  %vm2702_vm1 = vmand %vm2636_vm12, %vm2670_vm2 }
 0x231   : > { %v2803_v44 = vsel %vm2702_vm1, %v3755_v18, %v2604_v14  ;;  %vm2901_vm11 = vmand %vm2835_vm8, %vm2869_vm9 }
 0x232   : > { %v3002_v58 = vsel %vm2901_vm11, %v6880_v41, %v2803_v44  ;;  %vm3100_vm6 = vmand %vm3034_vm3, %vm3068_vm5 }
 0x233   : > { %v3201_v52 = vsel %vm3100_vm6, %v6908_v22, %v3002_v58  ;;  %vm3299_vm14 = vmand %vm3233_vm15, %vm3267_vm13 }
 0x234   : > { %v3400_v27 = vsel %vm3299_vm14, %v6934_v62, %v3201_v52 }
 0x235   : > { %3433 = vst.msk [vmem:[%s4087_s23 + $0xf8] sm:$0xff] %vm7881_vm7, %v3400_v27 }
 0x236 PF: > { %s22_s22 = sadd.s32 1, %s3776_s22  }
 0x237   : > { %p19_p9 = scmp.ge.s32.totalorder %s22_s22, 10  }
 0x239   :  { %21 = sbr.rel (!%p19_p9) target bundleno = 16 (0x10), region = 63 }

</bundles_post_ra>
